<compile_context>
chip_gen: v7x
topology: tpu7x:2x2x1
jax: 0.10.0
libtpu: 0.0.40
codegen_flags: <defaults>
</compile_context>

<pallas_src>
import functools

import jax
import jax.numpy as jnp
from jax.experimental import pallas as pl
from jax.experimental.pallas import tpu as pltpu


def _round_up(x, m):
    return ((x + m - 1) // m) * m


def _cdiv(a, b):
    return (a + b - 1) // b


def conv_bn_relu_kernel(x_ref, w_ref, shift_ref, o_ref, *, kh_size, kw_size,
                        ow, stride):
    """One output row-block of the fused Conv2d + BN(eval) + ReLU.

    x_ref:     [KH, TR, Wp, Cin]        bf16  per-kh shifted input rows
    w_ref:     [KH, KW, Cin, COUT_PAD]  bf16  (BN scale folded in)
    shift_ref: [1, COUT_PAD]            f32   (bias - mean) * scale + beta
    o_ref:     [TR*OW, COUT_PAD]        bf16
    """
    tr = x_ref.shape[1]
    cout = o_ref.shape[1]
    acc = jnp.zeros((tr * ow, cout), jnp.float32)
    for kh in range(kh_size):
        x_kh = x_ref[kh]                          # [TR, Wp, Cin]
        for kw in range(kw_size):
            if stride == 1:
                xs = x_kh[:, kw:kw + ow, :]       # [TR, OW, Cin]
            else:
                # TODO(synk): strided-W tap path (stride > 1) is not exercised
                # by the demo shapes.
                xs = x_ref[kh, :, pl.ds(kw, ow, stride=stride), :]
            lhs = xs.reshape(tr * ow, xs.shape[-1])
            acc = acc + jnp.dot(lhs, w_ref[kh, kw],
                                preferred_element_type=jnp.float32)
    y = acc + shift_ref[...]
    o_ref[...] = jnp.maximum(y, 0.0).astype(o_ref.dtype)


def basic_conv2d(x_nchw, weight, bias, gamma, beta, running_mean, running_var,
                 *, stride=1, padding=1, eps=1e-5,
                 vmem_budget_bytes=20 * 1024 * 1024):
    """Conv2d(bias=True) -> BatchNorm2d(eval) -> ReLU.

    x_nchw : [N, Cin, H, W]
    weight : [Cout, Cin, KH, KW]   (PyTorch conv weight layout)
    """
    N, Cin, H, W = x_nchw.shape
    Cout, _, KH, KW = weight.shape
    OH = (H + 2 * padding - KH) // stride + 1
    OW = (W + 2 * padding - KW) // stride + 1
    Wp = W + 2 * padding
    R = N * OH
    M = N * OH * OW

    # ---- glue (all bf16): NCHW -> NHWC, spatial pad, per-kh tap stack ----
    x_nhwc = jnp.transpose(x_nchw.astype(jnp.bfloat16), (0, 2, 3, 1))
    x_pad = jnp.pad(x_nhwc, ((0, 0), (padding, padding),
                             (padding, padding), (0, 0)))
    taps = [x_pad[:, kh:kh + stride * (OH - 1) + 1:stride, :, :]
            for kh in range(KH)]
    x_taps = jnp.stack(taps, axis=0).reshape(KH, R, Wp, Cin)   # [KH,R,Wp,Cin]

    # ---- fold conv bias + BN(eval) into weight scale & output shift ----
    scale = gamma / jnp.sqrt(running_var + eps)                # [Cout]
    shift = (bias - running_mean) * scale + beta               # [Cout]

    cout_pad = _round_up(Cout, 128)                  # lane-dense output stores
    cout_256 = _round_up(Cout, 256)
    if cout_256 != cout_pad and cout_256 <= int(1.125 * cout_pad):
        cout_pad = cout_256                          # fill 256-wide MXU halves

    w_t = jnp.transpose(weight, (2, 3, 1, 0)) * scale          # [KH,KW,Cin,Cout]
    w_t = jnp.pad(w_t, ((0, 0), (0, 0), (0, 0), (0, cout_pad - Cout)))
    w_t = w_t.astype(jnp.bfloat16)
    shift2d = jnp.pad(shift, (0, cout_pad - Cout)).reshape(1, cout_pad)
    shift2d = shift2d.astype(jnp.float32)

    # ---- row-tile selection with full VMEM accounting ----
    cin_v = _round_up(Cin, 128)          # lane-padded VMEM width of x tiles
    wp_v = _round_up(Wp, 16)             # bf16 sublane-padded
    per_row = (2 * KH * wp_v * cin_v * 2         # x block, double-buffered, bf16
               + 2 * OW * cout_pad * 2           # out block, double-buffered, bf16
               + OW * cout_pad * 4)              # f32 accumulator
    fixed = (2 * KH * KW * _round_up(Cin, 16) * cout_pad * 2   # weights (x2 buf)
             + 2 * 8 * cout_pad * 4)                           # shift
    max_tr = max(8, ((vmem_budget_bytes - fixed) // per_row) // 8 * 8)
    tr = max(8, _round_up(_cdiv(512, OW), 8))    # target ~512 output rows/step
    tr = min(tr, max_tr)
    if _cdiv(R, tr) < 2 and R > 8:               # grid >= 2: v7x megacore
        tr = max(8, _round_up(_cdiv(R, 2), 8))
    R_pad = _round_up(R, tr)
    M_pad = R_pad * OW

    x_taps = jnp.pad(x_taps, ((0, 0), (0, R_pad - R), (0, 0), (0, 0)))

    accounted = fixed + tr * per_row
    vmem_limit = int(min(48 * 1024 * 1024,
                         max(24 * 1024 * 1024, accounted + 4 * 1024 * 1024)))

    grid_m = R_pad // tr
    cost = pl.CostEstimate(
        flops=2 * M_pad * KH * KW * Cin * cout_pad,
        transcendentals=0,
        bytes_accessed=int(x_taps.size * 2 + w_t.size * 2 + shift2d.size * 4
                           + M_pad * cout_pad * 2),
    )

    kernel = functools.partial(conv_bn_relu_kernel, kh_size=KH, kw_size=KW,
                               ow=OW, stride=stride)

    out_flat = pl.pallas_call(
        kernel,
        out_shape=jax.ShapeDtypeStruct((M_pad, cout_pad), jnp.bfloat16),
        grid=(grid_m,),
        in_specs=[
            pl.BlockSpec((KH, tr, Wp, Cin), lambda i: (0, i, 0, 0)),
            pl.BlockSpec((KH, KW, Cin, cout_pad), lambda i: (0, 0, 0, 0)),
            pl.BlockSpec((1, cout_pad), lambda i: (0, 0)),
        ],
        out_specs=pl.BlockSpec((tr * OW, cout_pad), lambda i: (i, 0)),
        compiler_params=pltpu.CompilerParams(
            dimension_semantics=("parallel",),
            vmem_limit_bytes=vmem_limit),
        cost_estimate=cost,
    )(x_taps, w_t, shift2d)

    # back to f32 NCHW (only to match the PyTorch module's output layout)
    out = out_flat[:M, :Cout].astype(jnp.float32).reshape(N, OH, OW, Cout)
    return jnp.transpose(out, (0, 3, 1, 2))


def reference(x_nchw, weight, bias, gamma, beta, running_mean, running_var,
              *, stride=1, padding=1, eps=1e-5):
    y = jax.lax.conv_general_dilated(
        x_nchw.astype(jnp.float32), weight.astype(jnp.float32),
        window_strides=(stride, stride),
        padding=[(padding, padding), (padding, padding)],
        dimension_numbers=("NCHW", "OIHW", "NCHW"))
    y = y + bias[None, :, None, None]
    y = (y - running_mean[None, :, None, None]) / jnp.sqrt(
        running_var[None, :, None, None] + eps)
    y = y * gamma[None, :, None, None] + beta[None, :, None, None]
    return jnp.maximum(y, 0.0)


if __name__ == "__main__":
    key = jax.random.PRNGKey(0)
    k_x, k_w, k_b, k_g, k_be, k_m, k_v = jax.random.split(key, 7)

    # small shapes consistent with BasicConv2d(in=4, out=8, kernel=3, padding=1)
    N, Cin, H, W = 2, 4, 16, 16
    Cout, KH, KW = 8, 3, 3

    x = jax.random.normal(k_x, (N, Cin, H, W), dtype=jnp.float32)
    weight = jax.random.normal(k_w, (Cout, Cin, KH, KW), dtype=jnp.float32) * 0.1
    bias = jax.random.normal(k_b, (Cout,), dtype=jnp.float32) * 0.1
    gamma = 1.0 + 0.1 * jax.random.normal(k_g, (Cout,), dtype=jnp.float32)
    beta = 0.1 * jax.random.normal(k_be, (Cout,), dtype=jnp.float32)
    running_mean = 0.1 * jax.random.normal(k_m, (Cout,), dtype=jnp.float32)
    running_var = jnp.abs(jax.random.normal(k_v, (Cout,), dtype=jnp.float32)) + 0.5

    out = basic_conv2d(x, weight, bias, gamma, beta, running_mean, running_var,
                       stride=1, padding=1)
    out = jax.block_until_ready(out)

    ref = reference(x, weight, bias, gamma, beta, running_mean, running_var,
                    stride=1, padding=1)
    assert out.shape == (N, Cout, H, W), out.shape
    # bf16 inputs/outputs with f32 accumulation vs the f32 reference.
    max_err = float(jnp.max(jnp.abs(out - ref)))
    assert jnp.allclose(out, ref, atol=5e-2, rtol=5e-2), max_err

    print("KERNEL_OK")
</pallas_src>

<mosaic_0001>
module attributes {stable_mosaic.version = 11 : i64} {
  func.func @conv_bn_relu_kernel(%arg0: i32, %arg1: memref<3x16x18x4xbf16, #tpu.memory_space<vmem>>, %arg2: memref<3x3x4x128xbf16, #tpu.memory_space<vmem>>, %arg3: memref<1x128xf32, #tpu.memory_space<vmem>>, %arg4: memref<256x128xbf16, #tpu.memory_space<vmem>>) attributes {dimension_semantics = [#tpu.dimension_semantics<parallel>], iteration_bounds = array<i64: 2>, scalar_prefetch = 0 : i64, scratch_operands = 0 : i64, tpu.core_type = #tpu.core_type<tc>, window_params = [{transform_indices = @transform_0, window_bounds = array<i64: 3, 16, 18, 4>}, {pipeline_mode = #tpu.pipeline_mode<synchronous>, transform_indices = @transform_1, window_bounds = array<i64: 3, 3, 4, 128>}, {pipeline_mode = #tpu.pipeline_mode<synchronous>, transform_indices = @transform_2, window_bounds = array<i64: 1, 128>}, {transform_indices = @transform_3, window_bounds = array<i64: 256, 128>}]} {
    %cst = arith.constant 0.000000e+00 : f32
    %0 = vector.broadcast %cst : f32 to vector<256x128xf32>
    %c0 = arith.constant 0 : index
    %c0_0 = arith.constant 0 : index
    %c0_1 = arith.constant 0 : index
    %c0_2 = arith.constant 0 : index
    %1 = vector.load %arg1[%c0, %c0_0, %c0_1, %c0_2] : memref<3x16x18x4xbf16, #tpu.memory_space<vmem>>, vector<1x16x18x4xbf16>
    %2 = vector.shape_cast %1 : vector<1x16x18x4xbf16> to vector<16x18x4xbf16>
    %3 = vector.extract_strided_slice %2 {offsets = [0, 0, 0], sizes = [16, 16, 4], strides = [1, 1, 1]} : vector<16x18x4xbf16> to vector<16x16x4xbf16>
    %4 = vector.shape_cast %3 : vector<16x16x4xbf16> to vector<256x4xbf16>
    %c0_3 = arith.constant 0 : index
    %c0_4 = arith.constant 0 : index
    %c0_5 = arith.constant 0 : index
    %c0_6 = arith.constant 0 : index
    %5 = vector.load %arg2[%c0_3, %c0_4, %c0_5, %c0_6] : memref<3x3x4x128xbf16, #tpu.memory_space<vmem>>, vector<1x1x4x128xbf16>
    %6 = vector.shape_cast %5 : vector<1x1x4x128xbf16> to vector<4x128xbf16>
    %cst_7 = arith.constant dense<0.000000e+00> : vector<256x128xf32>
    %7 = tpu.matmul %4, %6, %cst_7 {dimension_numbers = #tpu.dot_dimension_numbers<[1], [0], [0], [1], [0, 0, 1, 1], [], []>} : vector<256x4xbf16>, vector<4x128xbf16>, vector<256x128xf32> -> vector<256x128xf32>
    %8 = arith.addf %0, %7 : vector<256x128xf32>
    %9 = vector.extract_strided_slice %2 {offsets = [0, 1, 0], sizes = [16, 16, 4], strides = [1, 1, 1]} : vector<16x18x4xbf16> to vector<16x16x4xbf16>
    %10 = vector.shape_cast %9 : vector<16x16x4xbf16> to vector<256x4xbf16>
    %c0_8 = arith.constant 0 : index
    %c1 = arith.constant 1 : index
    %c0_9 = arith.constant 0 : index
    %c0_10 = arith.constant 0 : index
    %11 = vector.load %arg2[%c0_8, %c1, %c0_9, %c0_10] : memref<3x3x4x128xbf16, #tpu.memory_space<vmem>>, vector<1x1x4x128xbf16>
    %12 = vector.shape_cast %11 : vector<1x1x4x128xbf16> to vector<4x128xbf16>
    %cst_11 = arith.constant dense<0.000000e+00> : vector<256x128xf32>
    %13 = tpu.matmul %10, %12, %cst_11 {dimension_numbers = #tpu.dot_dimension_numbers<[1], [0], [0], [1], [0, 0, 1, 1], [], []>} : vector<256x4xbf16>, vector<4x128xbf16>, vector<256x128xf32> -> vector<256x128xf32>
    %14 = arith.addf %8, %13 : vector<256x128xf32>
    %15 = vector.extract_strided_slice %2 {offsets = [0, 2, 0], sizes = [16, 16, 4], strides = [1, 1, 1]} : vector<16x18x4xbf16> to vector<16x16x4xbf16>
    %16 = vector.shape_cast %15 : vector<16x16x4xbf16> to vector<256x4xbf16>
    %c0_12 = arith.constant 0 : index
    %c2 = arith.constant 2 : index
    %c0_13 = arith.constant 0 : index
    %c0_14 = arith.constant 0 : index
    %17 = vector.load %arg2[%c0_12, %c2, %c0_13, %c0_14] : memref<3x3x4x128xbf16, #tpu.memory_space<vmem>>, vector<1x1x4x128xbf16>
    %18 = vector.shape_cast %17 : vector<1x1x4x128xbf16> to vector<4x128xbf16>
    %cst_15 = arith.constant dense<0.000000e+00> : vector<256x128xf32>
    %19 = tpu.matmul %16, %18, %cst_15 {dimension_numbers = #tpu.dot_dimension_numbers<[1], [0], [0], [1], [0, 0, 1, 1], [], []>} : vector<256x4xbf16>, vector<4x128xbf16>, vector<256x128xf32> -> vector<256x128xf32>
    %20 = arith.addf %14, %19 : vector<256x128xf32>
    %c1_16 = arith.constant 1 : index
    %c0_17 = arith.constant 0 : index
    %c0_18 = arith.constant 0 : index
    %c0_19 = arith.constant 0 : index
    %21 = vector.load %arg1[%c1_16, %c0_17, %c0_18, %c0_19] : memref<3x16x18x4xbf16, #tpu.memory_space<vmem>>, vector<1x16x18x4xbf16>
    %22 = vector.shape_cast %21 : vector<1x16x18x4xbf16> to vector<16x18x4xbf16>
    %23 = vector.extract_strided_slice %22 {offsets = [0, 0, 0], sizes = [16, 16, 4], strides = [1, 1, 1]} : vector<16x18x4xbf16> to vector<16x16x4xbf16>
    %24 = vector.shape_cast %23 : vector<16x16x4xbf16> to vector<256x4xbf16>
    %c1_20 = arith.constant 1 : index
    %c0_21 = arith.constant 0 : index
    %c0_22 = arith.constant 0 : index
    %c0_23 = arith.constant 0 : index
    %25 = vector.load %arg2[%c1_20, %c0_21, %c0_22, %c0_23] : memref<3x3x4x128xbf16, #tpu.memory_space<vmem>>, vector<1x1x4x128xbf16>
    %26 = vector.shape_cast %25 : vector<1x1x4x128xbf16> to vector<4x128xbf16>
    %cst_24 = arith.constant dense<0.000000e+00> : vector<256x128xf32>
    %27 = tpu.matmul %24, %26, %cst_24 {dimension_numbers = #tpu.dot_dimension_numbers<[1], [0], [0], [1], [0, 0, 1, 1], [], []>} : vector<256x4xbf16>, vector<4x128xbf16>, vector<256x128xf32> -> vector<256x128xf32>
    %28 = arith.addf %20, %27 : vector<256x128xf32>
    %29 = vector.extract_strided_slice %22 {offsets = [0, 1, 0], sizes = [16, 16, 4], strides = [1, 1, 1]} : vector<16x18x4xbf16> to vector<16x16x4xbf16>
    %30 = vector.shape_cast %29 : vector<16x16x4xbf16> to vector<256x4xbf16>
    %c1_25 = arith.constant 1 : index
    %c1_26 = arith.constant 1 : index
    %c0_27 = arith.constant 0 : index
    %c0_28 = arith.constant 0 : index
    %31 = vector.load %arg2[%c1_25, %c1_26, %c0_27, %c0_28] : memref<3x3x4x128xbf16, #tpu.memory_space<vmem>>, vector<1x1x4x128xbf16>
    %32 = vector.shape_cast %31 : vector<1x1x4x128xbf16> to vector<4x128xbf16>
    %cst_29 = arith.constant dense<0.000000e+00> : vector<256x128xf32>
    %33 = tpu.matmul %30, %32, %cst_29 {dimension_numbers = #tpu.dot_dimension_numbers<[1], [0], [0], [1], [0, 0, 1, 1], [], []>} : vector<256x4xbf16>, vector<4x128xbf16>, vector<256x128xf32> -> vector<256x128xf32>
    %34 = arith.addf %28, %33 : vector<256x128xf32>
    %35 = vector.extract_strided_slice %22 {offsets = [0, 2, 0], sizes = [16, 16, 4], strides = [1, 1, 1]} : vector<16x18x4xbf16> to vector<16x16x4xbf16>
    %36 = vector.shape_cast %35 : vector<16x16x4xbf16> to vector<256x4xbf16>
    %c1_30 = arith.constant 1 : index
    %c2_31 = arith.constant 2 : index
    %c0_32 = arith.constant 0 : index
    %c0_33 = arith.constant 0 : index
    %37 = vector.load %arg2[%c1_30, %c2_31, %c0_32, %c0_33] : memref<3x3x4x128xbf16, #tpu.memory_space<vmem>>, vector<1x1x4x128xbf16>
    %38 = vector.shape_cast %37 : vector<1x1x4x128xbf16> to vector<4x128xbf16>
    %cst_34 = arith.constant dense<0.000000e+00> : vector<256x128xf32>
    %39 = tpu.matmul %36, %38, %cst_34 {dimension_numbers = #tpu.dot_dimension_numbers<[1], [0], [0], [1], [0, 0, 1, 1], [], []>} : vector<256x4xbf16>, vector<4x128xbf16>, vector<256x128xf32> -> vector<256x128xf32>
    %40 = arith.addf %34, %39 : vector<256x128xf32>
    %c2_35 = arith.constant 2 : index
    %c0_36 = arith.constant 0 : index
    %c0_37 = arith.constant 0 : index
    %c0_38 = arith.constant 0 : index
    %41 = vector.load %arg1[%c2_35, %c0_36, %c0_37, %c0_38] : memref<3x16x18x4xbf16, #tpu.memory_space<vmem>>, vector<1x16x18x4xbf16>
    %42 = vector.shape_cast %41 : vector<1x16x18x4xbf16> to vector<16x18x4xbf16>
    %43 = vector.extract_strided_slice %42 {offsets = [0, 0, 0], sizes = [16, 16, 4], strides = [1, 1, 1]} : vector<16x18x4xbf16> to vector<16x16x4xbf16>
    %44 = vector.shape_cast %43 : vector<16x16x4xbf16> to vector<256x4xbf16>
    %c2_39 = arith.constant 2 : index
    %c0_40 = arith.constant 0 : index
    %c0_41 = arith.constant 0 : index
    %c0_42 = arith.constant 0 : index
    %45 = vector.load %arg2[%c2_39, %c0_40, %c0_41, %c0_42] : memref<3x3x4x128xbf16, #tpu.memory_space<vmem>>, vector<1x1x4x128xbf16>
    %46 = vector.shape_cast %45 : vector<1x1x4x128xbf16> to vector<4x128xbf16>
    %cst_43 = arith.constant dense<0.000000e+00> : vector<256x128xf32>
    %47 = tpu.matmul %44, %46, %cst_43 {dimension_numbers = #tpu.dot_dimension_numbers<[1], [0], [0], [1], [0, 0, 1, 1], [], []>} : vector<256x4xbf16>, vector<4x128xbf16>, vector<256x128xf32> -> vector<256x128xf32>
    %48 = arith.addf %40, %47 : vector<256x128xf32>
    %49 = vector.extract_strided_slice %42 {offsets = [0, 1, 0], sizes = [16, 16, 4], strides = [1, 1, 1]} : vector<16x18x4xbf16> to vector<16x16x4xbf16>
    %50 = vector.shape_cast %49 : vector<16x16x4xbf16> to vector<256x4xbf16>
    %c2_44 = arith.constant 2 : index
    %c1_45 = arith.constant 1 : index
    %c0_46 = arith.constant 0 : index
    %c0_47 = arith.constant 0 : index
    %51 = vector.load %arg2[%c2_44, %c1_45, %c0_46, %c0_47] : memref<3x3x4x128xbf16, #tpu.memory_space<vmem>>, vector<1x1x4x128xbf16>
    %52 = vector.shape_cast %51 : vector<1x1x4x128xbf16> to vector<4x128xbf16>
    %cst_48 = arith.constant dense<0.000000e+00> : vector<256x128xf32>
    %53 = tpu.matmul %50, %52, %cst_48 {dimension_numbers = #tpu.dot_dimension_numbers<[1], [0], [0], [1], [0, 0, 1, 1], [], []>} : vector<256x4xbf16>, vector<4x128xbf16>, vector<256x128xf32> -> vector<256x128xf32>
    %54 = arith.addf %48, %53 : vector<256x128xf32>
    %55 = vector.extract_strided_slice %42 {offsets = [0, 2, 0], sizes = [16, 16, 4], strides = [1, 1, 1]} : vector<16x18x4xbf16> to vector<16x16x4xbf16>
    %56 = vector.shape_cast %55 : vector<16x16x4xbf16> to vector<256x4xbf16>
    %c2_49 = arith.constant 2 : index
    %c2_50 = arith.constant 2 : index
    %c0_51 = arith.constant 0 : index
    %c0_52 = arith.constant 0 : index
    %57 = vector.load %arg2[%c2_49, %c2_50, %c0_51, %c0_52] : memref<3x3x4x128xbf16, #tpu.memory_space<vmem>>, vector<1x1x4x128xbf16>
    %58 = vector.shape_cast %57 : vector<1x1x4x128xbf16> to vector<4x128xbf16>
    %cst_53 = arith.constant dense<0.000000e+00> : vector<256x128xf32>
    %59 = tpu.matmul %56, %58, %cst_53 {dimension_numbers = #tpu.dot_dimension_numbers<[1], [0], [0], [1], [0, 0, 1, 1], [], []>} : vector<256x4xbf16>, vector<4x128xbf16>, vector<256x128xf32> -> vector<256x128xf32>
    %60 = arith.addf %54, %59 : vector<256x128xf32>
    %c0_54 = arith.constant 0 : index
    %c0_55 = arith.constant 0 : index
    %61 = vector.load %arg3[%c0_54, %c0_55] : memref<1x128xf32, #tpu.memory_space<vmem>>, vector<1x128xf32>
    %62 = vector.broadcast %61 : vector<1x128xf32> to vector<256x128xf32>
    %63 = arith.addf %60, %62 : vector<256x128xf32>
    %cst_56 = arith.constant 0.000000e+00 : f32
    %64 = vector.broadcast %cst_56 : f32 to vector<256x128xf32>
    %65 = arith.maximumf %63, %64 : vector<256x128xf32>
    %66 = arith.truncf %65 : vector<256x128xf32> to vector<256x128xbf16>
    %c0_57 = arith.constant 0 : index
    %c0_58 = arith.constant 0 : index
    %67 = vector.load %arg4[%c0_57, %c0_58] : memref<256x128xbf16, #tpu.memory_space<vmem>>, vector<256x128xbf16>
    tpu.vector_store %arg4[%c0_57, %c0_58], %66 {strides = array<i32>} : memref<256x128xbf16, #tpu.memory_space<vmem>>, vector<256x128xbf16>,
    return
  }
  func.func @transform_0(%arg0: i32) -> (i32, i32, i32, i32) {
    %c0_i32 = arith.constant 0 : i32
    %c0_i32_0 = arith.constant 0 : i32
    %c0_i32_1 = arith.constant 0 : i32
    %c0_i32_2 = arith.constant 0 : i32
    return %c0_i32, %arg0, %c0_i32_0, %c0_i32_1 : i32, i32, i32, i32
  }
  func.func @transform_1(%arg0: i32) -> (i32, i32, i32, i32) {
    %c0_i32 = arith.constant 0 : i32
    %c0_i32_0 = arith.constant 0 : i32
    %c0_i32_1 = arith.constant 0 : i32
    %c0_i32_2 = arith.constant 0 : i32
    %c0_i32_3 = arith.constant 0 : i32
    return %c0_i32, %c0_i32_0, %c0_i32_1, %c0_i32_2 : i32, i32, i32, i32
  }
  func.func @transform_2(%arg0: i32) -> (i32, i32) {
    %c0_i32 = arith.constant 0 : i32
    %c0_i32_0 = arith.constant 0 : i32
    %c0_i32_1 = arith.constant 0 : i32
    return %c0_i32, %c0_i32_0 : i32, i32
  }
  func.func @transform_3(%arg0: i32) -> (i32, i32) {
    %c0_i32 = arith.constant 0 : i32
    %c0_i32_0 = arith.constant 0 : i32
    return %arg0, %c0_i32 : i32, i32
  }
}

</mosaic_0001>

<bundles_post_ra>
// kernel: tpu_custom_call.1
= control target key start
LH: loop header
LB: loop body
LE: loop exit
PB: predicated region body
PF: predicated region fallthrough
CT: control target
= control target key end

     0   :  { %8 = vsyncpa [#allocation4], 0  ;;  %s9354_s0 = inlined_call_operand.vmem [shape: bf16[3,32,18,4], index: 0, kind: input, shape index: {}]   ;;  %s9355_s1 = inlined_call_operand.vmem [shape: bf16[3,3,4,128], index: 1, kind: input, shape index: {}]   ;;  %s9356_s2 = inlined_call_operand.vmem [shape: f32[1,128], index: 2, kind: input, shape index: {}]   ;;  %s9357_s3 = inlined_call_operand.hbm [shape: bf16[512,128], index: 3, kind: output, shape index: {}]  }
   0x1   :  { %10 = vsyncpa [#allocation4 + $0x1], 0  ;;  %s7097_s12 = smov 0   ;;  %s7099_s13 = smov 0  }
   0x2   :  { %s7101_s14 = smov 0   ;;  %s7103_s15 = smov 0  }
   0x3 LB: > { %s5466_s16 = sadd.s32 4294967295, %s7072_s15   ;;  %s5467_s17 = sadd.s32 4294967294, %s7072_s15   ;;  %s7072_s15 = sphi %s7103_s15, %s9478_s15   ;;  %s7068_s14 = sphi %s7101_s14, %s9477_s14   ;;  %s7064_s13 = sphi %s7099_s13, %s9476_s13   ;;  %s7060_s12 = sphi %s7097_s12, %s9475_s12  }
   0x4   : > { %s7120_s18 = sadd.s32 1, %s7072_s15   ;;  %s23_s19 = sadd.s32 1, %s7068_s14 }
   0x5   : > { %s20_s20 = ssub.s32 %s7072_s15, %s7120_s18  ;;  %p30_p0 = scmp.ne.s32.totalorder %s7068_s14, %s7064_s13 }
   0x6   : > { %p21_p1 = scmp.eq.s32.totalorder %s20_s20, 0  ;;  %p31_p2 = scmp.eq.s32.totalorder %s7072_s15, 0 }
   0x7   : > { %p102_p3 = scmp.eq.s32.totalorder %s5466_s16, 1  ;;  %p107_p4 = scmp.ne.s32.totalorder %s7064_s13, %s7060_s12 }
   0x8   : > { %s7133_s21 = scalar_select %p21_p1, %s7068_s14, %s23_s19  }
   0x9   : > { %p32_p5 = por %p31_p2, %p30_p0  ;;  %p7135_p6 = por %p102_p3, %p30_p0 }
   0xa   : > { %p108_p7 = scmp.eq.s32.totalorder %s5467_s17, 1  ;;  %p5469_p9 = scmp.ge.s32.totalorder %s7072_s15, 2 }
   0xc   : > { %p7139_p8 = por %p108_p7, %p107_p4  ;;  %130 = sbr.rel (%p5469_p9) target bundleno = 60 (0x3c), region = 24 }
  0x13   : > { %133 = sbr.rel (!%p32_p5) target bundleno = 60 (0x3c), region = 28  ;;  %s135_s24 = sand.u32 (%p32_p5), 1, %s7068_s14  }
  0x14   : > { %s6809_s25 = smul.u32 (%p32_p5), 192, %s7072_s15 }
  0x15   : > { %s6808_s26 = smul.u32 (%p32_p5), 576, %s135_s24 }
  0x16   : > { %s7151_s29 = scalar_lea.vmem (%p32_p5), %s9354_s0, %s6809_s25 }
  0x17   : > { %v157_v0 = vld [vmem:[%s7151_s29] sm:$0xff] (%p32_p5)   ;;  %v161_v1 = vld [vmem:[%s7151_s29 + $0x8] sm:$0xff] (%p32_p5)   ;;  %v165_v2 = vld [vmem:[%s7151_s29 + $0x10] sm:$0xff] (%p32_p5)   ;;  %s7156_s30 = scalar_lea.vmem (%p32_p5), [#allocation2], %s6808_s26 }
  0x18   : > { %158 = vst [vmem:[%s7156_s30] sm:$0xff] (%p32_p5), %v157_v0   ;;  %162 = vst [vmem:[%s7156_s30 + $0x8] sm:$0xff] (%p32_p5), %v161_v1   ;;  %v169_v3 = vld [vmem:[%s7151_s29 + $0x18] sm:$0xff] (%p32_p5)   ;;  %v173_v4 = vld [vmem:[%s7151_s29 + $0x20] sm:$0xff] (%p32_p5)  }
  0x19   : > { %166 = vst [vmem:[%s7156_s30 + $0x10] sm:$0xff] (%p32_p5), %v165_v2   ;;  %v177_v5 = vld [vmem:[%s7151_s29 + $0x28] sm:$0xff] (%p32_p5)   ;;  %170 = vst [vmem:[%s7156_s30 + $0x18] sm:$0xff] (%p32_p5), %v169_v3   ;;  %v181_v6 = vld [vmem:[%s7151_s29 + $0x30] sm:$0xff] (%p32_p5)  }
  0x1a   : > { %174 = vst [vmem:[%s7156_s30 + $0x20] sm:$0xff] %v173_v4   ;;  %178 = vst [vmem:[%s7156_s30 + $0x28] sm:$0xff] %v177_v5   ;;  %v185_v7 = vld [vmem:[%s7151_s29 + $0x38] sm:$0xff]   ;;  %v189_v8 = vld [vmem:[%s7151_s29 + $0x40] sm:$0xff]  }
  0x1b   : > { %182 = vst [vmem:[%s7156_s30 + $0x30] sm:$0xff] %v181_v6   ;;  %186 = vst [vmem:[%s7156_s30 + $0x38] sm:$0xff] %v185_v7   ;;  %v193_v9 = vld [vmem:[%s7151_s29 + $0x48] sm:$0xff]   ;;  %v197_v10 = vld [vmem:[%s7151_s29 + $0x50] sm:$0xff]  }
  0x1c   : > { %190 = vst [vmem:[%s7156_s30 + $0x40] sm:$0xff] %v189_v8   ;;  %v201_v11 = vld [vmem:[%s7151_s29 + $0x58] sm:$0xff]   ;;  %194 = vst [vmem:[%s7156_s30 + $0x48] sm:$0xff] %v193_v9   ;;  %v205_v12 = vld [vmem:[%s7151_s29 + $0x60] sm:$0xff]  }
  0x1d   : > { %198 = vst [vmem:[%s7156_s30 + $0x50] sm:$0xff] %v197_v10   ;;  %202 = vst [vmem:[%s7156_s30 + $0x58] sm:$0xff] %v201_v11   ;;  %v209_v13 = vld [vmem:[%s7151_s29 + $0x68] sm:$0xff]   ;;  %v213_v14 = vld [vmem:[%s7151_s29 + $0x70] sm:$0xff]  }
  0x1e   : > { %206 = vst [vmem:[%s7156_s30 + $0x60] sm:$0xff] %v205_v12   ;;  %210 = vst [vmem:[%s7156_s30 + $0x68] sm:$0xff] %v209_v13   ;;  %v217_v15 = vld [vmem:[%s7151_s29 + $0x78] sm:$0xff]   ;;  %v221_v16 = vld [vmem:[%s7151_s29 + $0x80] sm:$0xff]  }
  0x1f   : > { %214 = vst [vmem:[%s7156_s30 + $0x70] sm:$0xff] %v213_v14   ;;  %v225_v17 = vld [vmem:[%s7151_s29 + $0x88] sm:$0xff]   ;;  %218 = vst [vmem:[%s7156_s30 + $0x78] sm:$0xff] %v217_v15   ;;  %v229_v18 = vld [vmem:[%s7151_s29 + $0x90] sm:$0xff]  }
  0x20   : > { %222 = vst [vmem:[%s7156_s30 + $0x80] sm:$0xff] %v221_v16   ;;  %226 = vst [vmem:[%s7156_s30 + $0x88] sm:$0xff] %v225_v17   ;;  %v233_v19 = vld [vmem:[%s7151_s29 + $0x98] sm:$0xff]   ;;  %v237_v20 = vld [vmem:[%s7151_s29 + $0xa0] sm:$0xff]  }
  0x21   : > { %230 = vst [vmem:[%s7156_s30 + $0x90] sm:$0xff] %v229_v18   ;;  %234 = vst [vmem:[%s7156_s30 + $0x98] sm:$0xff] %v233_v19   ;;  %v241_v21 = vld [vmem:[%s7151_s29 + $0xa8] sm:$0xff]   ;;  %v245_v22 = vld [vmem:[%s7151_s29 + $0xb0] sm:$0xff]  }
  0x22   : > { %238 = vst [vmem:[%s7156_s30 + $0xa0] sm:$0xff] %v237_v20   ;;  %v249_v23 = vld [vmem:[%s7151_s29 + $0xb8] sm:$0xff]   ;;  %242 = vst [vmem:[%s7156_s30 + $0xa8] sm:$0xff] %v241_v21   ;;  %v253_v24 = vld [vmem:[%s7151_s29 + $0x180] sm:$0xff]  }
  0x23   : > { %246 = vst [vmem:[%s7156_s30 + $0xb0] sm:$0xff] %v245_v22   ;;  %250 = vst [vmem:[%s7156_s30 + $0xb8] sm:$0xff] %v249_v23   ;;  %v257_v25 = vld [vmem:[%s7151_s29 + $0x188] sm:$0xff]   ;;  %v261_v26 = vld [vmem:[%s7151_s29 + $0x190] sm:$0xff]  }
  0x24   : > { %254 = vst [vmem:[%s7156_s30 + $0xc0] sm:$0xff] %v253_v24   ;;  %258 = vst [vmem:[%s7156_s30 + $0xc8] sm:$0xff] %v257_v25   ;;  %v265_v27 = vld [vmem:[%s7151_s29 + $0x198] sm:$0xff]   ;;  %v269_v28 = vld [vmem:[%s7151_s29 + $0x1a0] sm:$0xff]  }
  0x25   : > { %262 = vst [vmem:[%s7156_s30 + $0xd0] sm:$0xff] %v261_v26   ;;  %v273_v29 = vld [vmem:[%s7151_s29 + $0x1a8] sm:$0xff]   ;;  %266 = vst [vmem:[%s7156_s30 + $0xd8] sm:$0xff] %v265_v27   ;;  %v277_v30 = vld [vmem:[%s7151_s29 + $0x1b0] sm:$0xff]  }
  0x26   : > { %270 = vst [vmem:[%s7156_s30 + $0xe0] sm:$0xff] %v269_v28   ;;  %274 = vst [vmem:[%s7156_s30 + $0xe8] sm:$0xff] %v273_v29   ;;  %v281_v31 = vld [vmem:[%s7151_s29 + $0x1b8] sm:$0xff]   ;;  %v285_v32 = vld [vmem:[%s7151_s29 + $0x1c0] sm:$0xff]  }
  0x27   : > { %278 = vst [vmem:[%s7156_s30 + $0xf0] sm:$0xff] %v277_v30   ;;  %282 = vst [vmem:[%s7156_s30 + $0xf8] sm:$0xff] %v281_v31   ;;  %v289_v33 = vld [vmem:[%s7151_s29 + $0x1c8] sm:$0xff]   ;;  %v293_v34 = vld [vmem:[%s7151_s29 + $0x1d0] sm:$0xff]  }
  0x28   : > { %286 = vst [vmem:[%s7156_s30 + $0x100] sm:$0xff] %v285_v32   ;;  %v297_v35 = vld [vmem:[%s7151_s29 + $0x1d8] sm:$0xff]   ;;  %290 = vst [vmem:[%s7156_s30 + $0x108] sm:$0xff] %v289_v33   ;;  %v301_v36 = vld [vmem:[%s7151_s29 + $0x1e0] sm:$0xff]  }
  0x29   : > { %294 = vst [vmem:[%s7156_s30 + $0x110] sm:$0xff] %v293_v34   ;;  %298 = vst [vmem:[%s7156_s30 + $0x118] sm:$0xff] %v297_v35   ;;  %v305_v37 = vld [vmem:[%s7151_s29 + $0x1e8] sm:$0xff]   ;;  %v309_v38 = vld [vmem:[%s7151_s29 + $0x1f0] sm:$0xff]  }
  0x2a   : > { %302 = vst [vmem:[%s7156_s30 + $0x120] sm:$0xff] %v301_v36   ;;  %306 = vst [vmem:[%s7156_s30 + $0x128] sm:$0xff] %v305_v37   ;;  %v313_v39 = vld [vmem:[%s7151_s29 + $0x1f8] sm:$0xff]   ;;  %v317_v40 = vld [vmem:[%s7151_s29 + $0x200] sm:$0xff]  }
  0x2b   : > { %310 = vst [vmem:[%s7156_s30 + $0x130] sm:$0xff] %v309_v38   ;;  %v321_v41 = vld [vmem:[%s7151_s29 + $0x208] sm:$0xff]   ;;  %314 = vst [vmem:[%s7156_s30 + $0x138] sm:$0xff] %v313_v39   ;;  %v325_v42 = vld [vmem:[%s7151_s29 + $0x210] sm:$0xff]  }
  0x2c   : > { %318 = vst [vmem:[%s7156_s30 + $0x140] sm:$0xff] %v317_v40   ;;  %322 = vst [vmem:[%s7156_s30 + $0x148] sm:$0xff] %v321_v41   ;;  %v329_v43 = vld [vmem:[%s7151_s29 + $0x218] sm:$0xff]   ;;  %v333_v44 = vld [vmem:[%s7151_s29 + $0x220] sm:$0xff]  }
  0x2d   : > { %326 = vst [vmem:[%s7156_s30 + $0x150] sm:$0xff] %v325_v42   ;;  %330 = vst [vmem:[%s7156_s30 + $0x158] sm:$0xff] %v329_v43   ;;  %v337_v45 = vld [vmem:[%s7151_s29 + $0x228] sm:$0xff]   ;;  %v341_v46 = vld [vmem:[%s7151_s29 + $0x230] sm:$0xff]  }
  0x2e   : > { %334 = vst [vmem:[%s7156_s30 + $0x160] sm:$0xff] %v333_v44   ;;  %v345_v47 = vld [vmem:[%s7151_s29 + $0x238] sm:$0xff]   ;;  %338 = vst [vmem:[%s7156_s30 + $0x168] sm:$0xff] %v337_v45   ;;  %v349_v48 = vld [vmem:[%s7151_s29 + $0x300] sm:$0xff]  }
  0x2f   : > { %342 = vst [vmem:[%s7156_s30 + $0x170] sm:$0xff] %v341_v46   ;;  %346 = vst [vmem:[%s7156_s30 + $0x178] sm:$0xff] %v345_v47   ;;  %v353_v49 = vld [vmem:[%s7151_s29 + $0x308] sm:$0xff]   ;;  %v357_v50 = vld [vmem:[%s7151_s29 + $0x310] sm:$0xff]  }
  0x30   : > { %350 = vst [vmem:[%s7156_s30 + $0x180] sm:$0xff] %v349_v48   ;;  %354 = vst [vmem:[%s7156_s30 + $0x188] sm:$0xff] %v353_v49   ;;  %v361_v51 = vld [vmem:[%s7151_s29 + $0x318] sm:$0xff]   ;;  %v365_v52 = vld [vmem:[%s7151_s29 + $0x320] sm:$0xff]  }
  0x31   : > { %358 = vst [vmem:[%s7156_s30 + $0x190] sm:$0xff] %v357_v50   ;;  %v369_v53 = vld [vmem:[%s7151_s29 + $0x328] sm:$0xff]   ;;  %362 = vst [vmem:[%s7156_s30 + $0x198] sm:$0xff] %v361_v51   ;;  %v373_v54 = vld [vmem:[%s7151_s29 + $0x330] sm:$0xff]  }
  0x32   : > { %366 = vst [vmem:[%s7156_s30 + $0x1a0] sm:$0xff] %v365_v52   ;;  %370 = vst [vmem:[%s7156_s30 + $0x1a8] sm:$0xff] %v369_v53   ;;  %v377_v55 = vld [vmem:[%s7151_s29 + $0x338] sm:$0xff]   ;;  %v381_v56 = vld [vmem:[%s7151_s29 + $0x340] sm:$0xff]  }
  0x33   : > { %374 = vst [vmem:[%s7156_s30 + $0x1b0] sm:$0xff] %v373_v54   ;;  %378 = vst [vmem:[%s7156_s30 + $0x1b8] sm:$0xff] %v377_v55   ;;  %v385_v57 = vld [vmem:[%s7151_s29 + $0x348] sm:$0xff]   ;;  %v389_v58 = vld [vmem:[%s7151_s29 + $0x350] sm:$0xff]  }
  0x34   : > { %382 = vst [vmem:[%s7156_s30 + $0x1c0] sm:$0xff] %v381_v56   ;;  %v393_v59 = vld [vmem:[%s7151_s29 + $0x358] sm:$0xff]   ;;  %386 = vst [vmem:[%s7156_s30 + $0x1c8] sm:$0xff] %v385_v57   ;;  %v397_v60 = vld [vmem:[%s7151_s29 + $0x360] sm:$0xff]  }
  0x35   : > { %390 = vst [vmem:[%s7156_s30 + $0x1d0] sm:$0xff] %v389_v58   ;;  %394 = vst [vmem:[%s7156_s30 + $0x1d8] sm:$0xff] %v393_v59   ;;  %v401_v61 = vld [vmem:[%s7151_s29 + $0x368] sm:$0xff]   ;;  %v405_v62 = vld [vmem:[%s7151_s29 + $0x370] sm:$0xff]  }
  0x36   : > { %398 = vst [vmem:[%s7156_s30 + $0x1e0] sm:$0xff] %v397_v60   ;;  %402 = vst [vmem:[%s7156_s30 + $0x1e8] sm:$0xff] %v401_v61   ;;  %v409_v63 = vld [vmem:[%s7151_s29 + $0x378] sm:$0xff]   ;;  %v413_v0 = vld [vmem:[%s7151_s29 + $0x380] sm:$0xff]  }
  0x37   : > { %406 = vst [vmem:[%s7156_s30 + $0x1f0] sm:$0xff] %v405_v62   ;;  %v417_v1 = vld [vmem:[%s7151_s29 + $0x388] sm:$0xff]   ;;  %410 = vst [vmem:[%s7156_s30 + $0x1f8] sm:$0xff] %v409_v63   ;;  %v421_v2 = vld [vmem:[%s7151_s29 + $0x390] sm:$0xff]  }
  0x38   : > { %414 = vst [vmem:[%s7156_s30 + $0x200] sm:$0xff] %v413_v0   ;;  %418 = vst [vmem:[%s7156_s30 + $0x208] sm:$0xff] %v417_v1   ;;  %v425_v3 = vld [vmem:[%s7151_s29 + $0x398] sm:$0xff]   ;;  %v429_v4 = vld [vmem:[%s7151_s29 + $0x3a0] sm:$0xff]  }
  0x39   : > { %422 = vst [vmem:[%s7156_s30 + $0x210] sm:$0xff] %v421_v2   ;;  %426 = vst [vmem:[%s7156_s30 + $0x218] sm:$0xff] %v425_v3   ;;  %v433_v5 = vld [vmem:[%s7151_s29 + $0x3a8] sm:$0xff]   ;;  %v437_v6 = vld [vmem:[%s7151_s29 + $0x3b0] sm:$0xff]  }
  0x3a   : > { %430 = vst [vmem:[%s7156_s30 + $0x220] sm:$0xff] %v429_v4   ;;  %v441_v7 = vld [vmem:[%s7151_s29 + $0x3b8] sm:$0xff]   ;;  %434 = vst [vmem:[%s7156_s30 + $0x228] sm:$0xff] %v433_v5  }
  0x3b   : > { %438 = vst [vmem:[%s7156_s30 + $0x230] sm:$0xff] %v437_v6   ;;  %442 = vst [vmem:[%s7156_s30 + $0x238] sm:$0xff] %v441_v7  }
  0x3c PF: > { %p5473_p10 = scmp.ge.s32.totalorder %s7072_s15, 1  ;;  %p754_p11 = scmp.lt.s32.totalorder %s7072_s15, 3 }
  0x3e   : > { %p755_p12 = pnand %p5473_p10, %p754_p11 }
  0x40   : > { %758 = sbr.rel (%p755_p12) target bundleno = 665 (0x299), region = 69 }
  0x47   : > { %v5475_v8 = vld [vmem:[%s9355_s1 + $0x2] sm:$0x3]  ;;  %vm1322_vm0 = vcmask 1041408   ;;  %v5670_v9 = vld [vmem:[%s9355_s1 + $0x8] sm:$0x3]  ;;  %s7308_s8 = sand.u32 1, %s7064_s13  }
  0x48   : > { %6798 = vmatprep.subr.msk.bf16.mxu1 %vm1322_vm0, %v5475_v8  ;;  %6802 = vmatprep.subr.msk.bf16.mxu0 %vm1322_vm0, %v5670_v9  ;;  %v1324_v10 = vsel %vm1322_vm0, %v5475_v8, 0  ;;  %v7314_v11 = vsel %vm1322_vm0, %v5670_v9, 0  ;;  %s6810_s9 = smul.u32 576, %s7308_s8  ;;  %v835_v12 = vld [vmem:[%s9355_s1] sm:$0x3]  ;;  %vm1273_vm3 = vcmask 31744  }
  0x49   : > { %9386 = vst [vmem:[#allocation6_spill] sm:$0xff] %v7314_v11  ;;  %6235 = vmatpush3.bf16.msra.mxu1 %v1324_v10  ;;  %6371 = vmatpush3.bf16.msra.mxu0 %v7314_v11  ;;  %v7324_v13 = vld [vmem:[%s9355_s1 + $0xa] sm:$0x3]  ;;  %vm836_vm1 = vsmask.f32 3328  ;;  %v7357_v43 = vsel %vm1322_vm0, %v835_v12, 0 }
  0x4a   : > { %vm837_vm2 = vsmask.f32 7440  ;;  %6799 = vmatprep.subr.msk.bf16.mxu1 %vm1322_vm0, %v835_v12  ;;  %6804 = vmatprep.subr.msk.bf16.mxu0 %vm1322_vm0, %v7324_v13  ;;  %s7329_s20 = scalar_lea.vmem [#allocation2], %s6810_s9  ;;  %v7379_v7 = vsel %vm1322_vm0, %v7324_v13, 0  ;;  %vm1795_vm5 = vcmask 1042432   ;;  %vm1796_vm6 = vcmask 1046532  }
  0x4b   : > { %v787_v14 = vld [vmem:[%s7329_s20] sm:$0xf]  ;;  %v788_v15 = vld [vmem:[%s7329_s20 + $0x4] sm:$0xf]  ;;  %v789_v16 = vld [vmem:[%s7329_s20 + $0x8] sm:$0x1] }
  0x4c   : > { %v840_v17 = vshrl.u32 %v787_v14, 16  ;;  %v843_v18 = vshll.u32 %v787_v14, 16  ;;  %v849_v19 = vshll.u32 %v788_v15, 16  ;;  %v853_v20 = vshrl.u32 %v788_v15, 16  ;;  %v7335_v21 = vld [vmem:[%s7329_s20 + $0xc0] sm:$0xf]  ;;  %vm7352_vm4 = vmor %vm836_vm1, %vm837_vm2 }
  0x4d   : > { %v859_v22 = vshll.u32 %v789_v16, 16  ;;  %v7338_v23 = vld [vmem:[%s7329_s20 + $0xc4] sm:$0xf]  ;;  %v7341_v24 = vld [vmem:[%s7329_s20 + $0xc8] sm:$0x1]  ;;  %v2580_v30 = vshrl.u32 %v7335_v21, 16  ;;  %vm7621_vm7 = vmor %vm1795_vm5, %vm1796_vm6 }
  0x4e   : > { %v842_v25 = vrot.slane %v840_v17, 4  ;;  %v845_v26 = vrot.slane %v843_v18, 5  ;;  %v851_v27 = vrot.slane %v849_v19, 5  ;;  %v855_v28 = vrot.slane %v853_v20, 4  ;;  %v790_v37 = vld [vmem:[%s7329_s20 + $0xc] sm:$0xf] }
  0x4f   : > { %v861_v29 = vrot.slane %v859_v22, 5  ;;  %v2583_v31 = vshll.u32 %v7335_v21, 16  ;;  %v2589_v32 = vshll.u32 %v7338_v23, 16  ;;  %v2593_v35 = vshrl.u32 %v7338_v23, 16  ;;  %v791_v38 = vld [vmem:[%s7329_s20 + $0x10] sm:$0xf] }
  0x50   : > { %v846_v33 = vor.u32 %v845_v26, %v842_v25  ;;  %v856_v34 = vor.u32 %v855_v28, %v851_v27  ;;  %v2599_v36 = vshll.u32 %v7341_v24, 16  ;;  %v2582_v40 = vrot.slane %v2580_v30, 4  ;;  %v792_v49 = vld [vmem:[%s7329_s20 + $0x14] sm:$0x1]  ;;  %v7365_v61 = vld [vmem:[%s7329_s20 + $0xcc] sm:$0xf] }
  0x51   : > { %v2585_v41 = vrot.slane %v2583_v31, 5  ;;  %v2591_v42 = vrot.slane %v2589_v32, 5  ;;  %v2595_v46 = vrot.slane %v2593_v35, 4  ;;  %v864_v50 = vshrl.u32 %v790_v37, 16  ;;  %v7368_v2 = vld [vmem:[%s7329_s20 + $0xd0] sm:$0xf] }
  0x52   : > { %v847_v44 = vrot.slane %v846_v33, 4  ;;  %v857_v45 = vrot.slane %v856_v34, 4  ;;  %v2601_v47 = vrot.slane %v2599_v36, 5  ;;  %v867_v51 = vshll.u32 %v790_v37, 16  ;;  %v7375_v6 = vld [vmem:[%s7329_s20 + $0xd4] sm:$0x1] }
  0x53   : > { %v2586_v48 = vor.u32 %v2585_v41, %v2582_v40  ;;  %v873_v52 = vshll.u32 %v791_v38, 16  ;;  %v2596_v55 = vor.u32 %v2595_v46, %v2591_v42  ;;  %v877_v56 = vshrl.u32 %v791_v38, 16  ;;  %v793_v18 = vld [vmem:[%s7329_s20 + $0x18] sm:$0xf]  ;;  %v794_v25 = vld [vmem:[%s7329_s20 + $0x1c] sm:$0xf] }
  0x54   : > { %v852_v53 = vsel %vm7352_vm4, %v847_v44, %v851_v27  ;;  %v862_v54 = vsel %vm7352_vm4, %v857_v45, %v861_v29  ;;  %v866_v59 = vrot.slane %v864_v50, 4  ;;  %v869_v60 = vrot.slane %v867_v51, 5  ;;  %v795_v30 = vld [vmem:[%s7329_s20 + $0x20] sm:$0x1]  ;;  %v7399_v35 = vld [vmem:[%s7329_s20 + $0xd8] sm:$0xf] }
  0x55   : > { %v5476_v57 = vcombine.low %v852_v53, %v862_v54  ;;  %v2587_v58 = vrot.slane %v2586_v48, 4  ;;  %v2597_v62 = vrot.slane %v2596_v55, 4  ;;  %v875_v63 = vrot.slane %v873_v52, 5  ;;  %v7408_v55 = vld [vmem:[%s7329_s20 + $0xe0] sm:$0x1]  ;;  %s5474_s17 = sshll.u32 %s7308_s8, 7 }
  0x56   : > { %v879_v0 = vrot.slane %v877_v56, 4  ;;  %v883_v1 = vshll.u32 %v792_v49, 16  ;;  %v3278_v4 = vrot.slane %v7341_v24, 5  ;;  %v870_v5 = vor.u32 %v869_v60, %v866_v59  ;;  %v7403_v49 = vld [vmem:[%s7329_s20 + $0xdc] sm:$0xf]  ;;  %s9252_s19 = scalar_lea.vmem [#allocation3], %s5474_s17 }
  0x57   : > { %6236 = vmatprep.mubr.msk.bf16.mxu1 %vm1273_vm3, %v5476_v57  ;;  %v2592_v3 = vsel %vm7352_vm4, %v2587_v58, %v2591_v42  ;;  %v2602_v8 = vsel %vm7352_vm4, %v2597_v62, %v2601_v47  ;;  %v2604_v12 = vshrl.u32 %v7365_v61, 16  ;;  %v2607_v16 = vshll.u32 %v7365_v61, 16  ;;  %v796_v60 = vld [vmem:[%s7329_s20 + $0x24] sm:$0xf]  ;;  %s5399_s24 = sshll.u32 %s9252_s19, 4  ;;  %s7074_s29 = smov [#allocation3]   ;;  %s9308_s24 = int_to_ptr.vmem [resolvable:$true] %s5399_s24 }
  0x58   : > { %v880_v9 = vor.u32 %v879_v0, %v875_v63  ;;  %v885_v10 = vrot.slane %v883_v1, 5  ;;  %v5671_v14 = vcombine.low %v2592_v3, %v2602_v8  ;;  %v871_v15 = vrot.slane %v870_v5, 4  ;;  %s7010_s28 = scalar_lea.vmem %s9308_s24, 2048  ;;  %s7014_s30 = sshll.u32 %s7074_s29, 4  ;;  %s7015_s30 = int_to_ptr.vmem [resolvable:$false] %s7014_s30 }
  0x59   : > { %v2613_v17 = vshll.u32 %v7368_v2, 16  ;;  %v2606_v20 = vrot.slane %v2604_v12, 4  ;;  %v2617_v13 = vshrl.u32 %v7368_v2, 16  ;;  %v2623_v22 = vshll.u32 %v7375_v6, 16  ;;  %p7011_p13 = scmp.ne.s32.totalorder %s9308_s24, %s7010_s28  ;;  %s7016_s4 = scalar_lea.vmem %s7015_s30, 4096 }
  0x5a   : > { %v881_v19 = vrot.slane %v880_v9, 4  ;;  %6372 = vmatprep.mubr.msk.bf16.mxu0 %vm1273_vm3, %v5671_v14  ;;  %v876_v26 = vsel %vm7352_vm4, %v871_v15, %v875_v63  ;;  %v2609_v27 = vrot.slane %v2607_v16, 5  ;;  %v3282_v29 = vrot.slane %v7368_v2, 5  ;;  %v797_v9 = vld [vmem:[%s7329_s20 + $0x28] sm:$0xf]  ;;  %p7017_p2 = scmp.lt.s32.totalorder %s9308_s24, %s7015_s30  ;;  %p7018_p3 = scmp.lt.s32.totalorder %s7016_s4, %s7010_s28 }
  0x5b   : > { %v2615_v28 = vrot.slane %v2613_v17, 5  ;;  %v2619_v32 = vrot.slane %v2617_v13, 4  ;;  %v2625_v33 = vrot.slane %v2623_v22, 5  ;;  %v888_v38 = vshrl.u32 %v793_v18, 16  ;;  %v7425_v13 = vld [vmem:[%s7329_s20 + $0xe4] sm:$0xf]  ;;  %p7012_p0 = pnand %p7011_p13, %p7135_p6 }
  0x5c   : > { %v886_v31 = vsel %vm7352_vm4, %v881_v19, %v885_v10  ;;  %v2610_v37 = vor.u32 %v2609_v27, %v2606_v20  ;;  %v891_v40 = vshll.u32 %v793_v18, 16  ;;  %v897_v42 = vshll.u32 %v794_v25, 16  ;;  %v798_v19 = vld [vmem:[%s7329_s20 + $0x2c] sm:$0x1]  ;;  %p7019_p4 = por %p7018_p3, %p7017_p2 }
  0x5d   : > { %v5477_v36 = vcombine.low %v876_v26, %v886_v31  ;;  %v2620_v41 = vor.u32 %v2619_v32, %v2615_v28  ;;  %v901_v44 = vshrl.u32 %v794_v25, 16  ;;  %v907_v45 = vshll.u32 %v795_v30, 16  ;;  %p7013_p1 = pneg %p7012_p0 }
  0x5e   : > { %v2611_v46 = vrot.slane %v2610_v37, 4  ;;  %v890_v47 = vrot.slane %v888_v38, 4  ;;  %v893_v48 = vrot.slane %v891_v40, 5  ;;  %v2628_v50 = vshrl.u32 %v7399_v35, 16 }
  0x5f   : > { %6237 = vmatmul.mubr.msk.bf16.vlgmr.msra.gmra.mrb[0].mxu1 %vm1273_vm3, %v5477_v36  ;;  %v2621_v51 = vrot.slane %v2620_v41, 4  ;;  %v899_v52 = vrot.slane %v897_v42, 5  ;;  %v903_v53 = vrot.slane %v901_v44, 4  ;;  %v909_v54 = vrot.slane %v907_v45, 5  ;;  %v7438_v44 = vld [vmem:[%s7329_s20 + $0xec] sm:$0x1]  ;;  %p7020_p5 = pnand %p7019_p4, %p7013_p1 }
  0x60   : > { %6269 = vmatpush3.bf16.msra.mxu1 %v7357_v43  ;;  %v2616_v56 = vsel %vm7352_vm4, %v2611_v46, %v2615_v28  ;;  %v894_v57 = vor.u32 %v893_v48, %v890_v47  ;;  %v2630_v58 = vrot.slane %v2628_v50, 4  ;;  %v2631_v59 = vshll.u32 %v7399_v35, 16  ;;  %v7442_v46 = vld [vmem:[%s7329_s20 + $0x30] sm:$0xf] }
  0x61   : > { %v2626_v62 = vsel %vm7352_vm4, %v2621_v51, %v2625_v33  ;;  %v904_v63 = vor.u32 %v903_v53, %v899_v52  ;;  %v2637_v43 = vshll.u32 %v7403_v49, 16  ;;  %v2641_v0 = vshrl.u32 %v7403_v49, 16  ;;  %v7431_v33 = vld [vmem:[%s7329_s20 + $0xe8] sm:$0xf] }
  0x62   : > { %v5672_v1 = vcombine.low %v2616_v56, %v2626_v62  ;;  %v895_v3 = vrot.slane %v894_v57, 4  ;;  %v2633_v5 = vrot.slane %v2631_v59, 5  ;;  %v2647_v8 = vshll.u32 %v7408_v55, 16  ;;  %v7448_v57 = vld [vmem:[%s7329_s20 + $0x34] sm:$0xf] }
  0x63   : > { %v905_v10 = vrot.slane %v904_v63, 4  ;;  %v2639_v12 = vrot.slane %v2637_v43, 5  ;;  %v2643_v14 = vrot.slane %v2641_v0, 4  ;;  %v912_v15 = vshrl.u32 %v796_v60, 16 }
  0x64   : > { %6373 = vmatmul.mubr.msk.bf16.vlgmr.msra.gmra.mrb[0].mxu0 %vm1273_vm3, %v5672_v1  ;;  %v900_v16 = vsel %vm7352_vm4, %v895_v3, %v899_v52  ;;  %v2634_v17 = vor.u32 %v2633_v5, %v2630_v58  ;;  %v2649_v18 = vrot.slane %v2647_v8, 5  ;;  %v915_v20 = vshll.u32 %v796_v60, 16  ;;  %v801_v1 = vld [vmem:[%s7329_s20 + $0x38] sm:$0x1]  ;;  %v7459_v5 = vld [vmem:[%s7329_s20 + $0xf0] sm:$0xf] }
  0x65   : > { %6405 = vmatpush3.bf16.msra.mxu0 %v7379_v7  ;;  %v910_v22 = vsel %vm7352_vm4, %v905_v10, %v909_v54  ;;  %v2644_v25 = vor.u32 %v2643_v14, %v2639_v12  ;;  %v914_v26 = vrot.slane %v912_v15, 4  ;;  %v921_v27 = vshll.u32 %v797_v9, 16  ;;  %v7463_v14 = vld [vmem:[%s7329_s20 + $0xf4] sm:$0xf] }
  0x66   : > { %v5478_v28 = vcombine.low %v900_v16, %v910_v22  ;;  %v2635_v30 = vrot.slane %v2634_v17, 4  ;;  %v917_v31 = vrot.slane %v915_v20, 5  ;;  %v925_v32 = vshrl.u32 %v797_v9, 16 }
  0x67   : > { %v2645_v36 = vrot.slane %v2644_v25, 4  ;;  %v923_v37 = vrot.slane %v921_v27, 5  ;;  %v931_v38 = vshll.u32 %v798_v19, 16  ;;  %v2652_v40 = vshrl.u32 %v7425_v13, 16  ;;  %v7471_v19 = vld [vmem:[%s9355_s1 + $0xc] sm:$0x3] }
  0x68   : > { %6240 = vmatprep.mubr.msk.bf16.mxu1 %vm1273_vm3, %v5478_v28  ;;  %v2640_v7 = vsel %vm7352_vm4, %v2635_v30, %v2639_v12  ;;  %v918_v41 = vor.u32 %v917_v31, %v914_v26  ;;  %v927_v42 = vrot.slane %v925_v32, 4  ;;  %v2655_v45 = vshll.u32 %v7425_v13, 16  ;;  %6805 = vmatprep.subr.msk.bf16.mxu0 %vm1322_vm0, %v7471_v19  ;;  %v7478_v31 = vld [vmem:[%s7329_s20 + $0xf8] sm:$0x1] }
  0x69   : > { %v2650_v47 = vsel %vm7352_vm4, %v2645_v36, %v2649_v18  ;;  %v933_v48 = vrot.slane %v931_v38, 5  ;;  %v2654_v50 = vrot.slane %v2652_v40, 4  ;;  %v2661_v51 = vshll.u32 %v7431_v33, 16 }
  0x6a   : > { %v5673_v52 = vcombine.low %v2640_v7, %v2650_v47  ;;  %v919_v53 = vrot.slane %v918_v41, 4  ;;  %v928_v54 = vor.u32 %v927_v42, %v923_v37  ;;  %v2657_v56 = vrot.slane %v2655_v45, 5  ;;  %v7486_v47 = vld [vmem:[%s7329_s20 + $0x3c] sm:$0xf] }
  0x6b   : > { %v2663_v58 = vrot.slane %v2661_v51, 5  ;;  %v2665_v59 = vshrl.u32 %v7431_v33, 16  ;;  %v2671_v60 = vshll.u32 %v7438_v44, 16  ;;  %v936_v62 = vshrl.u32 %v7442_v46, 16 }
  0x6c   : > { %6376 = vmatprep.mubr.msk.bf16.mxu0 %vm1273_vm3, %v5673_v52  ;;  %v924_v63 = vsel %vm7352_vm4, %v919_v53, %v923_v37  ;;  %v929_v43 = vrot.slane %v928_v54, 4  ;;  %v2658_v0 = vor.u32 %v2657_v56, %v2654_v50  ;;  %v939_v3 = vshll.u32 %v7442_v46, 16  ;;  %v7492_v53 = vld [vmem:[%s7329_s20 + $0x40] sm:$0xf] }
  0x6d   : > { %v2667_v8 = vrot.slane %v2665_v59, 4  ;;  %v2673_v9 = vrot.slane %v2671_v60, 5  ;;  %v938_v10 = vrot.slane %v936_v62, 4  ;;  %v945_v12 = vshll.u32 %v7448_v57, 16 }
  0x6e   : > { %v934_v15 = vsel %vm7352_vm4, %v929_v43, %v933_v48  ;;  %v2659_v16 = vrot.slane %v2658_v0, 4  ;;  %v941_v17 = vrot.slane %v939_v3, 5  ;;  %v949_v18 = vshrl.u32 %v7448_v57, 16 }
  0x6f   : > { %v5479_v20 = vcombine.low %v924_v63, %v934_v15  ;;  %v2668_v22 = vor.u32 %v2667_v8, %v2663_v58  ;;  %v947_v25 = vrot.slane %v945_v12, 5  ;;  %v955_v26 = vshll.u32 %v801_v1, 16  ;;  %v804_v63 = vld [vmem:[%s7329_s20 + $0x44] sm:$0x1] }
  0x70   : > { %v2664_v27 = vsel %vm7352_vm4, %v2659_v16, %v2663_v58  ;;  %v942_v28 = vor.u32 %v941_v17, %v938_v10  ;;  %v951_v30 = vrot.slane %v949_v18, 4  ;;  %v2676_v32 = vshrl.u32 %v7459_v5, 16  ;;  %v7505_v10 = vld [vmem:[%s7329_s20 + $0xfc] sm:$0xf]  ;;  %v7508_v18 = vld [vmem:[%s7329_s20 + $0x100] sm:$0xf] }
  0x71   : > { %6241 = vmatmul.mubr.msk.bf16.gmra.mrb[4].mxu1 %vm1273_vm3, %v5479_v20  ;;  %v2669_v36 = vrot.slane %v2668_v22, 4  ;;  %v957_v37 = vrot.slane %v955_v26, 5  ;;  %v2679_v38 = vshll.u32 %v7459_v5, 16  ;;  %v2685_v40 = vshll.u32 %v7463_v14, 16 }
  0x72   : > { %v943_v7 = vrot.slane %v942_v28, 4  ;;  %v952_v41 = vor.u32 %v951_v30, %v947_v25  ;;  %v2678_v42 = vrot.slane %v2676_v32, 4  ;;  %v2689_v45 = vshrl.u32 %v7463_v14, 16  ;;  %v7514_v30 = vld [vmem:[%s7329_s20 + $0x104] sm:$0x1] }
  0x73   : > { %v2674_v48 = vsel %vm7352_vm4, %v2669_v36, %v2673_v9  ;;  %v2681_v50 = vrot.slane %v2679_v38, 5  ;;  %v2687_v51 = vrot.slane %v2685_v40, 5  ;;  %v2695_v52 = vshll.u32 %v7478_v31, 16 }
  0x74   : > { %v5674_v54 = vcombine.low %v2664_v27, %v2674_v48  ;;  %v948_v56 = vsel %vm7352_vm4, %v943_v7, %v947_v25  ;;  %v953_v58 = vrot.slane %v952_v41, 4  ;;  %v2691_v59 = vrot.slane %v2689_v45, 4  ;;  %v7522_v41 = vld [vmem:[%s7329_s20 + $0x48] sm:$0xf] }
  0x75   : > { %v2682_v60 = vor.u32 %v2681_v50, %v2678_v42  ;;  %v2697_v62 = vrot.slane %v2695_v52, 5  ;;  %v960_v43 = vshrl.u32 %v7486_v47, 16  ;;  %v963_v0 = vshll.u32 %v7486_v47, 16 }
  0x76   : > { %6377 = vmatmul.mubr.msk.bf16.gmra.mrb[4].mxu0 %vm1273_vm3, %v5674_v54  ;;  %v958_v1 = vsel %vm7352_vm4, %v953_v58, %v957_v37  ;;  %v2692_v3 = vor.u32 %v2691_v59, %v2687_v51  ;;  %v969_v8 = vshll.u32 %v7492_v53, 16  ;;  %v973_v9 = vshrl.u32 %v7492_v53, 16 }
  0x77   : > { %v5480_v12 = vcombine.low %v948_v56, %v958_v1  ;;  %v2683_v15 = vrot.slane %v2682_v60, 4  ;;  %v962_v16 = vrot.slane %v960_v43, 4  ;;  %v965_v17 = vrot.slane %v963_v0, 5  ;;  %v7538_v0 = vld [vmem:[%s9355_s1 + $0x4] sm:$0x3] }
  0x78   : > { %v2693_v20 = vrot.slane %v2692_v3, 4  ;;  %v971_v22 = vrot.slane %v969_v8, 5  ;;  %v975_v25 = vrot.slane %v973_v9, 4  ;;  %v979_v26 = vshll.u32 %v804_v63, 16  ;;  %6800 = vmatprep.subr.msk.bf16.mxu1 %vm1322_vm0, %v7538_v0 }
  0x79   : > { %6244 = vmatprep.mubr.msk.bf16.mxu1 %vm1273_vm3, %v5480_v12  ;;  %v2688_v27 = vsel %vm7352_vm4, %v2683_v15, %v2687_v51  ;;  %v966_v28 = vor.u32 %v965_v17, %v962_v16  ;;  %v2700_v32 = vshrl.u32 %v7505_v10, 16  ;;  %v2703_v36 = vshll.u32 %v7505_v10, 16  ;;  %v7525_v51 = vld [vmem:[%s7329_s20 + $0x4c] sm:$0xf]  ;;  %v7544_v12 = vld [vmem:[%s7329_s20 + $0x108] sm:$0xf] }
  0x7a   : > { %v2698_v37 = vsel %vm7352_vm4, %v2693_v20, %v2697_v62  ;;  %v976_v38 = vor.u32 %v975_v25, %v971_v22  ;;  %v981_v40 = vrot.slane %v979_v26, 5  ;;  %v2709_v7 = vshll.u32 %v7508_v18, 16  ;;  %v807_v62 = vld [vmem:[%s7329_s20 + $0x50] sm:$0x1] }
  0x7b   : > { %v5675_v42 = vcombine.low %v2688_v27, %v2698_v37  ;;  %v967_v45 = vrot.slane %v966_v28, 4  ;;  %v2702_v48 = vrot.slane %v2700_v32, 4  ;;  %v2705_v50 = vrot.slane %v2703_v36, 5  ;;  %v7556_v37 = vld [vmem:[%s7329_s20 + $0x110] sm:$0x1] }
  0x7c   : > { %v977_v52 = vrot.slane %v976_v38, 4  ;;  %v2711_v54 = vrot.slane %v2709_v7, 5  ;;  %v2713_v56 = vshrl.u32 %v7508_v18, 16  ;;  %v2719_v58 = vshll.u32 %v7514_v30, 16 }
  0x7d   : > { %6380 = vmatprep.mubr.msk.bf16.mxu0 %vm1273_vm3, %v5675_v42  ;;  %v972_v59 = vsel %vm7352_vm4, %v967_v45, %v971_v22  ;;  %v2706_v60 = vor.u32 %v2705_v50, %v2702_v48  ;;  %v984_v63 = vshrl.u32 %v7522_v41, 16  ;;  %v987_v43 = vshll.u32 %v7522_v41, 16  ;;  %v7549_v22 = vld [vmem:[%s7329_s20 + $0x10c] sm:$0xf] }
  0x7e   : > { %v982_v1 = vsel %vm7352_vm4, %v977_v52, %v981_v40  ;;  %v2715_v3 = vrot.slane %v2713_v56, 4  ;;  %v2721_v8 = vrot.slane %v2719_v58, 5  ;;  %v993_v9 = vshll.u32 %v7525_v51, 16 }
  0x7f   : > { %v5481_v15 = vcombine.low %v972_v59, %v982_v1  ;;  %v2707_v16 = vrot.slane %v2706_v60, 4  ;;  %v986_v17 = vrot.slane %v984_v63, 4  ;;  %v989_v20 = vrot.slane %v987_v43, 5  ;;  %v7569_v43 = vld [vmem:[%s7329_s20 + $0x58] sm:$0xf] }
  0x80   : > { %v2716_v25 = vor.u32 %v2715_v3, %v2711_v54  ;;  %v995_v26 = vrot.slane %v993_v9, 5  ;;  %v997_v27 = vshrl.u32 %v7525_v51, 16  ;;  %v1003_v28 = vshll.u32 %v807_v62, 16 }
  0x81   : > { %6245 = vmatmul.mubr.msk.bf16.gmra.mrb[8].mxu1 %vm1273_vm3, %v5481_v15  ;;  %v2712_v32 = vsel %vm7352_vm4, %v2707_v16, %v2711_v54  ;;  %v990_v36 = vor.u32 %v989_v20, %v986_v17  ;;  %v2724_v38 = vshrl.u32 %v7544_v12, 16  ;;  %v2727_v40 = vshll.u32 %v7544_v12, 16  ;;  %v7563_v54 = vld [vmem:[%s7329_s20 + $0x54] sm:$0xf]  ;;  %v810_v16 = vld [vmem:[%s7329_s20 + $0x5c] sm:$0x1] }
  0x82   : > { %v2717_v7 = vrot.slane %v2716_v25, 4  ;;  %v999_v42 = vrot.slane %v997_v27, 4  ;;  %v1005_v45 = vrot.slane %v1003_v28, 5  ;;  %v2733_v48 = vshll.u32 %v7549_v22, 16 }
  0x83   : > { %v991_v50 = vrot.slane %v990_v36, 4  ;;  %v2726_v52 = vrot.slane %v2724_v38, 4  ;;  %v2729_v56 = vrot.slane %v2727_v40, 5  ;;  %v2737_v58 = vshrl.u32 %v7549_v22, 16 }
  0x84   : > { %v2722_v59 = vsel %vm7352_vm4, %v2717_v7, %v2721_v8  ;;  %v1000_v60 = vor.u32 %v999_v42, %v995_v26  ;;  %v2735_v62 = vrot.slane %v2733_v48, 5  ;;  %v2743_v63 = vshll.u32 %v7556_v37, 16  ;;  %v7585_v48 = vld [vmem:[%s7329_s20 + $0x118] sm:$0xf] }
  0x85   : > { %v5676_v1 = vcombine.low %v2712_v32, %v2722_v59  ;;  %v996_v3 = vsel %vm7352_vm4, %v991_v50, %v995_v26  ;;  %v2730_v9 = vor.u32 %v2729_v56, %v2726_v52  ;;  %v2739_v15 = vrot.slane %v2737_v58, 4  ;;  %v7580_v26 = vld [vmem:[%s7329_s20 + $0x114] sm:$0xf] }
  0x86   : > { %v1001_v17 = vrot.slane %v1000_v60, 4  ;;  %v2745_v20 = vrot.slane %v2743_v63, 5  ;;  %v1008_v25 = vshrl.u32 %v7563_v54, 16  ;;  %v1011_v8 = vshll.u32 %v7563_v54, 16 }
  0x87   : > { %6381 = vmatmul.mubr.msk.bf16.gmra.mrb[8].mxu0 %vm1273_vm3, %v5676_v1  ;;  %v2731_v27 = vrot.slane %v2730_v9, 4  ;;  %v2740_v28 = vor.u32 %v2739_v15, %v2735_v62  ;;  %v1017_v36 = vshll.u32 %v7569_v43, 16  ;;  %v1021_v32 = vshrl.u32 %v7569_v43, 16  ;;  %v7590_v1 = vld [vmem:[%s7329_s20 + $0x11c] sm:$0x1] }
  0x88   : > { %v1006_v38 = vsel %vm7352_vm4, %v1001_v17, %v1005_v45  ;;  %v1010_v40 = vrot.slane %v1008_v25, 4  ;;  %v1013_v7 = vrot.slane %v1011_v8, 5  ;;  %v1027_v42 = vshll.u32 %v810_v16, 16  ;;  %v7600_v16 = vld [vmem:[%s7329_s20 + $0x60] sm:$0xf] }
  0x89   : > { %v5482_v50 = vcombine.low %v996_v3, %v1006_v38  ;;  %v2736_v52 = vsel %vm7352_vm4, %v2731_v27, %v2735_v62  ;;  %v2741_v56 = vrot.slane %v2740_v28, 4  ;;  %v1019_v58 = vrot.slane %v1017_v36, 5  ;;  %v7603_v28 = vld [vmem:[%s7329_s20 + $0x64] sm:$0xf] }
  0x8a   : > { %v1014_v59 = vor.u32 %v1013_v7, %v1010_v40  ;;  %v1023_v60 = vrot.slane %v1021_v32, 4  ;;  %v1029_v63 = vrot.slane %v1027_v42, 5  ;;  %v2748_v45 = vshrl.u32 %v7580_v26, 16 }
  0x8b   : > { %6248 = vmatprep.mubr.msk.bf16.mxu1 %vm1273_vm3, %v5482_v50  ;;  %v2746_v9 = vsel %vm7352_vm4, %v2741_v56, %v2745_v20  ;;  %v2751_v3 = vshll.u32 %v7580_v26, 16  ;;  %v2757_v15 = vshll.u32 %v7585_v48, 16  ;;  %v2761_v62 = vshrl.u32 %v7585_v48, 16 }
  0x8c   : > { %v5677_v17 = vcombine.low %v2736_v52, %v2746_v9  ;;  %v1015_v25 = vrot.slane %v1014_v59, 4  ;;  %v1024_v8 = vor.u32 %v1023_v60, %v1019_v58  ;;  %v2750_v27 = vrot.slane %v2748_v45, 4  ;;  %v813_v60 = vld [vmem:[%s7329_s20 + $0x68] sm:$0x1] }
  0x8d   : > { %v2753_v36 = vrot.slane %v2751_v3, 5  ;;  %v2759_v32 = vrot.slane %v2757_v15, 5  ;;  %v2763_v38 = vrot.slane %v2761_v62, 4  ;;  %v2767_v20 = vshll.u32 %v7590_v1, 16 }
  0x8e   : > { %6384 = vmatprep.mubr.msk.bf16.mxu0 %vm1273_vm3, %v5677_v17  ;;  %v1020_v40 = vsel %vm7352_vm4, %v1015_v25, %v1019_v58  ;;  %v1025_v7 = vrot.slane %v1024_v8, 4  ;;  %v1032_v42 = vshrl.u32 %v7600_v16, 16  ;;  %v1035_v50 = vshll.u32 %v7600_v16, 16  ;;  %v7617_v58 = vld [vmem:[%s7329_s20 + $0x6c] sm:$0xf] }
  0x8f   : > { %v2754_v52 = vor.u32 %v2753_v36, %v2750_v27  ;;  %v2764_v56 = vor.u32 %v2763_v38, %v2759_v32  ;;  %v2769_v59 = vrot.slane %v2767_v20, 5  ;;  %v1041_v45 = vshll.u32 %v7603_v28, 16 }
  0x90   : > { %v1030_v9 = vsel %vm7352_vm4, %v1025_v7, %v1029_v63  ;;  %v1034_v3 = vrot.slane %v1032_v42, 4  ;;  %v1037_v15 = vrot.slane %v1035_v50, 5  ;;  %v1045_v62 = vshrl.u32 %v7603_v28, 16  ;;  %v7633_v50 = vld [vmem:[%s7329_s20 + $0x70] sm:$0xf] }
  0x91   : > { %v5483_v17 = vcombine.low %v1020_v40, %v1030_v9  ;;  %v2755_v25 = vrot.slane %v2754_v52, 4  ;;  %v2765_v8 = vrot.slane %v2764_v56, 4  ;;  %v1043_v34 = vrot.slane %v1041_v45, 5 }
  0x92   : > { %v1038_v27 = vor.u32 %v1037_v15, %v1034_v3  ;;  %v1047_v36 = vrot.slane %v1045_v62, 4  ;;  %v1051_v38 = vshll.u32 %v813_v60, 16  ;;  %v5703_v63 = vrot.slane %v7335_v21, 9  ;;  %v7637_v21 = vld [vmem:[%s7329_s20 + $0x74] sm:$0x1] }
  0x93   : > { %6249 = vmatmul.mubr.msk.bf16.gmra.mrb[12].mxu1 %vm1273_vm3, %v5483_v17  ;;  %v2760_v40 = vsel %vm7352_vm4, %v2755_v25, %v2759_v32  ;;  %v2770_v7 = vsel %vm7352_vm4, %v2765_v8, %v2769_v59  ;;  %v3275_v42 = vrot.slane %v7338_v23, 5  ;;  %v1056_v52 = vshrl.u32 %v7617_v58, 16 }
  0x94   : > { %v5678_v56 = vcombine.low %v2760_v40, %v2770_v7  ;;  %v1039_v60 = vrot.slane %v1038_v27, 4  ;;  %v1048_v45 = vor.u32 %v1047_v36, %v1043_v34  ;;  %v1053_v9 = vrot.slane %v1051_v38, 5 }
  0x95   : > { %v3276_v3 = vsel %vm7621_vm7, %v5703_v63, %v3275_v42  ;;  %v3277_v32 = vrot.slane %v3275_v42, 4  ;;  %v1058_v15 = vrot.slane %v1056_v52, 4  ;;  %v1059_v59 = vshll.u32 %v7617_v58, 16  ;;  %v7654_v63 = vld [vmem:[%s7329_s20 + $0x78] sm:$0xf] }
  0x96   : > { %6385 = vmatmul.mubr.msk.bf16.gmra.mrb[12].mxu0 %vm1273_vm3, %v5678_v56  ;;  %v1044_v23 = vsel %vm7352_vm4, %v1039_v60, %v1043_v34  ;;  %v1049_v62 = vrot.slane %v1048_v45, 4  ;;  %v1065_v17 = vshll.u32 %v7633_v50, 16  ;;  %v1069_v25 = vshrl.u32 %v7633_v50, 16  ;;  %v7659_v52 = vld [vmem:[%s7329_s20 + $0x7c] sm:$0xf] }
  0x97   : > { %v3279_v8 = vsel %vm7621_vm7, %v3277_v32, %v3278_v4  ;;  %v1061_v27 = vrot.slane %v1059_v59, 5  ;;  %v1075_v36 = vshll.u32 %v7637_v21, 16  ;;  %v5704_v38 = vrot.slane %v7365_v61, 9  ;;  %v819_v45 = vld [vmem:[%s7329_s20 + $0x80] sm:$0x1] }
  0x98   : > { %v1054_v34 = vsel %vm7352_vm4, %v1049_v62, %v1053_v9  ;;  %v5720_v40 = vcombine.low %v3276_v3, %v3279_v8  ;;  %v1067_v7 = vrot.slane %v1065_v17, 5  ;;  %v1071_v42 = vrot.slane %v1069_v25, 4 }
  0x99   : > { %v5484_v56 = vcombine.low %v1044_v23, %v1054_v34  ;;  %v1062_v24 = vor.u32 %v1061_v27, %v1058_v15  ;;  %v1077_v60 = vrot.slane %v1075_v36, 5  ;;  %v3283_v4 = vsel %vm7621_vm7, %v5704_v38, %v3282_v29  ;;  %v7683_v34 = vld [vmem:[%s7329_s20 + $0x84] sm:$0xf] }
  0x9a   : > { %6406 = vmatprep.mubr.msk.bf16.mxu0 %vm1273_vm3, %v5720_v40  ;;  %v1072_v61 = vor.u32 %v1071_v42, %v1067_v7  ;;  %v3284_v9 = vrot.slane %v3282_v29, 4  ;;  %v3859_v3 = vsel %vm1322_vm0, %v7471_v19, 0  ;;  %v1080_v32 = vshrl.u32 %v7654_v63, 16  ;;  %v7686_v40 = vld [vmem:[%s7329_s20 + $0x88] sm:$0xf] }
  0x9b   : > { %6252 = vmatprep.mubr.msk.bf16.mxu1 %vm1273_vm3, %v5484_v56  ;;  %v1063_v15 = vrot.slane %v1062_v24, 4  ;;  %v1083_v59 = vshll.u32 %v7654_v63, 16  ;;  %v1089_v23 = vshll.u32 %v7659_v52, 16  ;;  %v1093_v62 = vshrl.u32 %v7659_v52, 16 }
  0x9c   : > { %v1073_v17 = vrot.slane %v1072_v61, 4  ;;  %v9391_v2 = vrot.slane %v7375_v6, 5  ;;  %v1082_v25 = vrot.slane %v1080_v32, 4  ;;  %v1099_v19 = vshll.u32 %v819_v45, 16  ;;  %v7694_v45 = vld [vmem:[%s9355_s1 + $0xe] sm:$0x3] }
  0x9d   : > { %v1068_v8 = vsel %vm7352_vm4, %v1063_v15, %v1067_v7  ;;  %v1085_v36 = vrot.slane %v1083_v59, 5  ;;  %v1091_v38 = vrot.slane %v1089_v23, 5  ;;  %v1095_v6 = vrot.slane %v1093_v62, 4 }
  0x9e   : > { %v3286_v29 = vsel %vm7621_vm7, %v3284_v9, %v9391_v2  ;;  %v1078_v42 = vsel %vm7352_vm4, %v1073_v17, %v1077_v60  ;;  %v1101_v56 = vrot.slane %v1099_v19, 5  ;;  %v5705_v24 = vrot.slane %v7399_v35, 9  ;;  %v822_v60 = vld [vmem:[%s7329_s20 + $0x8c] sm:$0x1] }
  0x9f   : > { %v5721_v27 = vcombine.low %v3283_v4, %v3286_v29  ;;  %v5485_v7 = vcombine.low %v1068_v8, %v1078_v42  ;;  %v1086_v4 = vor.u32 %v1085_v36, %v1082_v25  ;;  %v3289_v61 = vrot.slane %v7403_v49, 5  ;;  %v7714_v36 = vld [vmem:[%s7329_s20 + $0x90] sm:$0xf] }
  0xa0   : > { %v3292_v9 = vrot.slane %v7408_v55, 5  ;;  %v1096_v32 = vor.u32 %v1095_v6, %v1091_v38  ;;  %v1104_v15 = vshrl.u32 %v7683_v34, 16  ;;  %v1107_v35 = vshll.u32 %v7683_v34, 16 }
  0xa1   : > { %6407 = vmatmul.mubr.msk.bf16.vlgmr.msra.gmra.mrb[0].mxu0 %vm1273_vm3, %v5721_v27  ;;  %v1113_v59 = vshll.u32 %v7686_v40, 16  ;;  %6253 = vmatmul.mubr.msk.bf16.gmra.mrb[16].mxu1 %vm1273_vm3, %v5485_v7  ;;  %v1087_v23 = vrot.slane %v1086_v4, 4  ;;  %v3290_v62 = vsel %vm7621_vm7, %v5705_v24, %v3289_v61  ;;  %v3291_v17 = vrot.slane %v3289_v61, 4  ;;  %v7720_v4 = vld [vmem:[%s7329_s20 + $0x94] sm:$0xf] }
  0xa2   : > { %6439 = vmatpush3.bf16.msra.mxu0 %v3859_v3  ;;  %v1117_v49 = vshrl.u32 %v7686_v40, 16  ;;  %v1097_v55 = vrot.slane %v1096_v32, 4  ;;  %v1106_v3 = vrot.slane %v1104_v15, 4  ;;  %v1109_v2 = vrot.slane %v1107_v35, 5  ;;  %v825_v35 = vld [vmem:[%s7329_s20 + $0x98] sm:$0x1] }
  0xa3   : > { %6806 = vmatprep.subr.msk.bf16.mxu0 %vm1322_vm0, %v7694_v45  ;;  %v1115_v29 = vrot.slane %v1113_v59, 5  ;;  %v1092_v25 = vsel %vm7352_vm4, %v1087_v23, %v1091_v38  ;;  %v3293_v19 = vsel %vm7621_vm7, %v3291_v17, %v3292_v9  ;;  %v1123_v27 = vshll.u32 %v822_v60, 16 }
  0xa4   : > { %v1119_v8 = vrot.slane %v1117_v49, 4  ;;  %v1102_v42 = vsel %vm7352_vm4, %v1097_v55, %v1101_v56  ;;  %v5722_v6 = vcombine.low %v3290_v62, %v3293_v19  ;;  %v1110_v24 = vor.u32 %v1109_v2, %v1106_v3 }
  0xa5   : > { %v5706_v7 = vrot.slane %v7425_v13, 9  ;;  %v5486_v61 = vcombine.low %v1092_v25, %v1102_v42  ;;  %v1125_v38 = vrot.slane %v1123_v27, 5  ;;  %v3296_v15 = vrot.slane %v7431_v33, 5 }
  0xa6   : > { %v1120_v32 = vor.u32 %v1119_v8, %v1115_v29  ;;  %6410 = vmatprep.mubr.msk.bf16.mxu0 %vm1273_vm3, %v5722_v6  ;;  %v1111_v9 = vrot.slane %v1110_v24, 4  ;;  %v3299_v60 = vrot.slane %v7438_v44, 5  ;;  %v1128_v56 = vshrl.u32 %v7714_v36, 16  ;;  %v7740_v8 = vld [vmem:[%s7329_s20 + $0x9c] sm:$0xf] }
  0xa7   : > { %v1131_v59 = vshll.u32 %v7714_v36, 16  ;;  %6256 = vmatprep.mubr.msk.bf16.mxu1 %vm1273_vm3, %v5486_v61  ;;  %v3297_v23 = vsel %vm7621_vm7, %v5706_v7, %v3296_v15  ;;  %v3298_v62 = vrot.slane %v3296_v15, 4  ;;  %v1137_v33 = vshll.u32 %v7720_v4, 16 }
  0xa8   : > { %v1121_v13 = vrot.slane %v1120_v32, 4  ;;  %v1116_v17 = vsel %vm7352_vm4, %v1111_v9, %v1115_v29  ;;  %v1130_v44 = vrot.slane %v1128_v56, 4  ;;  %v1141_v55 = vshrl.u32 %v7720_v4, 16  ;;  %v7743_v29 = vld [vmem:[%s7329_s20 + $0xa0] sm:$0xf] }
  0xa9   : > { %v1133_v49 = vrot.slane %v1131_v59, 5  ;;  %v3300_v2 = vsel %vm7621_vm7, %v3298_v62, %v3299_v60  ;;  %v1139_v25 = vrot.slane %v1137_v33, 5  ;;  %v1147_v19 = vshll.u32 %v825_v35, 16  ;;  %v7751_v60 = vld [vmem:[%s7329_s20 + $0xa4] sm:$0x1] }
  0xaa   : > { %v1126_v3 = vsel %vm7352_vm4, %v1121_v13, %v1125_v38  ;;  %v5723_v42 = vcombine.low %v3297_v23, %v3300_v2  ;;  %v1143_v24 = vrot.slane %v1141_v55, 4  ;;  %v5707_v61 = vrot.slane %v7459_v5, 9 }
  0xab   : > { %v5487_v27 = vcombine.low %v1116_v17, %v1126_v3  ;;  %v1134_v6 = vor.u32 %v1133_v49, %v1130_v44  ;;  %v1149_v7 = vrot.slane %v1147_v19, 5  ;;  %v3303_v32 = vrot.slane %v7463_v14, 5  ;;  %v7765_v3 = vld [vmem:[%s7329_s20 + $0xa8] sm:$0xf] }
  0xac   : > { %v3306_v38 = vrot.slane %v7478_v31, 5  ;;  %6411 = vmatmul.mubr.msk.bf16.gmra.mrb[4].mxu0 %vm1273_vm3, %v5723_v42  ;;  %v1144_v9 = vor.u32 %v1143_v24, %v1139_v25  ;;  %v1152_v35 = vshrl.u32 %v7740_v8, 16  ;;  %v1155_v56 = vshll.u32 %v7740_v8, 16  ;;  %9392 = vst [vmem:[#allocation7_spill] sm:$0xff] %v7765_v3  ;;  %v7771_v42 = vld [vmem:[%s7329_s20 + $0xac] sm:$0xf] }
  0xad   : > { %6257 = vmatmul.mubr.msk.bf16.gmra.mrb[20].mxu1 %vm1273_vm3, %v5487_v27  ;;  %v1135_v15 = vrot.slane %v1134_v6, 4  ;;  %v3304_v5 = vsel %vm7621_vm7, %v5707_v61, %v3303_v32  ;;  %v3305_v59 = vrot.slane %v3303_v32, 4  ;;  %v1161_v14 = vshll.u32 %v7743_v29, 16  ;;  %9393 = vst [vmem:[#allocation8_spill] sm:$0xff] %v7771_v42 }
  0xae   : > { %v1165_v31 = vshrl.u32 %v7743_v29, 16  ;;  %v1145_v23 = vrot.slane %v1144_v9, 4  ;;  %v1154_v62 = vrot.slane %v1152_v35, 4  ;;  %v1157_v33 = vrot.slane %v1155_v56, 5  ;;  %v7777_v9 = vld [vmem:[%s7329_s20 + $0xb0] sm:$0x1] }
  0xaf   : > { %v1140_v13 = vsel %vm7352_vm4, %v1135_v15, %v1139_v25  ;;  %v3307_v17 = vsel %vm7621_vm7, %v3305_v59, %v3306_v38  ;;  %v1163_v44 = vrot.slane %v1161_v14, 5  ;;  %v1171_v55 = vshll.u32 %v7751_v60, 16  ;;  %9394 = vst [vmem:[#allocation9_spill] sm:$0xff] %v7777_v9 }
  0xb0   : > { %v1167_v49 = vrot.slane %v1165_v31, 4  ;;  %v1150_v2 = vsel %vm7352_vm4, %v1145_v23, %v1149_v7  ;;  %v5724_v19 = vcombine.low %v3304_v5, %v3307_v17  ;;  %v1158_v27 = vor.u32 %v1157_v33, %v1154_v62  ;;  %v7794_v17 = vld [vmem:[%s7329_s20 + $0xb4] sm:$0xf] }
  0xb1   : > { %v5708_v25 = vrot.slane %v7505_v10, 9  ;;  %v5488_v6 = vcombine.low %v1140_v13, %v1150_v2  ;;  %v1173_v61 = vrot.slane %v1171_v55, 5  ;;  %v3310_v32 = vrot.slane %v7508_v18, 5 }
  0xb2   : > { %v1168_v24 = vor.u32 %v1167_v49, %v1163_v44  ;;  %6414 = vmatprep.mubr.msk.bf16.mxu0 %vm1273_vm3, %v5724_v19  ;;  %v1159_v38 = vrot.slane %v1158_v27, 4  ;;  %v3313_v15 = vrot.slane %v7514_v30, 5  ;;  %v1176_v7 = vshrl.u32 %v7765_v3, 16  ;;  %v7797_v19 = vld [vmem:[%s7329_s20 + $0xb8] sm:$0xf] }
  0xb3   : > { %v1179_v35 = vshll.u32 %v7765_v3, 16  ;;  %6260 = vmatprep.mubr.msk.bf16.mxu1 %vm1273_vm3, %v5488_v6  ;;  %v3311_v56 = vsel %vm7621_vm7, %v5708_v25, %v3310_v32  ;;  %v3312_v18 = vrot.slane %v3310_v32, 4  ;;  %v1185_v5 = vshll.u32 %v7771_v42, 16  ;;  %9395 = vst [vmem:[#allocation10_spill] sm:$0xff] %v7797_v19 }
  0xb4   : > { %v1169_v10 = vrot.slane %v1168_v24, 4  ;;  %v1164_v30 = vsel %vm7352_vm4, %v1159_v38, %v1163_v44  ;;  %v1178_v59 = vrot.slane %v1176_v7, 4  ;;  %v1189_v31 = vshrl.u32 %v7771_v42, 16  ;;  %v834_v38 = vld [vmem:[%s7329_s20 + $0xbc] sm:$0x1] }
  0xb5   : > { %v1181_v14 = vrot.slane %v1179_v35, 5  ;;  %v3314_v23 = vsel %vm7621_vm7, %v3312_v18, %v3313_v15  ;;  %v1187_v62 = vrot.slane %v1185_v5, 5  ;;  %v1195_v33 = vshll.u32 %v7777_v9, 16 }
  0xb6   : > { %v1174_v13 = vsel %vm7352_vm4, %v1169_v10, %v1173_v61  ;;  %v5725_v55 = vcombine.low %v3311_v56, %v3314_v23  ;;  %v1191_v44 = vrot.slane %v1189_v31, 4  ;;  %v5709_v25 = vrot.slane %v7544_v12, 9  ;;  %v5614_v23 = vld [vmem:[%s7329_s20 + $0x124] sm:$0xf] }
  0xb7   : > { %v5489_v49 = vcombine.low %v1164_v30, %v1174_v13  ;;  %v1182_v2 = vor.u32 %v1181_v14, %v1178_v59  ;;  %v1197_v27 = vrot.slane %v1195_v33, 5  ;;  %v3317_v6 = vrot.slane %v7549_v22, 5  ;;  %v5613_v30 = vld [vmem:[%s7329_s20 + $0x120] sm:$0xf] }
  0xb8   : > { %v3320_v24 = vrot.slane %v7556_v37, 5  ;;  %6415 = vmatmul.mubr.msk.bf16.gmra.mrb[8].mxu0 %vm1273_vm3, %v5725_v55  ;;  %v1192_v32 = vor.u32 %v1191_v44, %v1187_v62  ;;  %v1200_v15 = vshrl.u32 %v7794_v17, 16  ;;  %v1203_v7 = vshll.u32 %v7794_v17, 16  ;;  %v5615_v44 = vld [vmem:[%s7329_s20 + $0x128] sm:$0x1] }
  0xb9   : > { %6261 = vmatmul.mubr.msk.bf16.gmra.mrb[24].mxu1 %vm1273_vm3, %v5489_v49  ;;  %v1183_v61 = vrot.slane %v1182_v2, 4  ;;  %v3318_v12 = vsel %vm7621_vm7, %v5709_v25, %v3317_v6  ;;  %v3319_v35 = vrot.slane %v3317_v6, 4  ;;  %v1209_v22 = vshll.u32 %v7797_v19, 16 }
  0xba   : > { %v1213_v37 = vshrl.u32 %v7797_v19, 16  ;;  %v1193_v56 = vrot.slane %v1192_v32, 4  ;;  %v1202_v18 = vrot.slane %v1200_v15, 4  ;;  %v1205_v5 = vrot.slane %v1203_v7, 5 }
  0xbb   : > { %v1188_v10 = vsel %vm7352_vm4, %v1183_v61, %v1187_v62  ;;  %v3321_v59 = vsel %vm7621_vm7, %v3319_v35, %v3320_v24  ;;  %v1211_v14 = vrot.slane %v1209_v22, 5  ;;  %v1219_v13 = vshll.u32 %v834_v38, 16 }
  0xbc   : > { %v1215_v31 = vrot.slane %v1213_v37, 4  ;;  %v1198_v33 = vsel %vm7352_vm4, %v1193_v56, %v1197_v27  ;;  %v5726_v49 = vcombine.low %v3318_v12, %v3321_v59  ;;  %v1206_v55 = vor.u32 %v1205_v5, %v1202_v18  ;;  %v7839_v56 = vld [vmem:[%s7329_s20 + $0x4] sm:$0xf]  ;;  %v5616_v5 = vld [vmem:[%s7329_s20 + $0x12c] sm:$0xf] }
  0xbd   : > { %v5710_v2 = vrot.slane %v7580_v26, 9  ;;  %v5490_v62 = vcombine.low %v1188_v10, %v1198_v33  ;;  %v1221_v6 = vrot.slane %v1219_v13, 5  ;;  %v3324_v61 = vrot.slane %v7585_v48, 5  ;;  %v7836_v10 = vld [vmem:[%s7329_s20] sm:$0xf] }
  0xbe   : > { %v1216_v25 = vor.u32 %v1215_v31, %v1211_v14  ;;  %6418 = vmatprep.mubr.msk.bf16.mxu0 %vm1273_vm3, %v5726_v49  ;;  %v1207_v24 = vrot.slane %v1206_v55, 4  ;;  %v3327_v32 = vrot.slane %v7590_v1, 5  ;;  %v5711_v38 = vrot.slane %v5613_v30, 9  ;;  %v5617_v30 = vld [vmem:[%s7329_s20 + $0x130] sm:$0xf] }
  0xbf   : > { %v3331_v27 = vrot.slane %v5614_v23, 5  ;;  %6264 = vmatprep.mubr.msk.bf16.mxu1 %vm1273_vm3, %v5490_v62  ;;  %v3325_v15 = vsel %vm7621_vm7, %v5710_v2, %v3324_v61  ;;  %v3326_v7 = vrot.slane %v3324_v61, 4  ;;  %v3334_v48 = vrot.slane %v5615_v44, 5  ;;  %v5618_v13 = vld [vmem:[%s7329_s20 + $0x134] sm:$0x1] }
  0xc0   : > { %v1217_v26 = vrot.slane %v1216_v25, 4  ;;  %v1212_v12 = vsel %vm7352_vm4, %v1207_v24, %v1211_v14  ;;  %v5508_v18 = vcombine.low %v7836_v10, %v7839_v56  ;;  %v5619_v33 = vld [vmem:[%s7329_s20 + $0x138] sm:$0xf]  ;;  %v5620_v49 = vld [vmem:[%s7329_s20 + $0x13c] sm:$0xf]  ;;  %v5712_v55 = vrot.slane %v5616_v5, 9 }
  0xc1   : > { %v3332_v1 = vsel %vm7621_vm7, %v5711_v38, %v3331_v27  ;;  %v3333_v35 = vrot.slane %v3331_v27, 4  ;;  %v3328_v37 = vsel %vm7621_vm7, %v3326_v7, %v3327_v32  ;;  %v3338_v2 = vrot.slane %v5617_v30, 5  ;;  %v5621_v44 = vld [vmem:[%s7329_s20 + $0x140] sm:$0x1]  ;;  %v5622_v62 = vld [vmem:[%s7329_s20 + $0x144] sm:$0xf] }
  0xc2   : > { %v1222_v22 = vsel %vm7352_vm4, %v1217_v26, %v1221_v6  ;;  %v5727_v14 = vcombine.low %v3325_v15, %v3328_v37  ;;  %v3341_v25 = vrot.slane %v5618_v13, 5  ;;  %v5623_v6 = vld [vmem:[%s7329_s20 + $0x148] sm:$0xf]  ;;  %v5624_v61 = vld [vmem:[%s7329_s20 + $0x14c] sm:$0x1]  ;;  %v5713_v38 = vrot.slane %v5619_v33, 9 }
  0xc3   : > { %v5491_v59 = vcombine.low %v1212_v12, %v1222_v22  ;;  %v3335_v31 = vsel %vm7621_vm7, %v3333_v35, %v3334_v48  ;;  %v3339_v24 = vsel %vm7621_vm7, %v5712_v55, %v3338_v2  ;;  %v3340_v32 = vrot.slane %v3338_v2, 4  ;;  %v5625_v27 = vld [vmem:[%s7329_s20 + $0x150] sm:$0xf]  ;;  %v5626_v26 = vld [vmem:[%s7329_s20 + $0x154] sm:$0xf] }
  0xc4   : > { %v5728_v23 = vcombine.low %v3332_v1, %v3335_v31  ;;  %6419 = vmatmul.mubr.msk.bf16.gmra.mrb[12].mxu0 %vm1273_vm3, %v5727_v14  ;;  %v7863_v15 = vld [vmem:[%s7329_s20 + $0xc] sm:$0xf]  ;;  %v7866_v7 = vld [vmem:[%s7329_s20 + $0x10] sm:$0xf]  ;;  %v2009_v12 = vsel %vm1322_vm0, %v7538_v0, 0  ;;  %v3345_v1 = vrot.slane %v5620_v49, 5 }
  0xc5   : > { %6265 = vmatmul.mubr.msk.bf16.gmra.mrb[28].mxu1 %vm1273_vm3, %v5491_v59  ;;  %v5509_v48 = vcombine.low %v7863_v15, %v7866_v7  ;;  %v3348_v35 = vrot.slane %v5621_v44, 5  ;;  %v5627_v22 = vld [vmem:[%s7329_s20 + $0x158] sm:$0x1]  ;;  %v3342_v37 = vsel %vm7621_vm7, %v3340_v32, %v3341_v25  ;;  %v7879_v5 = vld [vmem:[%s7329_s20 + $0x1c] sm:$0xf]  ;;  %v5714_v59 = vrot.slane %v5622_v62, 9 }
  0xc6   : > { %6270 = vmatprep.mubr.msk.bf16.mxu1 %vm1273_vm3, %v5508_v18  ;;  %6422 = vmatprep.mubr.msk.bf16.mxu0 %vm1273_vm3, %v5728_v23  ;;  %v7876_v18 = vld [vmem:[%s7329_s20 + $0x18] sm:$0xf]  ;;  %v3352_v14 = vrot.slane %v5623_v6, 5  ;;  %v5729_v31 = vcombine.low %v3339_v24, %v3342_v37  ;;  %v3346_v0 = vsel %vm7621_vm7, %v5713_v38, %v3345_v1  ;;  %v3347_v13 = vrot.slane %v3345_v1, 4  ;;  %v5629_v44 = vld [vmem:[%s7329_s20 + $0x160] sm:$0xf] }
  0xc7   : > { %v5510_v30 = vcombine.low %v7876_v18, %v7879_v5  ;;  %v3355_v23 = vrot.slane %v5624_v61, 5  ;;  %v5715_v49 = vrot.slane %v5625_v27, 9  ;;  %v3359_v55 = vrot.slane %v5626_v26, 5  ;;  %v5632_v32 = vld [vmem:[%s7329_s20 + $0x16c] sm:$0xf] }
  0xc8   : > { %v3354_v33 = vrot.slane %v3352_v14, 4  ;;  %v3362_v2 = vrot.slane %v5627_v22, 5  ;;  %v3349_v25 = vsel %vm7621_vm7, %v3347_v13, %v3348_v35  ;;  %v7892_v62 = vld [vmem:[%s9355_s1 + $0x6] sm:$0x3]  ;;  %v3353_v24 = vsel %vm7621_vm7, %v5714_v59, %v3352_v14  ;;  %v5628_v1 = vld [vmem:[%s7329_s20 + $0x15c] sm:$0xf] }
  0xc9   : > { %v5730_v6 = vcombine.low %v3346_v0, %v3349_v25  ;;  %v3361_v61 = vrot.slane %v3359_v55, 4  ;;  %v3366_v27 = vrot.slane %v5629_v44, 5  ;;  %v3360_v26 = vsel %vm7621_vm7, %v5715_v49, %v3359_v55  ;;  %v5630_v35 = vld [vmem:[%s7329_s20 + $0x164] sm:$0x1]  ;;  %v5631_v22 = vld [vmem:[%s7329_s20 + $0x168] sm:$0xf] }
  0xca   : > { %v3356_v38 = vsel %vm7621_vm7, %v3354_v33, %v3355_v23  ;;  %v5633_v37 = vld [vmem:[%s7329_s20 + $0x170] sm:$0x1]  ;;  %v7916_v59 = vld [vmem:[%s7329_s20 + $0x28] sm:$0xf]  ;;  %v5512_v0 = vcombine.low %v7442_v46, %v7448_v57  ;;  %v5716_v23 = vrot.slane %v5628_v1, 9  ;;  %v3369_v49 = vrot.slane %v5630_v35, 5 }
  0xcb   : > { %v3368_v33 = vrot.slane %v3366_v27, 4  ;;  %v5717_v55 = vrot.slane %v5631_v22, 9  ;;  %v3376_v44 = vrot.slane %v5633_v37, 5  ;;  %v5635_v25 = vld [vmem:[%s7329_s20 + $0x178] sm:$0xf] }
  0xcc   : > { %6423 = vmatmul.mubr.msk.bf16.gmra.mrb[16].mxu0 %vm1273_vm3, %v5729_v31  ;;  %v5731_v31 = vcombine.low %v3353_v24, %v3356_v38  ;;  %v3367_v46 = vsel %vm7621_vm7, %v5716_v23, %v3366_v27  ;;  %v5634_v24 = vld [vmem:[%s7329_s20 + $0x174] sm:$0xf]  ;;  %v5636_v38 = vld [vmem:[%s7329_s20 + $0x17c] sm:$0x1]  ;;  %v5514_v27 = vcombine.low %v7522_v41, %v7525_v51  ;;  %v7950_v41 = vld [vmem:[%s7329_s20 + $0x180] sm:$0xf] }
  0xcd   : > { %6271 = vmatmul.mubr.msk.bf16.vlgmr.msra.gmra.mrb[0].mxu1 %vm1273_vm3, %v5509_v48  ;;  %6426 = vmatprep.mubr.msk.bf16.mxu0 %vm1273_vm3, %v5730_v6  ;;  %v3363_v48 = vsel %vm7621_vm7, %v3361_v61, %v3362_v2  ;;  %v3370_v57 = vsel %vm7621_vm7, %v3368_v33, %v3369_v49  ;;  %v5718_v35 = vrot.slane %v5634_v24, 9  ;;  %v3383_v37 = vrot.slane %v5636_v38, 5  ;;  %v7953_v51 = vld [vmem:[%s7329_s20 + $0x184] sm:$0xf]  ;;  %v6915_v38 = vld [vmem:[%s7329_s20 + $0x38] sm:$0x1] }
  0xce   : > { %6303 = vmatpush3.bf16.msra.mxu1 %v2009_v12  ;;  %6274 = vmatprep.mubr.msk.bf16.mxu1 %vm1273_vm3, %v5510_v30  ;;  %v3373_v12 = vrot.slane %v5632_v32, 5  ;;  %v7913_v30 = vld [vmem:[%s7329_s20 + $0x24] sm:$0xf]  ;;  %v5732_v13 = vcombine.low %v3360_v26, %v3363_v48  ;;  %v3380_v32 = vrot.slane %v5635_v25, 5  ;;  %v5513_v26 = vcombine.low %v7486_v47, %v7492_v53 }
  0xcf   : > { %6801 = vmatprep.subr.msk.bf16.mxu1 %vm1322_vm0, %v7892_v62  ;;  %v5511_v14 = vcombine.low %v7913_v30, %v7916_v59  ;;  %v5733_v48 = vcombine.low %v3367_v46, %v3370_v57  ;;  %v5518_v33 = vcombine.low %v7654_v63, %v7659_v52  ;;  %v4537_v49 = vsel %vm1322_vm0, %v7694_v45, 0  ;;  %v7999_v63 = vld [vmem:[%s7329_s20 + $0x1a8] sm:$0xf]  ;;  %v8003_v52 = vld [vmem:[%s7329_s20 + $0x1b0] sm:$0xf] }
  0xd0   : > { %v3375_v2 = vrot.slane %v3373_v12, 4  ;;  %v3374_v6 = vsel %vm7621_vm7, %v5717_v55, %v3373_v12  ;;  %v3382_v22 = vrot.slane %v3380_v32, 4  ;;  %v3381_v47 = vsel %vm7621_vm7, %v5718_v35, %v3380_v32  ;;  %v8006_v45 = vld [vmem:[%s7329_s20 + $0x1b4] sm:$0xf]  ;;  %v8034_v35 = vld [vmem:[%s7329_s20 + $0x1c0] sm:$0xf] }
  0xd1   : > { %v5515_v12 = vcombine.low %v7563_v54, %v7569_v43  ;;  %v7969_v54 = vld [vmem:[%s7329_s20 + $0x190] sm:$0xf]  ;;  %v7972_v43 = vld [vmem:[%s7329_s20 + $0x198] sm:$0xf]  ;;  %v1807_v46 = vrot.slane %v7866_v7, 5  ;;  %v1831_v11 = vrot.slane %v6915_v38, 5 }
  0xd2   : > { %v3377_v61 = vsel %vm7621_vm7, %v3375_v2, %v3376_v44  ;;  %v3384_v53 = vsel %vm7621_vm7, %v3382_v22, %v3383_v37  ;;  %v7990_v2 = vld [vmem:[%s9355_s1 + $0x10] sm:$0x3]  ;;  %v8011_v44 = vld [vmem:[%s7329_s20 + $0x8] sm:$0x1]  ;;  %v8016_v57 = vld [vmem:[%s7329_s20 + $0x14] sm:$0x1] }
  0xd3   : > { %v5734_v1 = vcombine.low %v3374_v6, %v3377_v61  ;;  %v1803_v25 = vrot.slane %v8011_v44, 5  ;;  %v1810_v32 = vrot.slane %v8016_v57, 5  ;;  %v5519_v61 = vcombine.low %v7683_v34, %v7686_v40  ;;  %v8092_v34 = vld [vmem:[%s7329_s20 + $0x1ec] sm:$0xf]  ;;  %v8136_v7 = vld [vmem:[%s7329_s20 + $0x1f8] sm:$0xf] }
  0xd4   : > { %6427 = vmatmul.mubr.msk.bf16.gmra.mrb[20].mxu0 %vm1273_vm3, %v5731_v31  ;;  %v5516_v31 = vcombine.low %v7600_v16, %v7603_v28  ;;  %v7975_v16 = vld [vmem:[%s7329_s20 + $0x19c] sm:$0xf]  ;;  %v5517_v28 = vcombine.low %v7617_v58, %v7633_v50  ;;  %v7996_v58 = vld [vmem:[%s7329_s20 + $0x1a4] sm:$0xf]  ;;  %v5541_v37 = vrot.slane %v7863_v15, 9  ;;  %v1809_v22 = vrot.slane %v1807_v46, 4 }
  0xd5   : > { %6275 = vmatmul.mubr.msk.bf16.gmra.mrb[4].mxu1 %vm1273_vm3, %v5511_v14  ;;  %6430 = vmatprep.mubr.msk.bf16.mxu0 %vm1273_vm3, %v5732_v13  ;;  %v5735_v14 = vcombine.low %v3381_v47, %v3384_v53  ;;  %v7966_v13 = vld [vmem:[%s7329_s20 + $0x18c] sm:$0xf]  ;;  %v5803_v55 = vcombine.low %v7972_v43, %v7975_v16  ;;  %v5804_v24 = vcombine.low %v7996_v58, %v7999_v63  ;;  %v8041_v53 = vld [vmem:[%s7329_s20 + $0x1c8] sm:$0xf]  ;;  %v1821_v15 = vrot.slane %v7916_v59, 5 }
  0xd6   : > { %6278 = vmatprep.mubr.msk.bf16.mxu1 %vm1273_vm3, %v5512_v0  ;;  %v5801_v0 = vcombine.low %v7950_v41, %v7953_v51  ;;  %v5802_v23 = vcombine.low %v7966_v13, %v7969_v54  ;;  %9397 = vst [vmem:[#allocation12_spill] sm:$0xff] %v8041_v53  ;;  %9402 = vst [vmem:[#allocation17_spill] sm:$0xff] %v8092_v34  ;;  %v8127_v44 = vsel %vm7621_vm7, %v1809_v22, %v1810_v32  ;;  %v6912_v47 = vld [vmem:[%s7329_s20 + $0x2c] sm:$0x1] }
  0xd7   : > { %v8131_v59 = vsel %vm1322_vm0, %v7892_v62, 0  ;;  %9404 = vst [vmem:[#allocation19_spill] sm:$0xff] %v8136_v7  ;;  %v5542_v57 = vrot.slane %v7876_v18, 9  ;;  %v6910_v62 = vld [vmem:[%s7329_s20 + $0x20] sm:$0x1]  ;;  %v4064_v6 = vshll.u32 %v7953_v51, 16 }
  0xd8   : > { %v1817_v22 = vrot.slane %v6910_v62, 5  ;;  %v1823_v62 = vrot.slane %v1821_v15, 4 }
  0xd9   : > { %v8234_v9 = vrot.slane %v4064_v6, 5 }
  0xdc   : > { %6431 = vmatmul.mubr.msk.bf16.gmra.mrb[24].mxu0 %vm1273_vm3, %v5733_v48  ;;  %v5520_v48 = vcombine.low %v7714_v36, %v7720_v4  ;;  %v5540_v36 = vrot.slane %v7836_v10, 9 }
  0xdd   : > { %6279 = vmatmul.mubr.msk.bf16.gmra.mrb[8].mxu1 %vm1273_vm3, %v5513_v26  ;;  %6434 = vmatprep.mubr.msk.bf16.mxu0 %vm1273_vm3, %v5734_v1  ;;  %v8031_v1 = vld [vmem:[%s7329_s20 + $0x1bc] sm:$0xf]  ;;  %v8099_v26 = vld [vmem:[%s7329_s20 + $0x1f0] sm:$0xf] }
  0xde   : > { %6282 = vmatprep.mubr.msk.bf16.mxu1 %vm1273_vm3, %v5514_v27  ;;  %v5805_v27 = vcombine.low %v8003_v52, %v8006_v45  ;;  %9396 = vst [vmem:[#allocation11_spill] sm:$0xff] %v8031_v1  ;;  %9403 = vst [vmem:[#allocation18_spill] sm:$0xff] %v8099_v26 }
  0xe4   : > { %6435 = vmatmul.mubr.msk.bf16.gmra.mrb[28].mxu0 %vm1273_vm3, %v5735_v14 }
  0xe5   : > { %6283 = vmatmul.mubr.msk.bf16.gmra.mrb[12].mxu1 %vm1273_vm3, %v5515_v12  ;;  %6440 = vmatprep.mubr.msk.bf16.mxu0 %vm1273_vm3, %v5801_v0  ;;  %v1800_v0 = vrot.slane %v7839_v56, 5  ;;  %v8083_v12 = vld [vmem:[%s7329_s20 + $0x1e4] sm:$0xf] }
  0xe6   : > { %6286 = vmatprep.mubr.msk.bf16.mxu1 %vm1273_vm3, %v5516_v31  ;;  %v8047_v31 = vld [vmem:[%s7329_s20 + $0x1cc] sm:$0xf]  ;;  %9401 = vst [vmem:[#allocation16_spill] sm:$0xff] %v8083_v12 }
  0xe7   : > { %v5807_v56 = vcombine.low %v8041_v53, %v8047_v31  ;;  %v1801_v10 = vsel %vm7621_vm7, %v5540_v36, %v1800_v0  ;;  %v8121_v36 = vsel %vm7621_vm7, %v5541_v37, %v1807_v46  ;;  %v8147_v37 = vld [vmem:[%s7329_s20 + $0x204] sm:$0xf]  ;;  %v5543_v46 = vrot.slane %v7913_v30, 9 }
  0xec   : > { %6441 = vmatmul.mubr.msk.bf16.vlgmr.msra.gmra.mrb[0].mxu0 %vm1273_vm3, %v5802_v23  ;;  %v8065_v23 = vld [vmem:[%s7329_s20 + $0x1d4] sm:$0xf] }
  0xed   : > { %6287 = vmatmul.mubr.msk.bf16.gmra.mrb[16].mxu1 %vm1273_vm3, %v5517_v28  ;;  %6473 = vmatpush3.bf16.msra.mxu0 %v4537_v49  ;;  %9398 = vst [vmem:[#allocation13_spill] sm:$0xff] %v8065_v23  ;;  %v8077_v28 = vld [vmem:[%s7329_s20 + $0x1e0] sm:$0xf]  ;;  %v1802_v49 = vrot.slane %v1800_v0, 4  ;;  %v8139_v0 = vld [vmem:[%s7329_s20 + $0x1fc] sm:$0xf] }
  0xee   : > { %6290 = vmatprep.mubr.msk.bf16.mxu1 %vm1273_vm3, %v5518_v33  ;;  %6444 = vmatprep.mubr.msk.bf16.mxu0 %vm1273_vm3, %v5803_v55  ;;  %v5521_v55 = vcombine.low %v7740_v8, %v7743_v29  ;;  %v8074_v33 = vld [vmem:[%s7329_s20 + $0x1d8] sm:$0xf]  ;;  %9400 = vst [vmem:[#allocation15_spill] sm:$0xff] %v8077_v28  ;;  %9405 = vst [vmem:[#allocation20_spill] sm:$0xff] %v8139_v0 }
  0xef   : > { %6807 = vmatprep.subr.msk.bf16.mxu0 %vm1322_vm0, %v7990_v2  ;;  %9399 = vst [vmem:[#allocation14_spill] sm:$0xff] %v8074_v33  ;;  %v5808_v14 = vcombine.low %v8065_v23, %v8074_v33 }
  0xf4   : > { %6445 = vmatmul.mubr.msk.bf16.gmra.mrb[4].mxu0 %vm1273_vm3, %v5804_v24  ;;  %v1804_v24 = vsel %vm7621_vm7, %v1802_v49, %v1803_v25  ;;  %v8175_v25 = vld [vmem:[%s7329_s20 + $0x210] sm:$0xf] }
  0xf5   : > { %6291 = vmatmul.mubr.msk.bf16.gmra.mrb[20].mxu1 %vm1273_vm3, %v5519_v61  ;;  %6448 = vmatprep.mubr.msk.bf16.mxu0 %vm1273_vm3, %v5805_v27  ;;  %v5806_v61 = vcombine.low %v8031_v1, %v8034_v35  ;;  %v5522_v27 = vcombine.low %v7765_v3, %v7771_v42  ;;  %v5557_v49 = vcombine.low %v1801_v10, %v1804_v24  ;;  %v1824_v24 = vrot.slane %v6912_v47, 5  ;;  %v8178_v10 = vld [vmem:[%s7329_s20 + $0x214] sm:$0xf]  ;;  %v8217_v47 = vld [vmem:[%s7329_s20 + $0x220] sm:$0xf] }
  0xf6   : > { %6294 = vmatprep.mubr.msk.bf16.mxu1 %vm1273_vm3, %v5520_v48  ;;  %v1814_v48 = vrot.slane %v7879_v5, 5  ;;  %v8152_v5 = vld [vmem:[%s7329_s20 + $0x208] sm:$0xf]  ;;  %v1863_v3 = vrot.slane %v7633_v50, 5  ;;  %v9413_v50 = vcombine.low %v8092_v34, %v8099_v26  ;;  %v6927_v34 = vld [vmem:[%s7329_s20 + $0x6c] sm:$0xf] }
  0xf7   : > { %v5549_v26 = vrot.slane %v6927_v34, 9  ;;  %v8315_v1 = vld [vmem:[%s7329_s20 + $0x194] sm:$0x1] }
  0xf8   : > { %v1816_v32 = vrot.slane %v1814_v48, 4 }
  0xfa   : > { %v8170_v30 = vsel %vm7621_vm7, %v1816_v32, %v1817_v22  ;;  %v8186_v32 = vsel %vm7621_vm7, %v5543_v46, %v1821_v15  ;;  %v8190_v22 = vsel %vm7621_vm7, %v1823_v62, %v1824_v24  ;;  %v8205_v62 = vld [vmem:[%s7329_s20 + $0x21c] sm:$0xf]  ;;  %v6916_v24 = vld [vmem:[%s7329_s20 + $0x4c] sm:$0xf]  ;;  %v6918_v15 = vld [vmem:[%s7329_s20 + $0x44] sm:$0x1] }
  0xfb   : > { %v1838_v46 = vrot.slane %v6918_v15, 5 }
  0xfc   : > { %6449 = vmatmul.mubr.msk.bf16.gmra.mrb[8].mxu0 %vm1273_vm3, %v5806_v61  ;;  %v6913_v61 = vld [vmem:[%s7329_s20 + $0x40] sm:$0xf] }
  0xfd   : > { %6295 = vmatmul.mubr.msk.bf16.gmra.mrb[24].mxu1 %vm1273_vm3, %v5521_v55  ;;  %6452 = vmatprep.mubr.msk.bf16.mxu0 %vm1273_vm3, %v5807_v56  ;;  %v6911_v56 = vld [vmem:[%s7329_s20 + $0x34] sm:$0xf]  ;;  %v1835_v18 = vrot.slane %v6913_v61, 5  ;;  %v6914_v55 = vld [vmem:[%s7329_s20 + $0x30] sm:$0xf]  ;;  %v1842_v61 = vrot.slane %v6916_v24, 5 }
  0xfe   : > { %6298 = vmatprep.mubr.msk.bf16.mxu1 %vm1273_vm3, %v5522_v27  ;;  %v1828_v27 = vrot.slane %v6911_v56, 5  ;;  %v8166_v56 = vsel %vm7621_vm7, %v5542_v57, %v1814_v48  ;;  %v5544_v48 = vrot.slane %v6914_v55, 9  ;;  %v9406_v55 = vcombine.low %v7794_v17, %v7797_v19 }
  0xff   : > { %v5559_v38 = vcombine.low %v8166_v56, %v8170_v30  ;;  %v9407_v17 = vcombine.low %v8077_v28, %v8083_v12  ;;  %v6917_v56 = vld [vmem:[%s7329_s20 + $0x3c] sm:$0xf]  ;;  %v9408_v19 = vshrl.u32 %v7950_v41, 16  ;;  %v9409_v28 = vshll.u32 %v7950_v41, 16  ;;  %v6921_v12 = vld [vmem:[%s7329_s20 + $0x58] sm:$0xf] }
 0x100   : > { %v1830_v57 = vrot.slane %v1828_v27, 4  ;;  %v5545_v30 = vrot.slane %v6917_v56, 9  ;;  %v8223_v24 = vsel %vm7621_vm7, %v5544_v48, %v1828_v27  ;;  %v6919_v56 = vld [vmem:[%s7329_s20 + $0x48] sm:$0xf]  ;;  %v1849_v33 = vrot.slane %v6921_v12, 5 }
 0x101   : > { %v4057_v15 = vrot.slane %v9408_v19, 4  ;;  %v4060_v23 = vrot.slane %v9409_v28, 5  ;;  %v8243_v19 = vld [vmem:[%s7329_s20 + $0x188] sm:$0x1]  ;;  %v6922_v28 = vld [vmem:[%s7329_s20 + $0x64] sm:$0xf] }
 0x102   : > { %9411 = vst [vmem:[#allocation21_spill] sm:$0xff] %v8243_v19  ;;  %v8249_v6 = vsel %vm7621_vm7, %v5545_v30, %v1835_v18  ;;  %v6923_v12 = vld [vmem:[%s7329_s20 + $0x54] sm:$0xf]  ;;  %v4088_v41 = vshll.u32 %v7969_v54, 16  ;;  %v6924_v30 = vld [vmem:[%s7329_s20 + $0x5c] sm:$0x1] }
 0x103   : > { %v5547_v48 = vrot.slane %v6923_v12, 9  ;;  %v4074_v53 = vshll.u32 %v8243_v19, 16 }
 0x104   : > { %6453 = vmatmul.mubr.msk.bf16.gmra.mrb[12].mxu0 %vm1273_vm3, %v5808_v14  ;;  %v5546_v14 = vrot.slane %v6919_v56, 9 }
 0x105   : > { %6299 = vmatmul.mubr.msk.bf16.gmra.mrb[28].mxu1 %vm1273_vm3, %v9406_v55  ;;  %6456 = vmatprep.mubr.msk.bf16.mxu0 %vm1273_vm3, %v9407_v17  ;;  %v1837_v55 = vrot.slane %v1835_v18, 4  ;;  %v8227_v17 = vsel %vm7621_vm7, %v1830_v57, %v1831_v11  ;;  %v1844_v11 = vrot.slane %v1842_v61, 4  ;;  %v6920_v57 = vld [vmem:[%s7329_s20 + $0x50] sm:$0x1]  ;;  %v8264_v18 = vld [vmem:[%s7329_s20 + $0x228] sm:$0xf] }
 0x106   : > { %6304 = vmatprep.mubr.msk.bf16.mxu1 %vm1273_vm3, %v5557_v49  ;;  %v9410_v49 = vshrl.u32 %v7953_v51, 16  ;;  %v1845_v56 = vrot.slane %v6920_v57, 5  ;;  %v8258_v57 = vsel %vm7621_vm7, %v5546_v14, %v1842_v61  ;;  %v9412_v61 = vcombine.low %v8121_v36, %v8127_v44 }
 0x107   : > { %v8253_v51 = vsel %vm7621_vm7, %v1837_v55, %v1838_v46  ;;  %v1852_v46 = vrot.slane %v6924_v30, 5  ;;  %v4061_v55 = vor.u32 %v4060_v23, %v4057_v15  ;;  %v8282_v23 = vld [vmem:[%s7329_s20 + $0x22c] sm:$0xf]  ;;  %v1851_v15 = vrot.slane %v1849_v33, 4  ;;  %v8291_v30 = vld [vmem:[%s7329_s20 + $0x234] sm:$0xf] }
 0x108   : > { %v4070_v27 = vrot.slane %v9410_v49, 4  ;;  %v1856_v49 = vrot.slane %v6922_v28, 5  ;;  %v8279_v14 = vsel %vm7621_vm7, %v1844_v11, %v1845_v56  ;;  %v9415_v36 = vshll.u32 %v7966_v13, 16  ;;  %v6926_v56 = vld [vmem:[%s7329_s20 + $0x68] sm:$0x1] }
 0x109   : > { %v1859_v19 = vrot.slane %v6926_v56, 5  ;;  %v6928_v56 = vld [vmem:[%s9355_s1 + $0x8] sm:$0x3]  ;;  %v5815_v34 = vcombine.low %v8264_v18, %v8282_v23 }
 0x10a   : > { %v4071_v28 = vor.u32 %v4070_v27, %v8234_v9  ;;  %v9414_v27 = vshrl.u32 %v7966_v13, 16  ;;  %v4084_v44 = vrot.slane %v9415_v36, 5  ;;  %v1858_v11 = vrot.slane %v1856_v49, 4  ;;  %v8301_v13 = vld [vmem:[%s7329_s20 + $0x238] sm:$0xf] }
 0x10b   : > { %v8304_v36 = vrot.slane %v4088_v41, 5  ;;  %v8325_v41 = vsel %vm7621_vm7, %v1851_v15, %v1852_v46  ;;  %v6929_v15 = vld [vmem:[%s7329_s20 + $0x7c] sm:$0xf] }
 0x10c   : > { %6457 = vmatmul.mubr.msk.bf16.gmra.mrb[16].mxu0 %vm1273_vm3, %v9413_v50  ;;  %v4081_v12 = vrot.slane %v9414_v27, 4  ;;  %v9416_v27 = vcombine.low %v8136_v7, %v8139_v0  ;;  %v4072_v7 = vrot.slane %v4071_v28, 4  ;;  %v4076_v0 = vrot.slane %v4074_v53, 5  ;;  %v6933_v53 = vld [vmem:[%s7329_s20 + $0x8c] sm:$0x1] }
 0x10d   : > { %6305 = vmatmul.mubr.msk.bf16.vlgmr.msra.gmra.mrb[0].mxu1 %vm1273_vm3, %v9412_v61  ;;  %v6925_v61 = vld [vmem:[%s7329_s20 + $0x60] sm:$0xf] }
 0x10e   : > { %6337 = vmatpush3.bf16.msra.mxu1 %v8131_v59  ;;  %6308 = vmatprep.mubr.msk.bf16.mxu1 %vm1273_vm3, %v5559_v38  ;;  %v5548_v50 = vrot.slane %v6925_v61, 9  ;;  %v1865_v59 = vrot.slane %v1863_v3, 4  ;;  %v1866_v38 = vrot.slane %v7637_v21, 5  ;;  %v9417_v61 = vshrl.u32 %v7969_v54, 16 }
 0x10f   : > { %6460 = vmatprep.mubr.msk.bf16.mxu0 %vm1273_vm3, %v9416_v27  ;;  %6803 = vmatprep.subr.msk.bf16.mxu1 %vm1322_vm0, %v6928_v56  ;;  %v4062_v27 = vrot.slane %v4061_v55, 4  ;;  %v5562_v21 = vcombine.low %v8249_v6, %v8253_v51  ;;  %v8321_v54 = vsel %vm7621_vm7, %v5547_v48, %v1849_v33  ;;  %v5563_v55 = vcombine.low %v8258_v57, %v8279_v14  ;;  %v6930_v56 = vld [vmem:[%s7329_s20 + $0x78] sm:$0xf] }
 0x110   : > { %v4094_v42 = vrot.slane %v9417_v61, 4  ;;  %v4085_v61 = vor.u32 %v4084_v44, %v4081_v12  ;;  %v8333_v28 = vsel %vm7621_vm7, %v5548_v50, %v1856_v49  ;;  %v8337_v33 = vsel %vm7621_vm7, %v1858_v11, %v1859_v19 }
 0x111   : > { %v8341_v48 = vsel %vm7621_vm7, %v5549_v26, %v1863_v3  ;;  %v8345_v6 = vsel %vm7621_vm7, %v1865_v59, %v1866_v38  ;;  %v4098_v57 = vshll.u32 %v8315_v1, 16  ;;  %v5564_v49 = vcombine.low %v8321_v54, %v8325_v41 }
 0x112   : > { %v4095_v51 = vor.u32 %v4094_v42, %v8304_v36  ;;  %v4067_v19 = vsel %vm7352_vm4, %v4062_v27, %v8234_v9  ;;  %v4077_v46 = vsel %vm7352_vm4, %v4072_v7, %v4076_v0  ;;  %v4112_v3 = vshll.u32 %v7975_v16, 16 }
 0x113   : > { %v9418_v26 = vcombine.low %v8186_v32, %v8190_v22  ;;  %v9419_v42 = vcombine.low %v8147_v37, %v8152_v5  ;;  %v4086_v14 = vrot.slane %v4085_v61, 4  ;;  %v1870_v9 = vrot.slane %v6929_v15, 5  ;;  %v6931_v61 = vld [vmem:[%s7329_s20 + $0x80] sm:$0x1] }
 0x114   : > { %v9420_v12 = vshrl.u32 %v7972_v43, 16  ;;  %v9421_v0 = vshll.u32 %v7972_v43, 16  ;;  %v9422_v32 = vcombine.low %v8223_v24, %v8227_v17  ;;  %v9423_v22 = vcombine.low %v8175_v25, %v8178_v10 }
 0x115   : > { %6309 = vmatmul.mubr.msk.bf16.gmra.mrb[4].mxu1 %vm1273_vm3, %v9418_v26  ;;  %6461 = vmatmul.mubr.msk.bf16.gmra.mrb[20].mxu0 %vm1273_vm3, %v9419_v42  ;;  %v8384_v43 = vsel %vm1322_vm0, %v7990_v2, 0  ;;  %v4136_v59 = vshll.u32 %v7999_v63, 16  ;;  %v8387_v24 = vcombine.low %v4067_v19, %v4077_v46  ;;  %v4096_v17 = vrot.slane %v4095_v51, 4  ;;  %v8392_v42 = vld [vmem:[%s7329_s20 + $0x1a0] sm:$0x1] }
 0x116   : > { %v4105_v7 = vrot.slane %v9420_v12, 4  ;;  %v4108_v44 = vrot.slane %v9421_v0, 5  ;;  %6312 = vmatprep.mubr.msk.bf16.mxu1 %vm1273_vm3, %v9422_v32  ;;  %6464 = vmatprep.mubr.msk.bf16.mxu0 %vm1273_vm3, %v9423_v22  ;;  %v4100_v38 = vrot.slane %v4098_v57, 5  ;;  %v5550_v27 = vrot.slane %v6930_v56, 9  ;;  %v8404_v32 = vld [vmem:[%s7329_s20 + $0x1ac] sm:$0x1] }
 0x117   : > { %v1873_v26 = vrot.slane %v6931_v61, 5  ;;  %v8394_v15 = vrot.slane %v4112_v3, 5  ;;  %v9424_v12 = vshrl.u32 %v7975_v16, 16  ;;  %v1877_v2 = vrot.slane %v7686_v40, 5 }
 0x118   : > { %v4091_v19 = vsel %vm7352_vm4, %v4086_v14, %v8304_v36  ;;  %v1872_v51 = vrot.slane %v1870_v9, 4  ;;  %v4109_v57 = vor.u32 %v4108_v44, %v4105_v7  ;;  %v4160_v46 = vshll.u32 %v8006_v45, 16 }
 0x119   : > { %v4118_v0 = vrot.slane %v9424_v12, 4  ;;  %v9425_v3 = vshrl.u32 %v7996_v58, 16  ;;  %v9426_v16 = vshll.u32 %v7996_v58, 16  ;;  %v8410_v61 = vrot.slane %v4136_v59, 5  ;;  %v6932_v58 = vld [vmem:[%s7329_s20 + $0x84] sm:$0xf] }
 0x11a   : > { %v9427_v40 = vshrl.u32 %v7999_v63, 16  ;;  %v4101_v36 = vsel %vm7352_vm4, %v4096_v17, %v4100_v38  ;;  %v4122_v14 = vshll.u32 %v8392_v42, 16  ;;  %v9428_v7 = vshrl.u32 %v8003_v52, 16 }
 0x11b   : > { %v4129_v22 = vrot.slane %v9425_v3, 4  ;;  %v4132_v56 = vrot.slane %v9426_v16, 5  ;;  %v9429_v11 = vshll.u32 %v8003_v52, 16  ;;  %v4119_v3 = vor.u32 %v4118_v0, %v8394_v15 }
 0x11c   : > { %v4142_v12 = vrot.slane %v9427_v40, 4  ;;  %v4153_v44 = vrot.slane %v9428_v7, 4  ;;  %v5551_v16 = vrot.slane %v6932_v58, 9  ;;  %v1879_v59 = vrot.slane %v1877_v2, 4 }
 0x11d   : > { %v4156_v50 = vrot.slane %v9429_v11, 5  ;;  %v1880_v63 = vrot.slane %v6933_v53, 5  ;;  %6313 = vmatmul.mubr.msk.bf16.gmra.mrb[8].mxu1 %vm1273_vm3, %v5562_v21  ;;  %v9430_v17 = vcombine.low %v8205_v62, %v8217_v47  ;;  %v8431_v38 = vsel %vm7621_vm7, %v5550_v27, %v1870_v9 }
 0x11e   : > { %v4146_v52 = vshll.u32 %v8404_v32, 16  ;;  %v8434_v11 = vrot.slane %v4160_v46, 5  ;;  %v9431_v0 = vshrl.u32 %v8006_v45, 16  ;;  %6316 = vmatprep.mubr.msk.bf16.mxu1 %vm1273_vm3, %v5563_v55  ;;  %v8445_v21 = vsel %vm7621_vm7, %v1872_v51, %v1873_v26  ;;  %v8450_v46 = vld [vmem:[%s7329_s20 + $0x1b8] sm:$0x1] }
 0x11f   : > { %6465 = vmatmul.mubr.msk.bf16.gmra.mrb[24].mxu0 %vm1273_vm3, %v9430_v17  ;;  %v4133_v53 = vor.u32 %v4132_v56, %v4129_v22  ;;  %v4143_v9 = vor.u32 %v4142_v12, %v8410_v61  ;;  %v1884_v27 = vrot.slane %v7720_v4, 5  ;;  %v8452_v45 = vcombine.low %v4091_v19, %v4101_v36  ;;  %v6934_v22 = vld [vmem:[%s7329_s20 + $0x90] sm:$0xf] }
 0x120   : > { %v4166_v40 = vrot.slane %v9431_v0, 4  ;;  %6468 = vmatprep.mubr.msk.bf16.mxu0 %vm1273_vm3, %v5815_v34  ;;  %v4110_v55 = vrot.slane %v4109_v57, 4  ;;  %v4124_v7 = vrot.slane %v4122_v14, 5  ;;  %v4157_v58 = vor.u32 %v4156_v50, %v4153_v44  ;;  %v6935_v14 = vld [vmem:[%s7329_s20 + $0x98] sm:$0x1] }
 0x121   : > { %v4120_v17 = vrot.slane %v4119_v3, 4  ;;  %v8456_v34 = vsel %vm7621_vm7, %v5551_v16, %v1877_v2  ;;  %v8460_v26 = vsel %vm7621_vm7, %v1879_v59, %v1880_v63  ;;  %v1891_v51 = vrot.slane %v7743_v29, 5 }
 0x122   : > { %v4148_v4 = vrot.slane %v4146_v52, 5  ;;  %v5552_v56 = vrot.slane %v6934_v22, 9  ;;  %v4167_v19 = vor.u32 %v4166_v40, %v8434_v11  ;;  %v4170_v57 = vshll.u32 %v8450_v46, 16  ;;  %v9438_v22 = vld [vmem:[#allocation8_spill] sm:$0xff] }
 0x123   : > { %v4134_v12 = vrot.slane %v4133_v53, 4  ;;  %v4144_v50 = vrot.slane %v4143_v9, 4  ;;  %v1886_v36 = vrot.slane %v1884_v27, 4  ;;  %v1887_v2 = vrot.slane %v6935_v14, 5 }
 0x124   : > { %v5567_v44 = vcombine.low %v8431_v38, %v8445_v21  ;;  %v4115_v29 = vsel %vm7352_vm4, %v4110_v55, %v8394_v15  ;;  %v4158_v3 = vrot.slane %v4157_v58, 4  ;;  %v5553_v16 = vrot.slane %v7740_v8, 9  ;;  %v8491_v21 = vld [vmem:[%s7329_s20 + $0x1c4] sm:$0x1] }
 0x125   : > { %v4125_v59 = vsel %vm7352_vm4, %v4120_v17, %v4124_v7  ;;  %v5568_v63 = vcombine.low %v8456_v34, %v8460_v26  ;;  %v1893_v52 = vrot.slane %v1891_v51, 4  ;;  %v1894_v0 = vrot.slane %v7751_v60, 5  ;;  %6317 = vmatmul.mubr.msk.bf16.gmra.mrb[12].mxu1 %vm1273_vm3, %v5564_v49 }
 0x126   : > { %v9432_v15 = vcombine.low %v8291_v30, %v8301_v13  ;;  %v8488_v8 = vsel %vm7621_vm7, %v5552_v56, %v1884_v27  ;;  %v4168_v38 = vrot.slane %v4167_v19, 4  ;;  %v4172_v40 = vrot.slane %v4170_v57, 5  ;;  %v9439_v57 = vld [vmem:[#allocation12_spill] sm:$0xff] }
 0x127   : > { %v4184_v60 = vshll.u32 %v8034_v35, 16  ;;  %v9433_v54 = vcombine.low %v8333_v28, %v8337_v33  ;;  %v4139_v41 = vsel %vm7352_vm4, %v4134_v12, %v8410_v61  ;;  %v4149_v49 = vsel %vm7352_vm4, %v4144_v50, %v4148_v4 }
 0x128   : > { %6469 = vmatmul.mubr.msk.bf16.gmra.mrb[28].mxu0 %vm1273_vm3, %v9432_v15  ;;  %v8507_v53 = vsel %vm7621_vm7, %v1886_v36, %v1887_v2  ;;  %v4208_v9 = vshll.u32 %v8047_v31, 16  ;;  %v4163_v28 = vsel %vm7352_vm4, %v4158_v3, %v8434_v11  ;;  %v8515_v33 = vsel %vm7621_vm7, %v5553_v16, %v1891_v51 }
 0x129   : > { %6320 = vmatprep.mubr.msk.bf16.mxu1 %vm1273_vm3, %v9433_v54  ;;  %6474 = vmatprep.mubr.msk.bf16.mxu0 %vm1273_vm3, %v8387_v24  ;;  %v9434_v24 = vld [vmem:[#allocation11_spill] sm:$0xff]  ;;  %v8523_v58 = vsel %vm7621_vm7, %v1893_v52, %v1894_v0  ;;  %v9437_v17 = vshrl.u32 %v8034_v35, 16  ;;  %v4194_v11 = vshll.u32 %v8491_v21, 16  ;;  %v1898_v56 = vrot.slane %v9438_v22, 5  ;;  %v9444_v54 = vld [vmem:[#allocation14_spill] sm:$0xff] }
 0x12a   : > { %v9435_v27 = vshrl.u32 %v9434_v24, 16  ;;  %v9436_v55 = vshll.u32 %v9434_v24, 16  ;;  %v4173_v51 = vsel %vm7352_vm4, %v4168_v38, %v4172_v40  ;;  %v8531_v19 = vrot.slane %v4184_v60, 5  ;;  %v9443_v38 = vld [vmem:[#allocation7_spill] sm:$0xff]  ;;  %v8545_v60 = vld [vmem:[%s7329_s20 + $0x1d0] sm:$0x1] }
 0x12b   : > { %v4190_v4 = vrot.slane %v9437_v17, 4  ;;  %v9440_v12 = vshrl.u32 %v9439_v57, 16  ;;  %v9441_v36 = vshll.u32 %v9439_v57, 16  ;;  %v5836_v2 = vcombine.low %v4115_v29, %v4125_v59 }
 0x12c   : > { %v4177_v61 = vrot.slane %v9435_v27, 4  ;;  %v4180_v7 = vrot.slane %v9436_v55, 5  ;;  %v5569_v35 = vcombine.low %v8488_v8, %v8507_v53  ;;  %v8539_v3 = vrot.slane %v4208_v9, 5  ;;  %v9445_v8 = vld [vmem:[#allocation16_spill] sm:$0xff]  ;;  %v9447_v9 = vld [vmem:[#allocation9_spill] sm:$0xff] }
 0x12d   : > { %v4201_v50 = vrot.slane %v9440_v12, 4  ;;  %v4204_v14 = vrot.slane %v9441_v36, 5  ;;  %v9442_v16 = vshrl.u32 %v8047_v31, 16  ;;  %v5837_v0 = vcombine.low %v4139_v41, %v4149_v49  ;;  %v8582_v12 = vld [vmem:[%s7329_s20 + $0x1e8] sm:$0x1] }
 0x12e   : > { %v4181_v15 = vor.u32 %v4180_v7, %v4177_v61  ;;  %v5554_v40 = vrot.slane %v9443_v38, 9  ;;  %v4232_v24 = vshll.u32 %v9444_v54, 16  ;;  %v5838_v27 = vcombine.low %v4163_v28, %v4173_v51 }
 0x12f   : > { %v4214_v52 = vrot.slane %v9442_v16, 4  ;;  %v5570_v29 = vcombine.low %v8515_v33, %v8523_v58  ;;  %v8550_v59 = vrot.slane %v4194_v11, 5  ;;  %v4256_v53 = vshll.u32 %v9445_v8, 16 }
 0x130   : > { %v9446_v31 = vcombine.low %v8341_v48, %v8345_v6  ;;  %6475 = vmatmul.mubr.msk.bf16.vlgmr.msra.gmra.mrb[0].mxu0 %vm1273_vm3, %v8452_v45  ;;  %v4191_v41 = vor.u32 %v4190_v4, %v8531_v19  ;;  %v1900_v49 = vrot.slane %v1898_v56, 4  ;;  %v1901_v28 = vrot.slane %v9447_v9, 5  ;;  %v9448_v6 = vld [vmem:[#allocation13_spill] sm:$0xff] }
 0x131   : > { %v4205_v61 = vor.u32 %v4204_v14, %v4201_v50  ;;  %6507 = vmatpush3.bf16.msra.mxu0 %v8384_v43  ;;  %v4215_v55 = vor.u32 %v4214_v52, %v8539_v3  ;;  %v4218_v48 = vshll.u32 %v8545_v60, 16  ;;  %v9449_v7 = vshrl.u32 %v9448_v6, 16  ;;  %6478 = vmatprep.mubr.msk.bf16.mxu0 %vm1273_vm3, %v5836_v2  ;;  %v8575_v43 = vld [vmem:[%s7329_s20 + $0x1dc] sm:$0x1]  ;;  %v9452_v50 = vld [vmem:[#allocation15_spill] sm:$0xff] }
 0x132   : > { %6321 = vmatmul.mubr.msk.bf16.gmra.mrb[16].mxu1 %vm1273_vm3, %v9446_v31  ;;  %v9450_v45 = vshll.u32 %v9448_v6, 16  ;;  %v4182_v4 = vrot.slane %v4181_v15, 4  ;;  %v8572_v22 = vsel %vm7621_vm7, %v5554_v40, %v1898_v56  ;;  %v9451_v51 = vshrl.u32 %v9444_v54, 16 }
 0x133   : > { %6324 = vmatprep.mubr.msk.bf16.mxu1 %vm1273_vm3, %v5567_v44  ;;  %v4225_v17 = vrot.slane %v9449_v7, 4  ;;  %v8577_v44 = vrot.slane %v4232_v24, 5  ;;  %v9453_v36 = vshrl.u32 %v9452_v50, 16  ;;  %v9454_v2 = vshll.u32 %v9452_v50, 16  ;;  %v9456_v24 = vld [vmem:[#allocation10_spill] sm:$0xff] }
 0x134   : > { %v4228_v11 = vrot.slane %v9450_v45, 5  ;;  %v4238_v57 = vrot.slane %v9451_v51, 4  ;;  %v8588_v52 = vrot.slane %v4256_v53, 5  ;;  %v9455_v56 = vshrl.u32 %v9445_v8, 16  ;;  %v6936_v8 = vld [vmem:[%s7329_s20 + $0xb4] sm:$0xf] }
 0x135   : > { %v4249_v14 = vrot.slane %v9453_v36, 4  ;;  %v4252_v16 = vrot.slane %v9454_v2, 5  ;;  %v4192_v38 = vrot.slane %v4191_v41, 4  ;;  %v8594_v40 = vsel %vm7621_vm7, %v1900_v49, %v1901_v28 }
 0x136   : > { %v4262_v15 = vrot.slane %v9455_v56, 4  ;;  %v4206_v54 = vrot.slane %v4205_v61, 4  ;;  %v1905_v31 = vrot.slane %v9456_v24, 5  ;;  %v4216_v9 = vrot.slane %v4215_v55, 4 }
 0x137   : > { %v4220_v6 = vrot.slane %v4218_v48, 5  ;;  %v4229_v7 = vor.u32 %v4228_v11, %v4225_v17  ;;  %v4242_v45 = vshll.u32 %v8575_v43, 16  ;;  %v4187_v53 = vsel %vm7352_vm4, %v4182_v4, %v8531_v19  ;;  %v9457_v48 = vld [vmem:[#allocation18_spill] sm:$0xff] }
 0x138   : > { %v5555_v51 = vrot.slane %v6936_v8, 9  ;;  %v4239_v41 = vor.u32 %v4238_v57, %v8577_v44  ;;  %v4266_v49 = vshll.u32 %v8582_v12, 16  ;;  %v5571_v28 = vcombine.low %v8572_v22, %v8594_v40  ;;  %6479 = vmatmul.mubr.msk.bf16.gmra.mrb[4].mxu0 %vm1273_vm3, %v5837_v0  ;;  %v6937_v22 = vld [vmem:[%s7329_s20 + $0xbc] sm:$0x1]  ;;  %v9458_v0 = vld [vmem:[#allocation20_spill] sm:$0xff]  ;;  %v9463_v8 = vld [vmem:[#allocation19_spill] sm:$0xff] }
 0x139   : > { %v4253_v61 = vor.u32 %v4252_v16, %v4249_v14  ;;  %v4263_v55 = vor.u32 %v4262_v15, %v8588_v52  ;;  %v4280_v17 = vshll.u32 %v9457_v48, 16  ;;  %v4197_v19 = vsel %vm7352_vm4, %v4192_v38, %v8550_v59  ;;  %6482 = vmatprep.mubr.msk.bf16.mxu0 %vm1273_vm3, %v5838_v27  ;;  %v9459_v14 = vld [vmem:[#allocation17_spill] sm:$0xff]  ;;  %v8630_v38 = vld [vmem:[%s7329_s20 + $0x1f4] sm:$0x1] }
 0x13a   : > { %6325 = vmatmul.mubr.msk.bf16.gmra.mrb[20].mxu1 %vm1273_vm3, %v5568_v63  ;;  %v4211_v11 = vsel %vm7352_vm4, %v4206_v54, %v8539_v3  ;;  %v1907_v4 = vrot.slane %v1905_v31, 4  ;;  %v1908_v57 = vrot.slane %v6937_v22, 5  ;;  %v4221_v34 = vsel %vm7352_vm4, %v4216_v9, %v4220_v6 }
 0x13b   : > { %6328 = vmatprep.mubr.msk.bf16.mxu1 %vm1273_vm3, %v5569_v35  ;;  %v4230_v26 = vrot.slane %v4229_v7, 4  ;;  %v4244_v63 = vrot.slane %v4242_v45, 5  ;;  %v4304_v59 = vshll.u32 %v9458_v0, 16  ;;  %v4240_v50 = vrot.slane %v4239_v41, 4  ;;  %v8641_v45 = vld [vmem:[%s7329_s20 + $0x200] sm:$0x1] }
 0x13c   : > { %v4268_v36 = vrot.slane %v4266_v49, 5  ;;  %v9460_v3 = vshrl.u32 %v9459_v14, 16  ;;  %v9461_v16 = vshll.u32 %v9459_v14, 16  ;;  %v4254_v15 = vrot.slane %v4253_v61, 4 }
 0x13d   : > { %v4264_v35 = vrot.slane %v4263_v55, 4  ;;  %v8632_v27 = vrot.slane %v4280_v17, 5  ;;  %v9462_v40 = vshrl.u32 %v9457_v48, 16  ;;  %v5839_v24 = vcombine.low %v4187_v53, %v4197_v19 }
 0x13e   : > { %v4273_v2 = vrot.slane %v9460_v3, 4  ;;  %v4276_v56 = vrot.slane %v9461_v16, 5  ;;  %v5840_v9 = vcombine.low %v4211_v11, %v4221_v34  ;;  %v1906_v6 = vsel %vm7621_vm7, %v5555_v51, %v1905_v31 }
 0x13f   : > { %v4286_v54 = vrot.slane %v9462_v40, 4  ;;  %v1909_v7 = vsel %vm7621_vm7, %v1907_v4, %v1908_v57  ;;  %v9464_v41 = vshrl.u32 %v9463_v8, 16  ;;  %v9465_v61 = vshll.u32 %v9463_v8, 16 }
 0x140   : > { %v8647_v48 = vrot.slane %v4304_v59, 5  ;;  %v9466_v53 = vshrl.u32 %v9458_v0, 16  ;;  %v4235_v31 = vsel %vm7352_vm4, %v4230_v26, %v8577_v44  ;;  %v4245_v51 = vsel %vm7352_vm4, %v4240_v50, %v4244_v63  ;;  %6483 = vmatmul.mubr.msk.bf16.gmra.mrb[8].mxu0 %vm1273_vm3, %v5839_v24  ;;  %v6938_v26 = vld [vmem:[%s7329_s20 + $0xc0] sm:$0xf] }
 0x141   : > { %v4297_v49 = vrot.slane %v9464_v41, 4  ;;  %v4300_v55 = vrot.slane %v9465_v61, 5  ;;  %v4277_v19 = vor.u32 %v4276_v56, %v4273_v2  ;;  %v4290_v11 = vshll.u32 %v8630_v38, 16  ;;  %6486 = vmatprep.mubr.msk.bf16.mxu0 %vm1273_vm3, %v5840_v9  ;;  %v8692_v61 = vld [vmem:[%s7329_s20 + $0x218] sm:$0x1] }
 0x142   : > { %v4310_v17 = vrot.slane %v9466_v53, 4  ;;  %v4259_v4 = vsel %vm7352_vm4, %v4254_v15, %v8588_v52  ;;  %v4269_v22 = vsel %vm7352_vm4, %v4264_v35, %v4268_v36  ;;  %v4287_v57 = vor.u32 %v4286_v54, %v8632_v27  ;;  %6329 = vmatmul.mubr.msk.bf16.gmra.mrb[24].mxu1 %vm1273_vm3, %v5570_v29  ;;  %v6939_v52 = vld [vmem:[%s7329_s20 + $0xc4] sm:$0xf]  ;;  %v8683_v54 = vld [vmem:[%s7329_s20 + $0x20c] sm:$0x1] }
 0x143   : > { %v4314_v34 = vshll.u32 %v8641_v45, 16  ;;  %v4346_v0 = vshll.u32 %v8175_v25, 16  ;;  %v4356_v44 = vshrl.u32 %v8178_v10, 16  ;;  %v5638_v63 = vcombine.low %v6938_v26, %v6939_v52  ;;  %6332 = vmatprep.mubr.msk.bf16.mxu1 %vm1273_vm3, %v5571_v28  ;;  %v6940_v26 = vld [vmem:[%s7329_s20 + $0xcc] sm:$0xf] }
 0x144   : > { %v4328_v59 = vshll.u32 %v8152_v5, 16  ;;  %v5572_v50 = vcombine.low %v1906_v6, %v1909_v7  ;;  %v4301_v36 = vor.u32 %v4300_v55, %v4297_v49  ;;  %v4311_v14 = vor.u32 %v4310_v17, %v8647_v48  ;;  %v6941_v52 = vld [vmem:[%s7329_s20 + $0xd0] sm:$0xf] }
 0x145   : > { %v4352_v33 = vshll.u32 %v8178_v10, 16  ;;  %v5841_v58 = vcombine.low %v4235_v31, %v4245_v51  ;;  %v5842_v29 = vcombine.low %v4259_v4, %v4269_v22  ;;  %v4278_v3 = vrot.slane %v4277_v19, 4 }
 0x146   : > { %v4292_v2 = vrot.slane %v4290_v11, 5  ;;  %v4288_v16 = vrot.slane %v4287_v57, 4  ;;  %v4316_v56 = vrot.slane %v4314_v34, 5  ;;  %v9467_v15 = vshrl.u32 %v8147_v37, 16 }
 0x147   : > { %v9468_v28 = vshll.u32 %v8147_v37, 16  ;;  %v8685_v24 = vrot.slane %v4328_v59, 5  ;;  %v9469_v9 = vshrl.u32 %v8152_v5, 16  ;;  %v9470_v6 = vshrl.u32 %v8175_v25, 16 }
 0x148   : > { %v4321_v35 = vrot.slane %v9467_v15, 4  ;;  %v4348_v8 = vrot.slane %v4346_v0, 5  ;;  %v4302_v41 = vrot.slane %v4301_v36, 4  ;;  %v4312_v49 = vrot.slane %v4311_v14, 4  ;;  %6487 = vmatmul.mubr.msk.bf16.gmra.mrb[12].mxu0 %vm1273_vm3, %v5841_v58 }
 0x149   : > { %v4324_v40 = vrot.slane %v9468_v28, 5  ;;  %v4334_v10 = vrot.slane %v9469_v9, 4  ;;  %v4345_v7 = vrot.slane %v9470_v6, 4  ;;  %v8694_v55 = vrot.slane %v4352_v33, 5  ;;  %6490 = vmatprep.mubr.msk.bf16.mxu0 %vm1273_vm3, %v5842_v29 }
 0x14a   : > { %v4358_v53 = vrot.slane %v4356_v44, 4  ;;  %v4367_v37 = vshrl.u32 %v8205_v62, 16  ;;  %v4370_v17 = vshll.u32 %v8205_v62, 16  ;;  %v4380_v31 = vshrl.u32 %v8217_v47, 16  ;;  %6333 = vmatmul.mubr.msk.bf16.gmra.mrb[28].mxu1 %vm1273_vm3, %v5572_v50  ;;  %v6942_v50 = vld [vmem:[%s7329_s20 + $0xd8] sm:$0xf] }
 0x14b   : > { %v4391_v5 = vshrl.u32 %v8264_v18, 16  ;;  %v4394_v51 = vshll.u32 %v8264_v18, 16  ;;  %v4283_v25 = vsel %vm7352_vm4, %v4278_v3, %v8632_v27  ;;  %v4325_v19 = vor.u32 %v4324_v40, %v4321_v35  ;;  %6338 = vmatprep.mubr.msk.bf16.mxu1 %vm1273_vm3, %v5638_v63  ;;  %v6943_v63 = vld [vmem:[%s7329_s20 + $0xdc] sm:$0xf]  ;;  %v8729_v40 = vld [vmem:[%s7329_s20 + $0x224] sm:$0x1] }
 0x14c   : > { %v4338_v11 = vshll.u32 %v8683_v54, 16  ;;  %v4293_v62 = vsel %vm7352_vm4, %v4288_v16, %v4292_v2  ;;  %v4335_v18 = vor.u32 %v4334_v10, %v8685_v24  ;;  %v4349_v4 = vor.u32 %v4348_v8, %v4345_v7 }
 0x14d   : > { %v4362_v22 = vshll.u32 %v8692_v61, 16  ;;  %v4307_v27 = vsel %vm7352_vm4, %v4302_v41, %v8647_v48  ;;  %v4317_v57 = vsel %vm7352_vm4, %v4312_v49, %v4316_v56  ;;  %v4359_v34 = vor.u32 %v4358_v53, %v8694_v55  ;;  %v8736_v41 = vld [vmem:[%s7329_s20 + $0x230] sm:$0x1] }
 0x14e   : > { %v4376_v0 = vshll.u32 %v8217_v47, 16  ;;  %v4404_v44 = vshrl.u32 %v8282_v23, 16  ;;  %v5639_v59 = vcombine.low %v6940_v26, %v6941_v52  ;;  %v5640_v36 = vcombine.low %v6942_v50, %v6943_v63 }
 0x14f   : > { %v4400_v14 = vshll.u32 %v8282_v23, 16  ;;  %v5843_v33 = vcombine.low %v4283_v25, %v4293_v62  ;;  %v4326_v48 = vrot.slane %v4325_v19, 4  ;;  %v4340_v58 = vrot.slane %v4338_v11, 5  ;;  %v6944_v62 = vld [vmem:[%s7329_s20 + $0xe4] sm:$0xf] }
 0x150   : > { %v4369_v29 = vrot.slane %v4367_v37, 4  ;;  %v5844_v3 = vcombine.low %v4307_v27, %v4317_v57  ;;  %v4336_v2 = vrot.slane %v4335_v18, 4  ;;  %v4350_v16 = vrot.slane %v4349_v4, 4  ;;  %v6945_v18 = vld [vmem:[%s7329_s20 + $0xe8] sm:$0xf] }
 0x151   : > { %v4364_v47 = vrot.slane %v4362_v22, 5  ;;  %v4360_v56 = vrot.slane %v4359_v34, 4  ;;  %v4372_v15 = vrot.slane %v4370_v17, 5  ;;  %v8726_v35 = vrot.slane %v4376_v0, 5  ;;  %6491 = vmatmul.mubr.msk.bf16.gmra.mrb[16].mxu0 %vm1273_vm3, %v5843_v33  ;;  %v6946_v57 = vld [vmem:[%s7329_s20 + $0xf0] sm:$0xf] }
 0x152   : > { %v4382_v28 = vrot.slane %v4380_v31, 4  ;;  %v4393_v9 = vrot.slane %v4391_v5, 4  ;;  %v4396_v10 = vrot.slane %v4394_v51, 5  ;;  %v8731_v6 = vrot.slane %v4400_v14, 5  ;;  %6339 = vmatmul.mubr.msk.bf16.vlgmr.msra.gmra.mrb[0].mxu1 %vm1273_vm3, %v5639_v59  ;;  %6494 = vmatprep.mubr.msk.bf16.mxu0 %vm1273_vm3, %v5844_v3  ;;  %v6947_v34 = vld [vmem:[%s7329_s20 + $0xf4] sm:$0xf] }
 0x153   : > { %v4406_v23 = vrot.slane %v4404_v44, 4  ;;  %v4415_v7 = vshrl.u32 %v8291_v30, 16  ;;  %v4418_v8 = vshll.u32 %v8291_v30, 16  ;;  %v4428_v49 = vshrl.u32 %v8301_v13, 16  ;;  %v9471_v30 = vld [vmem:[#allocation6_spill] sm:$0xff]  ;;  %6342 = vmatprep.mubr.msk.bf16.mxu1 %vm1273_vm3, %v5640_v36 }
 0x154   : > { %v4331_v53 = vsel %vm7352_vm4, %v4326_v48, %v8685_v24  ;;  %v4341_v37 = vsel %vm7352_vm4, %v4336_v2, %v4340_v58  ;;  %v4424_v17 = vshll.u32 %v8301_v13, 16  ;;  %6541 = vmatpush3.bf16.msra.mxu1 %v9471_v30  ;;  %v4355_v31 = vsel %vm7352_vm4, %v4350_v16, %v8694_v55  ;;  %v8766_v36 = vld [vmem:[%s7329_s20 + $0x23c] sm:$0x1]  ;;  %v8769_v58 = vld [vmem:[%s7329_s20 + $0x12c] sm:$0xf] }
 0x155   : > { %v4373_v5 = vor.u32 %v4372_v15, %v4369_v29  ;;  %v4383_v51 = vor.u32 %v4382_v28, %v8726_v35  ;;  %v4386_v24 = vshll.u32 %v8729_v40, 16  ;;  %v4365_v13 = vsel %vm7352_vm4, %v4360_v56, %v4364_v47 }
 0x156   : > { %v4397_v25 = vor.u32 %v4396_v10, %v4393_v9  ;;  %v4407_v19 = vor.u32 %v4406_v23, %v8731_v6  ;;  %v4410_v11 = vshll.u32 %v8736_v41, 16  ;;  %v5641_v55 = vcombine.low %v6944_v62, %v6945_v18  ;;  %v6949_v10 = vld [vmem:[%s7329_s20 + $0x184] sm:$0xf] }
 0x157   : > { %v4417_v4 = vrot.slane %v4415_v7, 4  ;;  %v4420_v22 = vrot.slane %v4418_v8, 5  ;;  %v5845_v27 = vcombine.low %v4331_v53, %v4341_v37  ;;  %v5642_v0 = vcombine.low %v6946_v57, %v6947_v34  ;;  %v6951_v8 = vld [vmem:[%s7329_s20 + $0x100] sm:$0xf]  ;;  %v6952_v37 = vld [vmem:[%s7329_s20 + $0x190] sm:$0xf] }
 0x158   : > { %v8763_v44 = vrot.slane %v4424_v17, 5  ;;  %v4430_v26 = vrot.slane %v4428_v49, 4  ;;  %v5846_v52 = vcombine.low %v4355_v31, %v4365_v13  ;;  %v4374_v59 = vrot.slane %v4373_v5, 4  ;;  %v6953_v5 = vld [vmem:[%s7329_s20 + $0x19c] sm:$0xf] }
 0x159   : > { %v4384_v50 = vrot.slane %v4383_v51, 4  ;;  %v4388_v63 = vrot.slane %v4386_v24, 5  ;;  %v4398_v14 = vrot.slane %v4397_v25, 4  ;;  %v4408_v33 = vrot.slane %v4407_v19, 4  ;;  %6495 = vmatmul.mubr.msk.bf16.gmra.mrb[20].mxu0 %vm1273_vm3, %v5845_v27  ;;  %v8797_v24 = vld [vmem:[%s7329_s20 + $0x130] sm:$0xf] }
 0x15a   : > { %v4412_v48 = vrot.slane %v4410_v11, 5  ;;  %v2796_v29 = vshrl.u32 %v8769_v58, 16  ;;  %v4421_v3 = vor.u32 %v4420_v22, %v4417_v4  ;;  %6343 = vmatmul.mubr.msk.bf16.gmra.mrb[4].mxu1 %vm1273_vm3, %v5641_v55  ;;  %v4431_v2 = vor.u32 %v4430_v26, %v8763_v44  ;;  %6498 = vmatprep.mubr.msk.bf16.mxu0 %vm1273_vm3, %v5846_v52  ;;  %v6955_v19 = vld [vmem:[%s7329_s20 + $0x108] sm:$0xf]  ;;  %v6956_v11 = vld [vmem:[%s7329_s20 + $0x10c] sm:$0xf] }
 0x15b   : > { %v4434_v16 = vshll.u32 %v8766_v36, 16  ;;  %6346 = vmatprep.mubr.msk.bf16.mxu1 %vm1273_vm3, %v5642_v0  ;;  %v4379_v47 = vsel %vm7352_vm4, %v4374_v59, %v8726_v35  ;;  %v4389_v56 = vsel %vm7352_vm4, %v4384_v50, %v4388_v63  ;;  %v2799_v15 = vshll.u32 %v8769_v58, 16  ;;  %v6950_v35 = vld [vmem:[%s7329_s20 + $0xfc] sm:$0xf]  ;;  %v6957_v55 = vld [vmem:[%s7329_s20 + $0x180] sm:$0xf] }
 0x15c   : > { %v4403_v28 = vsel %vm7352_vm4, %v4398_v14, %v8731_v6  ;;  %v4413_v9 = vsel %vm7352_vm4, %v4408_v33, %v4412_v48  ;;  %v4750_v23 = vrot.slane %v6949_v10, 5  ;;  %v8790_v7 = vrot.slane %v2796_v29, 4  ;;  %v9472_v27 = vld [vmem:[#allocation21_spill] sm:$0xff]  ;;  %v6958_v34 = vld [vmem:[%s7329_s20 + $0x18c] sm:$0xf] }
 0x15d   : > { %v5643_v49 = vcombine.low %v6950_v35, %v6951_v8  ;;  %v4422_v53 = vrot.slane %v4421_v3, 4  ;;  %v4757_v17 = vrot.slane %v6952_v37, 5  ;;  %v5847_v30 = vcombine.low %v4379_v47, %v4389_v56  ;;  %v6959_v50 = vld [vmem:[%s7329_s20 + $0x198] sm:$0xf]  ;;  %v6960_v29 = vld [vmem:[%s7329_s20 + $0x1a8] sm:$0xf] }
 0x15e   : > { %v4432_v6 = vrot.slane %v4431_v2, 4  ;;  %v4436_v31 = vrot.slane %v4434_v16, 5  ;;  %v4764_v51 = vrot.slane %v6953_v5, 5  ;;  %v2805_v13 = vshll.u32 %v8797_v24, 16  ;;  %v6961_v16 = vld [vmem:[%s7329_s20 + $0x134] sm:$0x1] }
 0x15f   : > { %v2809_v25 = vshrl.u32 %v8797_v24, 16  ;;  %v5644_v62 = vcombine.low %v6955_v19, %v6956_v11  ;;  %v5848_v18 = vcombine.low %v4403_v28, %v4413_v9  ;;  %v5866_v4 = vrot.slane %v6957_v55, 9  ;;  %v6962_v56 = vld [vmem:[%s7329_s20 + $0x114] sm:$0xf]  ;;  %v6963_v28 = vld [vmem:[%s7329_s20 + $0x118] sm:$0xf] }
 0x160   : > { %v4752_v22 = vrot.slane %v4750_v23, 4  ;;  %v4753_v57 = vrot.slane %v9472_v27, 5  ;;  %v5867_v0 = vrot.slane %v6958_v34, 9  ;;  %v4427_v26 = vsel %vm7352_vm4, %v4422_v53, %v8763_v44  ;;  %v6964_v53 = vld [vmem:[%s7329_s20 + $0x1a4] sm:$0xf] }
 0x161   : > { %v4759_v52 = vrot.slane %v4757_v17, 4  ;;  %v4760_v59 = vrot.slane %v8315_v1, 5  ;;  %v5868_v63 = vrot.slane %v6959_v50, 9  ;;  %6499 = vmatmul.mubr.msk.bf16.gmra.mrb[24].mxu0 %vm1273_vm3, %v5847_v30  ;;  %v4437_v14 = vsel %vm7352_vm4, %v4432_v6, %v4436_v31  ;;  %v6965_v6 = vld [vmem:[%s7329_s20 + $0x1b4] sm:$0xf] }
 0x162   : > { %6347 = vmatmul.mubr.msk.bf16.gmra.mrb[8].mxu1 %vm1273_vm3, %v5643_v49  ;;  %v4766_v33 = vrot.slane %v4764_v51, 4  ;;  %v4767_v48 = vrot.slane %v8392_v42, 5  ;;  %v4771_v3 = vrot.slane %v6960_v29, 5  ;;  %v8817_v44 = vrot.slane %v2799_v15, 5  ;;  %6502 = vmatprep.mubr.msk.bf16.mxu0 %vm1273_vm3, %v5848_v18  ;;  %v8860_v18 = vld [vmem:[%s7329_s20 + $0x138] sm:$0xf] }
 0x163   : > { %v8819_v1 = vrot.slane %v2805_v13, 5  ;;  %v8821_v2 = vrot.slane %v2809_v25, 4  ;;  %v2815_v47 = vshll.u32 %v6961_v16, 16  ;;  %6350 = vmatprep.mubr.msk.bf16.mxu1 %vm1273_vm3, %v5644_v62  ;;  %v5645_v42 = vcombine.low %v6962_v56, %v6963_v28  ;;  %v6967_v13 = vld [vmem:[%s7329_s20 + $0x124] sm:$0xf] }
 0x164   : > { %v4751_v15 = vsel %vm7621_vm7, %v5866_v4, %v4750_v23  ;;  %v4754_v9 = vsel %vm7621_vm7, %v4752_v22, %v4753_v57  ;;  %v8834_v10 = vsel %vm7621_vm7, %v5867_v0, %v4757_v17  ;;  %v5849_v35 = vcombine.low %v4427_v26, %v4437_v14  ;;  %v8868_v4 = vld [vmem:[%s7329_s20 + $0x144] sm:$0xf]  ;;  %v8871_v22 = vld [vmem:[%s7329_s20 + $0x148] sm:$0xf]  ;;  %v8876_v57 = vld [vmem:[%s7329_s20 + $0x150] sm:$0xf] }
 0x165   : > { %v8838_v8 = vsel %vm7621_vm7, %v4759_v52, %v4760_v59  ;;  %v8842_v49 = vsel %vm7621_vm7, %v5868_v63, %v4764_v51  ;;  %v5869_v23 = vrot.slane %v6964_v53, 9  ;;  %v8847_v37 = vsel %vm7621_vm7, %v4766_v33, %v4767_v48  ;;  %v6966_v51 = vld [vmem:[%s7329_s20 + $0x120] sm:$0xf]  ;;  %v8879_v34 = vld [vmem:[%s7329_s20 + $0x154] sm:$0xf] }
 0x166   : > { %v4773_v17 = vrot.slane %v4771_v3, 4  ;;  %v4774_v30 = vrot.slane %v8404_v32, 5  ;;  %v4778_v31 = vrot.slane %v6965_v6, 5  ;;  %v8851_v5 = vrot.slane %v2815_v47, 5  ;;  %v8863_v32 = vld [vmem:[%s7329_s20 + $0x13c] sm:$0xf] }
 0x167   : > { %v5646_v25 = vcombine.low %v6966_v51, %v6967_v13  ;;  %v5883_v19 = vcombine.low %v4751_v15, %v4754_v9  ;;  %v5647_v11 = vcombine.low %v8769_v58, %v8797_v24  ;;  %v5884_v62 = vcombine.low %v8834_v10, %v8838_v8  ;;  %v6974_v59 = vld [vmem:[%s7329_s20 + $0x1b0] sm:$0xf]  ;;  %v6975_v63 = vld [vmem:[%s7329_s20 + $0x1c0] sm:$0xf]  ;;  %v6977_v47 = vld [vmem:[%s7329_s20 + $0x1bc] sm:$0xf] }
 0x168   : > { %v5648_v55 = vcombine.low %v8860_v18, %v8863_v32  ;;  %v5649_v27 = vcombine.low %v8868_v4, %v8871_v22  ;;  %v5650_v0 = vcombine.low %v8876_v57, %v8879_v34  ;;  %v5885_v26 = vcombine.low %v8842_v49, %v8847_v37  ;;  %v8903_v9 = vld [vmem:[%s7329_s20 + $0x160] sm:$0xf]  ;;  %v8912_v53 = vld [vmem:[%s7329_s20 + $0x16c] sm:$0xf]  ;;  %v6988_v24 = vld [vmem:[%s7329_s20 + $0x128] sm:$0x1] }
 0x169   : > { %v8887_v52 = vsel %vm7621_vm7, %v5869_v23, %v4771_v3  ;;  %v5870_v50 = vrot.slane %v6974_v59, 9  ;;  %v4785_v14 = vrot.slane %v6975_v63, 5  ;;  %6503 = vmatmul.mubr.msk.bf16.gmra.mrb[28].mxu0 %vm1273_vm3, %v5849_v35  ;;  %v8895_v33 = vsel %vm7621_vm7, %v4773_v17, %v4774_v30  ;;  %v6976_v3 = vld [vmem:[%s7329_s20 + $0x1cc] sm:$0xf]  ;;  %v8906_v35 = vld [vmem:[%s7329_s20 + $0x15c] sm:$0xf] }
 0x16a   : > { %6351 = vmatmul.mubr.msk.bf16.gmra.mrb[12].mxu1 %vm1273_vm3, %v5645_v42  ;;  %v4780_v48 = vrot.slane %v4778_v31, 4  ;;  %v4781_v29 = vrot.slane %v8450_v46, 5  ;;  %v4792_v16 = vrot.slane %v6976_v3, 5  ;;  %6508 = vmatprep.mubr.msk.bf16.mxu0 %vm1273_vm3, %v5883_v19  ;;  %v5871_v56 = vrot.slane %v6977_v47, 9  ;;  %v8915_v23 = vld [vmem:[%s7329_s20 + $0x168] sm:$0xf] }
 0x16b   : > { %6354 = vmatprep.mubr.msk.bf16.mxu1 %vm1273_vm3, %v5646_v25  ;;  %v2772_v28 = vshrl.u32 %v6966_v51, 16  ;;  %v2775_v42 = vshll.u32 %v6966_v51, 16  ;;  %v2781_v15 = vshll.u32 %v6967_v13, 16  ;;  %v4788_v49 = vrot.slane %v8491_v21, 5  ;;  %v6982_v25 = vld [vmem:[%s7329_s20 + $0x1c8] sm:$0xf] }
 0x16c   : > { %v2785_v17 = vshrl.u32 %v6967_v13, 16  ;;  %v5886_v30 = vcombine.low %v8887_v52, %v8895_v33  ;;  %v8923_v6 = vsel %vm7621_vm7, %v5870_v50, %v4778_v31  ;;  %v4787_v51 = vrot.slane %v4785_v14, 4  ;;  %v6983_v63 = vld [vmem:[%s7329_s20 + $0x1d8] sm:$0xf]  ;;  %v6984_v46 = vld [vmem:[%s7329_s20 + $0x1e4] sm:$0xf] }
 0x16d   : > { %v5872_v19 = vrot.slane %v6982_v25, 9  ;;  %v8928_v21 = vsel %vm7621_vm7, %v4780_v48, %v4781_v29  ;;  %v4794_v59 = vrot.slane %v4792_v16, 4  ;;  %v4795_v13 = vrot.slane %v8545_v60, 5  ;;  %v6989_v8 = vld [vmem:[%s7329_s20 + $0x1e0] sm:$0xf] }
 0x16e   : > { %v4799_v3 = vrot.slane %v6983_v63, 5  ;;  %v8934_v47 = vsel %vm7621_vm7, %v5871_v56, %v4785_v14  ;;  %v2774_v31 = vrot.slane %v2772_v28, 4  ;;  %v2777_v50 = vrot.slane %v2775_v42, 5  ;;  %v8950_v56 = vld [vmem:[%s7329_s20 + $0x178] sm:$0xf] }
 0x16f   : > { %v8936_v37 = vrot.slane %v2781_v15, 5  ;;  %v2787_v25 = vrot.slane %v2785_v17, 4  ;;  %v4806_v48 = vrot.slane %v6984_v46, 5  ;;  %v2802_v29 = vor.u32 %v8817_v44, %v8790_v7  ;;  %v8953_v28 = vld [vmem:[%s7329_s20 + $0x174] sm:$0xf] }
 0x170   : > { %v2812_v60 = vor.u32 %v8821_v2, %v8819_v1  ;;  %v5887_v63 = vcombine.low %v8923_v6, %v8928_v21  ;;  %v8947_v14 = vsel %vm7621_vm7, %v4787_v51, %v4788_v49  ;;  %v5653_v42 = vcombine.low %v8953_v28, %v8950_v56  ;;  %v6987_v7 = vld [vmem:[%s7329_s20 + $0x1d4] sm:$0xf]  ;;  %v6991_v52 = vld [vmem:[%s7329_s20 + $0x1ec] sm:$0xf] }
 0x171   : > { %v5873_v44 = vrot.slane %v6987_v7, 9  ;;  %6509 = vmatmul.mubr.msk.bf16.vlgmr.msra.gmra.mrb[0].mxu0 %vm1273_vm3, %v5884_v62  ;;  %v8968_v2 = vsel %vm7621_vm7, %v5872_v19, %v4792_v16  ;;  %v8972_v15 = vsel %vm7621_vm7, %v4794_v59, %v4795_v13  ;;  %v4801_v46 = vrot.slane %v4799_v3, 4 }
 0x172   : > { %6355 = vmatmul.mubr.msk.bf16.gmra.mrb[16].mxu1 %vm1273_vm3, %v5647_v11  ;;  %v4802_v49 = vrot.slane %v8575_v43, 5  ;;  %6512 = vmatprep.mubr.msk.bf16.mxu0 %vm1273_vm3, %v5885_v26  ;;  %v2778_v58 = vor.u32 %v2777_v50, %v2774_v31  ;;  %v2791_v10 = vshll.u32 %v6988_v24, 16  ;;  %v5874_v11 = vrot.slane %v6989_v8, 9  ;;  %v6992_v8 = vld [vmem:[%s7329_s20 + $0x140] sm:$0x1] }
 0x173   : > { %6358 = vmatprep.mubr.msk.bf16.mxu1 %vm1273_vm3, %v5648_v55  ;;  %v4809_v62 = vrot.slane %v8582_v12, 5  ;;  %v2788_v16 = vor.u32 %v2787_v25, %v8936_v37  ;;  %v4808_v17 = vrot.slane %v4806_v48, 4  ;;  %v2803_v6 = vrot.slane %v2802_v29, 4 }
 0x174   : > { %v2813_v43 = vrot.slane %v2812_v60, 4  ;;  %v2820_v51 = vshrl.u32 %v8860_v18, 16  ;;  %v2823_v19 = vshll.u32 %v8860_v18, 16  ;;  %v2829_v55 = vshll.u32 %v8863_v32, 16 }
 0x175   : > { %v2833_v26 = vshrl.u32 %v8863_v32, 16  ;;  %v5888_v21 = vcombine.low %v8934_v47, %v8947_v14  ;;  %v5889_v12 = vcombine.low %v8968_v2, %v8972_v15  ;;  %v8994_v59 = vsel %vm7621_vm7, %v5873_v44, %v4799_v3  ;;  %v6990_v32 = vld [vmem:[%s7329_s20 + $0x1f0] sm:$0xf] }
 0x176   : > { %v8998_v13 = vsel %vm7621_vm7, %v4801_v46, %v4802_v49  ;;  %v2779_v31 = vrot.slane %v2778_v58, 4  ;;  %v2793_v18 = vrot.slane %v2791_v10, 5  ;;  %v9002_v50 = vsel %vm7621_vm7, %v5874_v11, %v4806_v48 }
 0x177   : > { %v4813_v25 = vrot.slane %v6990_v32, 5  ;;  %v2789_v47 = vrot.slane %v2788_v16, 4  ;;  %v9007_v29 = vsel %vm7621_vm7, %v4808_v17, %v4809_v62  ;;  %v2808_v3 = vsel %vm7352_vm4, %v2803_v6, %v8819_v1 }
 0x178   : > { %v2818_v60 = vsel %vm7352_vm4, %v2813_v43, %v8851_v5  ;;  %v2822_v14 = vrot.slane %v2820_v51, 4  ;;  %v2825_v7 = vrot.slane %v2823_v19, 5  ;;  %v9015_v48 = vrot.slane %v2829_v55, 5 }
 0x179   : > { %v2835_v44 = vrot.slane %v2833_v26, 4  ;;  %6513 = vmatmul.mubr.msk.bf16.gmra.mrb[4].mxu0 %vm1273_vm3, %v5886_v30  ;;  %v2844_v1 = vshrl.u32 %v8868_v4, 16  ;;  %v2847_v46 = vshll.u32 %v8868_v4, 16  ;;  %v2853_v5 = vshll.u32 %v8871_v22, 16 }
 0x17a   : > { %6359 = vmatmul.mubr.msk.bf16.gmra.mrb[20].mxu1 %vm1273_vm3, %v5649_v27  ;;  %v2857_v49 = vshrl.u32 %v8871_v22, 16  ;;  %6516 = vmatprep.mubr.msk.bf16.mxu0 %vm1273_vm3, %v5887_v63  ;;  %v5890_v27 = vcombine.low %v8994_v59, %v8998_v13  ;;  %v2784_v4 = vsel %vm7352_vm4, %v2779_v31, %v8936_v37  ;;  %v5875_v33 = vrot.slane %v6991_v52, 9  ;;  %v6993_v37 = vld [vmem:[%s7329_s20 + $0x1fc] sm:$0xf]  ;;  %v6994_v31 = vld [vmem:[%s7329_s20 + $0x1f8] sm:$0xf] }
 0x17b   : > { %6362 = vmatprep.mubr.msk.bf16.mxu1 %vm1273_vm3, %v5650_v0  ;;  %v4816_v30 = vrot.slane %v8630_v38, 5  ;;  %v2794_v22 = vsel %vm7352_vm4, %v2789_v47, %v2793_v18  ;;  %v5891_v58 = vcombine.low %v9002_v50, %v9007_v29  ;;  %v9045_v0 = vcombine.low %v2808_v3, %v2818_v60 }
 0x17c   : > { %v4815_v63 = vrot.slane %v4813_v25, 4  ;;  %v2826_v24 = vor.u32 %v2825_v7, %v2822_v14  ;;  %v2836_v10 = vor.u32 %v2835_v44, %v9015_v48  ;;  %v2839_v11 = vshll.u32 %v6992_v8, 16  ;;  %v6995_v14 = vld [vmem:[%s7329_s20 + $0x14c] sm:$0x1] }
 0x17d   : > { %v4820_v62 = vrot.slane %v6993_v37, 5  ;;  %v2846_v16 = vrot.slane %v2844_v1, 4  ;;  %v2849_v38 = vrot.slane %v2847_v46, 5  ;;  %v9050_v17 = vrot.slane %v2853_v5, 5 }
 0x17e   : > { %v2859_v6 = vrot.slane %v2857_v49, 4  ;;  %v5679_v43 = vcombine.low %v2784_v4, %v2794_v22  ;;  %v9054_v51 = vsel %vm7621_vm7, %v5875_v33, %v4813_v25  ;;  %v2868_v19 = vshrl.u32 %v8876_v57, 16  ;;  %v6997_v49 = vld [vmem:[%s7329_s20 + $0x208] sm:$0xf] }
 0x17f   : > { %v2871_v55 = vshll.u32 %v8876_v57, 16  ;;  %v9060_v26 = vsel %vm7621_vm7, %v4815_v63, %v4816_v30  ;;  %v5876_v18 = vrot.slane %v6994_v31, 9  ;;  %v2877_v32 = vshll.u32 %v8879_v34, 16 }
 0x180   : > { %v2881_v47 = vshrl.u32 %v8879_v34, 16  ;;  %v9065_v3 = vrot.slane %v2826_v24, 4  ;;  %v4822_v25 = vrot.slane %v4820_v62, 4  ;;  %v4823_v60 = vrot.slane %v8641_v45, 5  ;;  %v6996_v45 = vld [vmem:[%s7329_s20 + $0x204] sm:$0xf] }
 0x181   : > { %v2863_v7 = vshll.u32 %v6995_v14, 16  ;;  %v9473_v57 = vcombine.low %v8906_v35, %v8903_v9  ;;  %6517 = vmatmul.mubr.msk.bf16.gmra.mrb[8].mxu0 %vm1273_vm3, %v5888_v21  ;;  %v9074_v44 = vrot.slane %v2836_v10, 4  ;;  %v9076_v1 = vrot.slane %v2839_v11, 5  ;;  %v6998_v10 = vld [vmem:[%s7329_s20 + $0x214] sm:$0xf] }
 0x182   : > { %v2850_v34 = vor.u32 %v2849_v38, %v2846_v16  ;;  %v2860_v46 = vor.u32 %v2859_v6, %v9050_v17  ;;  %v9474_v5 = vcombine.low %v8915_v23, %v8912_v53  ;;  %6520 = vmatprep.mubr.msk.bf16.mxu0 %vm1273_vm3, %v5889_v12  ;;  %v5877_v21 = vrot.slane %v6996_v45, 9 }
 0x183   : > { %6363 = vmatmul.mubr.msk.bf16.gmra.mrb[24].mxu1 %vm1273_vm3, %v9473_v57  ;;  %v4827_v4 = vrot.slane %v6997_v49, 5  ;;  %v2870_v52 = vrot.slane %v2868_v19, 4  ;;  %v2873_v33 = vrot.slane %v2871_v55, 5  ;;  %v5892_v30 = vcombine.low %v9054_v51, %v9060_v26  ;;  %v6999_v19 = vld [vmem:[%s7329_s20 + $0x158] sm:$0x1] }
 0x184   : > { %6366 = vmatprep.mubr.msk.bf16.mxu1 %vm1273_vm3, %v9474_v5  ;;  %v9093_v22 = vsel %vm7621_vm7, %v5876_v18, %v4820_v62  ;;  %v9095_v63 = vrot.slane %v2877_v32, 5  ;;  %v2883_v24 = vrot.slane %v2881_v47, 4  ;;  %v2832_v2 = vsel %vm7352_vm4, %v9065_v3, %v9015_v48  ;;  %v7000_v18 = vld [vmem:[%s7329_s20 + $0x210] sm:$0xf] }
 0x185   : > { %v9103_v15 = vsel %vm7621_vm7, %v4822_v25, %v4823_v60  ;;  %v2865_v12 = vrot.slane %v2863_v7, 5  ;;  %v4834_v8 = vrot.slane %v6998_v10, 5  ;;  %v2842_v11 = vsel %vm7352_vm4, %v9074_v44, %v9076_v1 }
 0x186   : > { %v2851_v37 = vrot.slane %v2850_v34, 4  ;;  %v2861_v62 = vrot.slane %v2860_v46, 4  ;;  %v4830_v16 = vrot.slane %v8683_v54, 5  ;;  %v9113_v38 = vsel %vm7621_vm7, %v5877_v21, %v4827_v4 }
 0x187   : > { %v4829_v48 = vrot.slane %v4827_v4, 4  ;;  %v2874_v6 = vor.u32 %v2873_v33, %v2870_v52  ;;  %v2887_v55 = vshll.u32 %v6999_v19, 16  ;;  %v2884_v31 = vor.u32 %v2883_v24, %v9095_v63  ;;  %v7001_v24 = vld [vmem:[%s7329_s20 + $0x164] sm:$0x1] }
 0x188   : > { %v5878_v32 = vrot.slane %v7000_v18, 9  ;;  %v2892_v47 = vshrl.u32 %v8906_v35, 16  ;;  %v2895_v3 = vshll.u32 %v8906_v35, 16  ;;  %v4836_v25 = vrot.slane %v4834_v8, 4 }
 0x189   : > { %v4837_v60 = vrot.slane %v8692_v61, 5  ;;  %v2901_v54 = vshll.u32 %v8903_v9, 16  ;;  %v2905_v14 = vshrl.u32 %v8903_v9, 16  ;;  %6521 = vmatmul.mubr.msk.bf16.gmra.mrb[12].mxu0 %vm1273_vm3, %v5890_v27  ;;  %v2916_v7 = vshrl.u32 %v8915_v23, 16 }
 0x18a   : > { %v2919_v35 = vshll.u32 %v8915_v23, 16  ;;  %v2925_v61 = vshll.u32 %v8912_v53, 16  ;;  %v2929_v57 = vshrl.u32 %v8912_v53, 16  ;;  %6524 = vmatprep.mubr.msk.bf16.mxu0 %vm1273_vm3, %v5891_v58  ;;  %v2856_v9 = vsel %vm7352_vm4, %v2851_v37, %v9050_v17 }
 0x18b   : > { %6367 = vmatmul.mubr.msk.bf16.gmra.mrb[28].mxu1 %vm1273_vm3, %v5653_v42  ;;  %v2866_v42 = vsel %vm7352_vm4, %v2861_v62, %v2865_v12  ;;  %v9147_v23 = vsel %vm7621_vm7, %v4829_v48, %v4830_v16  ;;  %v2889_v59 = vrot.slane %v2887_v55, 5  ;;  %v2875_v53 = vrot.slane %v2874_v6, 4 }
 0x18c   : > { %6388 = vmatprep.mubr.msk.bf16.mxu1 %vm1273_vm3, %v5679_v43  ;;  %v2885_v13 = vrot.slane %v2884_v31, 4  ;;  %v2894_v27 = vrot.slane %v2892_v47, 4  ;;  %v2897_v43 = vrot.slane %v2895_v3, 5  ;;  %v9151_v50 = vsel %vm7621_vm7, %v5878_v32, %v4834_v8  ;;  %v7003_v8 = vld [vmem:[%s7329_s20 + $0x170] sm:$0x1] }
 0x18d   : > { %v9155_v29 = vsel %vm7621_vm7, %v4836_v25, %v4837_v60  ;;  %v9157_v58 = vrot.slane %v2901_v54, 5  ;;  %v2907_v17 = vrot.slane %v2905_v14, 4  ;;  %v2918_v44 = vrot.slane %v2916_v7, 4  ;;  %v7006_v3 = vld [vmem:[%s7329_s20 + $0x228] sm:$0xf] }
 0x18e   : > { %v2921_v1 = vrot.slane %v2919_v35, 5  ;;  %v9159_v34 = vrot.slane %v2925_v61, 5  ;;  %v2931_v46 = vrot.slane %v2929_v57, 4  ;;  %v5681_v5 = vcombine.low %v2832_v2, %v2842_v11 }
 0x18f   : > { %v5893_v45 = vcombine.low %v9093_v22, %v9103_v15  ;;  %v5682_v21 = vcombine.low %v2856_v9, %v2866_v42  ;;  %v5894_v49 = vcombine.low %v9113_v38, %v9147_v23  ;;  %v2880_v4 = vsel %vm7352_vm4, %v2875_v53, %v9095_v63  ;;  %v7002_v15 = vld [vmem:[%s7329_s20 + $0x220] sm:$0xf]  ;;  %v7004_v63 = vld [vmem:[%s7329_s20 + $0x21c] sm:$0xf]  ;;  %v7005_v38 = vld [vmem:[%s7329_s20 + $0x22c] sm:$0xf] }
 0x190   : > { %v2890_v52 = vsel %vm7352_vm4, %v2885_v13, %v2889_v59  ;;  %v2898_v33 = vor.u32 %v2897_v43, %v2894_v27  ;;  %v2911_v12 = vshll.u32 %v7001_v24, 16  ;;  %v5895_v2 = vcombine.low %v9151_v50, %v9155_v29  ;;  %v7007_v53 = vld [vmem:[%s7329_s20 + $0x17c] sm:$0x1]  ;;  %v7008_v29 = vld [vmem:[%s7329_s20 + $0x238] sm:$0xf] }
 0x191   : > { %v2908_v22 = vor.u32 %v2907_v17, %v9157_v58  ;;  %v4841_v10 = vrot.slane %v7002_v15, 5  ;;  %v2935_v11 = vshll.u32 %v7003_v8, 16  ;;  %6525 = vmatmul.mubr.msk.bf16.gmra.mrb[16].mxu0 %vm1273_vm3, %v5892_v30  ;;  %v5879_v37 = vrot.slane %v7004_v63, 9 }
 0x192   : > { %v2922_v62 = vor.u32 %v2921_v1, %v2918_v44  ;;  %v2932_v16 = vor.u32 %v2931_v46, %v9159_v34  ;;  %v4848_v48 = vrot.slane %v7005_v38, 5  ;;  %6528 = vmatprep.mubr.msk.bf16.mxu0 %vm1273_vm3, %v5893_v45  ;;  %v2940_v6 = vshrl.u32 %v8953_v28, 16 }
 0x193   : > { %6389 = vmatmul.mubr.msk.bf16.vlgmr.msra.gmra.mrb[16].mxu1 %vm1273_vm3, %v9045_v0  ;;  %v2943_v0 = vshll.u32 %v8953_v28, 16  ;;  %v2949_v51 = vshll.u32 %v8950_v56, 16  ;;  %v2953_v26 = vshrl.u32 %v8950_v56, 16  ;;  %v5683_v30 = vcombine.low %v2880_v4, %v2890_v52 }
 0x194   : > { %6392 = vmatprep.mubr.msk.bf16.mxu1 %vm1273_vm3, %v5681_v5  ;;  %v2899_v19 = vrot.slane %v2898_v33, 4  ;;  %v2913_v55 = vrot.slane %v2911_v12, 5  ;;  %v4844_v31 = vrot.slane %v8729_v40, 5  ;;  %v2909_v18 = vrot.slane %v2908_v22, 4  ;;  %v7009_v5 = vld [vmem:[%s7329_s20 + $0x234] sm:$0xf] }
 0x195   : > { %v4843_v32 = vrot.slane %v4841_v10, 4  ;;  %v2937_v47 = vrot.slane %v2935_v11, 5  ;;  %v5880_v25 = vrot.slane %v7006_v3, 9  ;;  %v2923_v60 = vrot.slane %v2922_v62, 4  ;;  %s5985_s20 = sshll.u32 %s5466_s16, 11  ;;  %s5386_s16 = scalar_lea.sflag [#allocation4], %s7308_s8 }
 0x196   : > { %v2933_v54 = vrot.slane %v2932_v16, 4  ;;  %v4850_v14 = vrot.slane %v4848_v48, 4  ;;  %v4851_v28 = vrot.slane %v8736_v41, 5  ;;  %v2942_v7 = vrot.slane %v2940_v6, 4  ;;  %s9306_s27 = scalar_lea.hbm %s9357_s3, %s5985_s20 }
 0x197   : > { %v2945_v35 = vrot.slane %v2943_v0, 5  ;;  %v2951_v61 = vrot.slane %v2949_v51, 5  ;;  %v2955_v56 = vrot.slane %v2953_v26, 4  ;;  %v2904_v57 = vsel %vm7352_vm4, %v2899_v19, %v9157_v58  ;;  %v9245_v19 = vld [vmem:[%s9356_s2] ss:$0 sm:$0xff] }
 0x198   : > { %v2914_v40 = vsel %vm7352_vm4, %v2909_v18, %v2913_v55  ;;  %v4842_v9 = vsel %vm7621_vm7, %v5879_v37, %v4841_v10  ;;  %v4845_v42 = vsel %vm7621_vm7, %v4843_v32, %v4844_v31  ;;  %v2928_v41 = vsel %vm7352_vm4, %v2923_v60, %v9159_v34 }
 0x199   : > { %6529 = vmatmul.mubr.msk.bf16.gmra.mrb[20].mxu0 %vm1273_vm3, %v5894_v49  ;;  %v4849_v23 = vsel %vm7621_vm7, %v5880_v25, %v4848_v48  ;;  %v4852_v59 = vsel %vm7621_vm7, %v4850_v14, %v4851_v28  ;;  %v2959_v13 = vshll.u32 %v7007_v53, 16  ;;  %v2938_v27 = vsel %vm7352_vm4, %v2933_v54, %v2937_v47 }
 0x19a   : > { %6532 = vmatprep.mubr.msk.bf16.mxu0 %vm1273_vm3, %v5895_v2  ;;  %v2946_v43 = vor.u32 %v2945_v35, %v2942_v7  ;;  %v2956_v50 = vor.u32 %v2955_v56, %v2951_v61  ;;  %v4855_v58 = vrot.slane %v7008_v29, 5  ;;  %v5684_v17 = vcombine.low %v2904_v57, %v2914_v40 }
 0x19b   : > { %6393 = vmatmul.mubr.msk.bf16.gmra.mrb[20].mxu1 %vm1273_vm3, %v5682_v21  ;;  %v5896_v44 = vcombine.low %v4842_v9, %v4845_v42  ;;  %v5685_v1 = vcombine.low %v2928_v41, %v2938_v27  ;;  %v5897_v34 = vcombine.low %v4849_v23, %v4852_v59  ;;  %v2961_v46 = vrot.slane %v2959_v13, 5 }
 0x19c   : > { %6396 = vmatprep.mubr.msk.bf16.mxu1 %vm1273_vm3, %v5683_v30  ;;  %v5881_v45 = vrot.slane %v7009_v5, 9  ;;  %v2947_v21 = vrot.slane %v2946_v43, 4  ;;  %v2957_v49 = vrot.slane %v2956_v50, 4  ;;  %v4857_v4 = vrot.slane %v4855_v58, 4 }
 0x19d   : > { %v4858_v52 = vrot.slane %v8766_v36, 5 }
 0x19e   : > { %v4856_v33 = vsel %vm7621_vm7, %v5881_v45, %v4855_v58  ;;  %v2952_v24 = vsel %vm7352_vm4, %v2947_v21, %v2951_v61  ;;  %v2962_v12 = vsel %vm7352_vm4, %v2957_v49, %v2961_v46 }
 0x19f   : > { %v4859_v36 = vsel %vm7621_vm7, %v4857_v4, %v4858_v52  ;;  %v5686_v2 = vcombine.low %v2952_v24, %v2962_v12 }
 0x1a0   : > { %v5898_v22 = vcombine.low %v4856_v33, %v4859_v36 }
 0x1a1   : > { %6533 = vmatmul.mubr.msk.bf16.gmra.mrb[24].mxu0 %vm1273_vm3, %v5896_v44 }
 0x1a2   : > { %6536 = vmatprep.mubr.msk.bf16.mxu0 %vm1273_vm3, %v5897_v34 }
 0x1a3   : > { %6397 = vmatmul.mubr.msk.bf16.gmra.mrb[24].mxu1 %vm1273_vm3, %v5684_v17 }
 0x1a4   : > { %6400 = vmatprep.mubr.msk.bf16.mxu1 %vm1273_vm3, %v5685_v1 }
 0x1a9   : > { %6537 = vmatmul.mubr.msk.bf16.gmra.mrb[28].mxu0 %vm1273_vm3, %v5898_v22 }
 0x1ab   : > { %6401 = vmatmul.mubr.msk.bf16.gmra.mrb[28].mxu1 %vm1273_vm3, %v5686_v2 }
 0x225   : > { %v6340_v15 = vpop.f32.mrb[0].mxu1 }
 0x226   : > { %v2420_v10 = vpop.f32.mrb[1].mxu1 }
 0x227   : > { %v6341_v8 = vpop.f32.mrb[2].mxu1 }
 0x228   : > { %v2423_v11 = vpop.f32.mrb[3].mxu1 }
 0x22d   : > { %v6344_v63 = vpop.f32.mrb[4].mxu1 }
 0x22e   : > { %v2436_v37 = vpop.f32.mrb[5].mxu1 }
 0x22f   : > { %v6345_v62 = vpop.f32.mrb[6].mxu1 }
 0x230   : > { %v2439_v16 = vpop.f32.mrb[7].mxu1 }
 0x235   : > { %v6348_v38 = vpop.f32.mrb[8].mxu1 }
 0x236   : > { %v2452_v39 = vpop.f32.mrb[9].mxu1 }
 0x237   : > { %v6349_v48 = vpop.f32.mrb[10].mxu1 }
 0x238   : > { %v2455_v6 = vpop.f32.mrb[11].mxu1 }
 0x23d   : > { %v9234_v20 = vpop.f32.mrb[12].mxu1 }
 0x23e   : > { %v9236_v0 = vpop.f32.mrb[13].mxu1 }
 0x23f   : > { %v9238_v51 = vpop.f32.mrb[14].mxu1 }
 0x240   : > { %v9240_v26 = vpop.f32.mrb[15].mxu1 }
 0x244   : > { %v6510_v30 = vpop.f32.mrb[0].mxu0 }
 0x245   : > { %v6542_v55 = vadd.f32 %v6510_v30, %v6340_v15  ;;  %v4995_v31 = vpop.f32.mrb[1].mxu0 }
 0x246   : > { %v6543_v18 = vadd.f32 %v4995_v31, %v2420_v10  ;;  %v6511_v32 = vpop.f32.mrb[2].mxu0 }
 0x247   : > { %v5163_v47 = vadd.f32 %v6542_v55, %v9245_v19  ;;  %v6544_v3 = vadd.f32 %v6511_v32, %v6341_v8  ;;  %v4998_v25 = vpop.f32.mrb[3].mxu0 }
 0x248   : > { %v5161_v60 = vadd.f32 %v6543_v18, %v9245_v19  ;;  %v6545_v54 = vadd.f32 %v4998_v25, %v2423_v11 }
 0x249   : > { %v5164_v14 = vadd.f32 %v6544_v3, %v9245_v19  ;;  %v5195_v7 = vmax.f32 %v5163_v47, 0.0 }
 0x24a   : > { %v5162_v28 = vadd.f32 %v6545_v54, %v9245_v19  ;;  %v5193_v61 = vmax.f32 %v5161_v60, 0.0 }
 0x24b   : > { %v5196_v35 = vmax.f32 %v5164_v14, 0.0 }
 0x24c   : > { %v5194_v56 = vmax.f32 %v5162_v28, 0.0  ;;  %v6514_v57 = vpop.f32.mrb[4].mxu0 }
 0x24d   : > { %v5994_v40 = vpack.c.bf16 %v5196_v35, %v5195_v7  ;;  %v6546_v9 = vadd.f32 %v6514_v57, %v6344_v63  ;;  %v5011_v42 = vpop.f32.mrb[5].mxu0 }
 0x24e   : > { %v5989_v41 = vpack.c.bf16 %v5194_v56, %v5193_v61  ;;  %v6547_v23 = vadd.f32 %v5011_v42, %v2436_v37  ;;  %v6515_v59 = vpop.f32.mrb[6].mxu0 }
 0x24f   : > { %6066 = vst [vmem:[%s9252_s19 + $0x8] sm:$0xff] %v5994_v40   ;;  %v5167_v53 = vadd.f32 %v6546_v9, %v9245_v19  ;;  %v6548_v13 = vadd.f32 %v6515_v59, %v6345_v62  ;;  %v5014_v27 = vpop.f32.mrb[7].mxu0 }
 0x250   : > { %5990 = vst [vmem:[%s9252_s19] sm:$0xff] %v5989_v41   ;;  %v5165_v43 = vadd.f32 %v6547_v23, %v9245_v19  ;;  %v6549_v50 = vadd.f32 %v5014_v27, %v2439_v16 }
 0x251   : > { %v5168_v29 = vadd.f32 %v6548_v13, %v9245_v19  ;;  %v5199_v17 = vmax.f32 %v5167_v53, 0.0 }
 0x252   : > { %v5166_v58 = vadd.f32 %v6549_v50, %v9245_v19  ;;  %v5197_v1 = vmax.f32 %v5165_v43, 0.0 }
 0x253   : > { %v5200_v44 = vmax.f32 %v5168_v29, 0.0 }
 0x254   : > { %v5198_v34 = vmax.f32 %v5166_v58, 0.0  ;;  %v6518_v46 = vpop.f32.mrb[8].mxu0 }
 0x255   : > { %v6004_v5 = vpack.c.bf16 %v5200_v44, %v5199_v17  ;;  %v6550_v45 = vadd.f32 %v6518_v46, %v6348_v38  ;;  %v5027_v21 = vpop.f32.mrb[9].mxu0 }
 0x256   : > { %v5999_v49 = vpack.c.bf16 %v5198_v34, %v5197_v1  ;;  %v6551_v4 = vadd.f32 %v5027_v21, %v2452_v39  ;;  %v6519_v52 = vpop.f32.mrb[10].mxu0 }
 0x257   : > { %6068 = vst [vmem:[%s9252_s19 + $0x18] sm:$0xff] %v6004_v5   ;;  %v5171_v33 = vadd.f32 %v6550_v45, %v9245_v19  ;;  %v6552_v24 = vadd.f32 %v6519_v52, %v6349_v48  ;;  %v5030_v12 = vpop.f32.mrb[11].mxu0 }
 0x258   : > { %6067 = vst [vmem:[%s9252_s19 + $0x10] sm:$0xff] %v5999_v49   ;;  %v5169_v36 = vadd.f32 %v6551_v4, %v9245_v19  ;;  %v6553_v2 = vadd.f32 %v5030_v12, %v2455_v6 }
 0x259   : > { %v5172_v22 = vadd.f32 %v6552_v24, %v9245_v19  ;;  %v5203_v10 = vmax.f32 %v5171_v33, 0.0 }
 0x25a   : > { %v5170_v15 = vadd.f32 %v6553_v2, %v9245_v19  ;;  %v5201_v11 = vmax.f32 %v5169_v36, 0.0 }
 0x25b   : > { %v5204_v8 = vmax.f32 %v5172_v22, 0.0 }
 0x25c   : > { %v5202_v63 = vmax.f32 %v5170_v15, 0.0  ;;  %v6522_v37 = vpop.f32.mrb[12].mxu0 }
 0x25d   : > { %v6014_v62 = vpack.c.bf16 %v5204_v8, %v5203_v10  ;;  %v6554_v16 = vadd.f32 %v6522_v37, %v9234_v20  ;;  %v5043_v38 = vpop.f32.mrb[13].mxu0 }
 0x25e   : > { %v6009_v39 = vpack.c.bf16 %v5202_v63, %v5201_v11  ;;  %v6555_v48 = vadd.f32 %v5043_v38, %v9236_v0  ;;  %v6523_v30 = vpop.f32.mrb[14].mxu0 }
 0x25f   : > { %6070 = vst [vmem:[%s9252_s19 + $0x28] sm:$0xff] %v6014_v62   ;;  %v5175_v6 = vadd.f32 %v6554_v16, %v9245_v19  ;;  %v6556_v55 = vadd.f32 %v6523_v30, %v9238_v51  ;;  %v5046_v31 = vpop.f32.mrb[15].mxu0 }
 0x260   : > { %6069 = vst [vmem:[%s9252_s19 + $0x20] sm:$0xff] %v6009_v39   ;;  %v5173_v18 = vadd.f32 %v6555_v48, %v9245_v19  ;;  %v6557_v32 = vadd.f32 %v5046_v31, %v9240_v26 }
 0x261   : > { %v5176_v47 = vadd.f32 %v6556_v55, %v9245_v19  ;;  %v5207_v3 = vmax.f32 %v5175_v6, 0.0 }
 0x262   : > { %v5174_v20 = vadd.f32 %v6557_v32, %v9245_v19  ;;  %v5205_v0 = vmax.f32 %v5173_v18, 0.0 }
 0x263   : > { %v5208_v25 = vmax.f32 %v5176_v47, 0.0 }
 0x264   : > { %v5206_v60 = vmax.f32 %v5174_v20, 0.0  ;;  %v6526_v14 = vpop.f32.mrb[16].mxu0 }
 0x265   : > { %v6024_v28 = vpack.c.bf16 %v5208_v25, %v5207_v3  ;;  %v5059_v35 = vpop.f32.mrb[17].mxu0 }
 0x266   : > { %v6390_v54 = vpop.f32.mrb[16].mxu1  ;;  %v6019_v61 = vpack.c.bf16 %v5206_v60, %v5205_v0  ;;  %v6527_v26 = vpop.f32.mrb[18].mxu0 }
 0x267   : > { %v6558_v51 = vadd.f32 %v6526_v14, %v6390_v54  ;;  %v3162_v7 = vpop.f32.mrb[17].mxu1  ;;  %6072 = vst [vmem:[%s9252_s19 + $0x38] sm:$0xff] %v6024_v28   ;;  %v5062_v41 = vpop.f32.mrb[19].mxu0 }
 0x268   : > { %v6559_v56 = vadd.f32 %v5059_v35, %v3162_v7  ;;  %v6391_v57 = vpop.f32.mrb[18].mxu1  ;;  %6071 = vst [vmem:[%s9252_s19 + $0x30] sm:$0xff] %v6019_v61  }
 0x269   : > { %v5179_v40 = vadd.f32 %v6558_v51, %v9245_v19  ;;  %v6560_v9 = vadd.f32 %v6527_v26, %v6391_v57  ;;  %v3165_v42 = vpop.f32.mrb[19].mxu1 }
 0x26a   : > { %v5177_v23 = vadd.f32 %v6559_v56, %v9245_v19  ;;  %v6561_v59 = vadd.f32 %v5062_v41, %v3165_v42 }
 0x26b   : > { %v5180_v53 = vadd.f32 %v6560_v9, %v9245_v19  ;;  %v5211_v27 = vmax.f32 %v5179_v40, 0.0 }
 0x26c   : > { %v5178_v13 = vadd.f32 %v6561_v59, %v9245_v19  ;;  %v5209_v50 = vmax.f32 %v5177_v23, 0.0  ;;  %v6530_v17 = vpop.f32.mrb[20].mxu0 }
 0x26d   : > { %v5212_v43 = vmax.f32 %v5180_v53, 0.0  ;;  %v5075_v46 = vpop.f32.mrb[21].mxu0 }
 0x26e   : > { %v5210_v29 = vmax.f32 %v5178_v13, 0.0  ;;  %v6394_v58 = vpop.f32.mrb[20].mxu1  ;;  %v6531_v49 = vpop.f32.mrb[22].mxu0 }
 0x26f   : > { %v6034_v44 = vpack.c.bf16 %v5212_v43, %v5211_v27  ;;  %v6562_v1 = vadd.f32 %v6530_v17, %v6394_v58  ;;  %v3178_v34 = vpop.f32.mrb[21].mxu1  ;;  %v5078_v24 = vpop.f32.mrb[23].mxu0 }
 0x270   : > { %v6029_v5 = vpack.c.bf16 %v5210_v29, %v5209_v50  ;;  %v6563_v45 = vadd.f32 %v5075_v46, %v3178_v34  ;;  %v6395_v21 = vpop.f32.mrb[22].mxu1 }
 0x271   : > { %6074 = vst [vmem:[%s9252_s19 + $0x48] sm:$0xff] %v6034_v44   ;;  %v5183_v4 = vadd.f32 %v6562_v1, %v9245_v19  ;;  %v6564_v52 = vadd.f32 %v6531_v49, %v6395_v21  ;;  %v3181_v33 = vpop.f32.mrb[23].mxu1 }
 0x272   : > { %6073 = vst [vmem:[%s9252_s19 + $0x40] sm:$0xff] %v6029_v5   ;;  %v5181_v12 = vadd.f32 %v6563_v45, %v9245_v19  ;;  %v6565_v36 = vadd.f32 %v5078_v24, %v3181_v33 }
 0x273   : > { %v5184_v2 = vadd.f32 %v6564_v52, %v9245_v19  ;;  %v5215_v15 = vmax.f32 %v5183_v4, 0.0 }
 0x274   : > { %v5182_v22 = vadd.f32 %v6565_v36, %v9245_v19  ;;  %v5213_v8 = vmax.f32 %v5181_v12, 0.0  ;;  %v6534_v37 = vpop.f32.mrb[24].mxu0 }
 0x275   : > { %v5216_v10 = vmax.f32 %v5184_v2, 0.0  ;;  %v5091_v39 = vpop.f32.mrb[25].mxu0 }
 0x276   : > { %v5214_v11 = vmax.f32 %v5182_v22, 0.0  ;;  %v6398_v63 = vpop.f32.mrb[24].mxu1  ;;  %v6535_v55 = vpop.f32.mrb[26].mxu0 }
 0x277   : > { %v6044_v62 = vpack.c.bf16 %v5216_v10, %v5215_v15  ;;  %v6566_v16 = vadd.f32 %v6534_v37, %v6398_v63  ;;  %v3194_v38 = vpop.f32.mrb[25].mxu1  ;;  %v5094_v47 = vpop.f32.mrb[27].mxu0 }
 0x278   : > { %v6039_v48 = vpack.c.bf16 %v5214_v11, %v5213_v8  ;;  %v6567_v30 = vadd.f32 %v5091_v39, %v3194_v38  ;;  %v6399_v6 = vpop.f32.mrb[26].mxu1 }
 0x279   : > { %6076 = vst [vmem:[%s9252_s19 + $0x58] sm:$0xff] %v6044_v62   ;;  %v5187_v31 = vadd.f32 %v6566_v16, %v9245_v19  ;;  %v6568_v18 = vadd.f32 %v6535_v55, %v6399_v6  ;;  %v3197_v32 = vpop.f32.mrb[27].mxu1 }
 0x27a   : > { %6075 = vst [vmem:[%s9252_s19 + $0x50] sm:$0xff] %v6039_v48   ;;  %v5185_v20 = vadd.f32 %v6567_v30, %v9245_v19  ;;  %v6569_v3 = vadd.f32 %v5094_v47, %v3197_v32 }
 0x27b   : > { %v5188_v25 = vadd.f32 %v6568_v18, %v9245_v19  ;;  %v5219_v60 = vmax.f32 %v5187_v31, 0.0 }
 0x27c   : > { %v5186_v0 = vadd.f32 %v6569_v3, %v9245_v19  ;;  %v5217_v14 = vmax.f32 %v5185_v20, 0.0  ;;  %v6538_v7 = vpop.f32.mrb[28].mxu0 }
 0x27d   : > { %v5220_v54 = vmax.f32 %v5188_v25, 0.0  ;;  %v5107_v57 = vpop.f32.mrb[29].mxu0 }
 0x27e   : > { %v5218_v28 = vmax.f32 %v5186_v0, 0.0  ;;  %v6402_v51 = vpop.f32.mrb[28].mxu1  ;;  %v6539_v42 = vpop.f32.mrb[30].mxu0 }
 0x27f   : > { %v6054_v35 = vpack.c.bf16 %v5220_v54, %v5219_v60  ;;  %v6570_v61 = vadd.f32 %v6538_v7, %v6402_v51  ;;  %v3210_v56 = vpop.f32.mrb[29].mxu1  ;;  %v5110_v53 = vpop.f32.mrb[31].mxu0 }
 0x280   : > { %v6049_v26 = vpack.c.bf16 %v5218_v28, %v5217_v14  ;;  %v6571_v40 = vadd.f32 %v5107_v57, %v3210_v56  ;;  %v6403_v9 = vpop.f32.mrb[30].mxu1 }
 0x281   : > { %6078 = vst [vmem:[%s9252_s19 + $0x68] sm:$0xff] %v6054_v35   ;;  %v5191_v41 = vadd.f32 %v6570_v61, %v9245_v19  ;;  %v6572_v23 = vadd.f32 %v6539_v42, %v6403_v9  ;;  %v3213_v59 = vpop.f32.mrb[31].mxu1 }
 0x282   : > { %6077 = vst [vmem:[%s9252_s19 + $0x60] sm:$0xff] %v6049_v26   ;;  %v5189_v13 = vadd.f32 %v6571_v40, %v9245_v19  ;;  %v6573_v27 = vadd.f32 %v5110_v53, %v3213_v59 }
 0x283   : > { %v5192_v43 = vadd.f32 %v6572_v23, %v9245_v19  ;;  %v5223_v29 = vmax.f32 %v5191_v41, 0.0 }
 0x284   : > { %v5190_v50 = vadd.f32 %v6573_v27, %v9245_v19  ;;  %v5221_v17 = vmax.f32 %v5189_v13, 0.0 }
 0x285   : > { %v5224_v58 = vmax.f32 %v5192_v43, 0.0 }
 0x286   : > { %v5222_v44 = vmax.f32 %v5190_v50, 0.0 }
 0x287   : > { %v6064_v1 = vpack.c.bf16 %v5224_v58, %v5223_v29 }
 0x288   : > { %v6059_v19 = vpack.c.bf16 %v5222_v44, %v5221_v17 }
 0x289   : > { %6080 = vst [vmem:[%s9252_s19 + $0x78] sm:$0xff] %v6064_v1  }
 0x28a   : > { %6079 = vst [vmem:[%s9252_s19 + $0x70] sm:$0xff] %v6059_v19  }
 0x28b   : > { %7023 = shalt.err (!%p7020_p5)
}
 0x28c   : > { %s7024_s5 = scalar_lea.hbm %s9306_s27, 2048  ;;  %s7028_s9 = scalar_lea.hbm %s9357_s3, 4096 }
 0x28d   : > { %p7025_p7 = scmp.ne.s32.totalorder %s9306_s27, %s7024_s5  ;;  %p7029_p12 = scmp.lt.u32.totalorder %s9306_s27, %s9357_s3 }
 0x28e   : > { %p7030_p13 = scmp.lt.u32.totalorder %s7028_s9, %s7024_s5  ;;  %p7032_p1 = scmp.lt.u32.totalorder %s7024_s5, %s9306_s27 }
 0x28f   : > { %p7026_p10 = pnand %p7025_p7, %p7135_p6 }
 0x290   : > { %p7031_p0 = por %p7030_p13, %p7029_p12 }
 0x291   : > { %p7027_p11 = pneg %p7026_p10 }
 0x292   : > { %p7033_p2 = por %p7032_p1, %p7031_p0 }
 0x294   : > { %p7034_p3 = pnand %p7033_p2, %p7027_p11 }
 0x296   : > { %7037 = shalt.err (!%p7034_p3)
}
 0x297   : > { %s7075_s17 = smov 64   ;;  %s7076_s19 = smov 4  }
 0x298   : > { %6811 = dma.vmem_to_hbm [thread:$0]  (%p7135_p6), %s9308_s24, 2048, %s9306_s27, %s5386_s16, %s7075_s17, %s7075_s17, %s7076_s19  }
 0x299 PF: > { %s5414_s20 = sand.u32 1, %s7060_s12   ;;  %p6814_p4 = pnand %p5469_p9, %p7139_p8 }
 0x29a   : > { %s5415_s25 = scalar_lea.sflag [#allocation4], %s5414_s20 }
 0x29b   : > { %7055 = dma.done.wait (!%p6814_p4), %s5415_s25, 2048  }
 0x29c   : > { %7057 = vsyncadd (!%p6814_p4), %s5415_s25, 4294965248  ;;  %p13_p5 = scmp.ge.s32.totalorder %s7120_s18, 4   ;;  %s9475_s12 = smov %s7064_s13 }
 0x29d   : > { %s9476_s13 = smov %s7068_s14  ;;  %s9477_s14 = smov %s7133_s21 }
 0x29e   : > { %s9478_s15 = smov %s7120_s18  ;;  %15 = sbr.rel (!%p13_p5) target bundleno = 3 (0x3), region = 123 }
 0x2a5   :  { %5420 = vsyncpa [#allocation4], 1 }
 0x2a6   :  { %5422 = vsyncpa [#allocation4 + $0x1], 1 }

</bundles_post_ra>
